<compile_context>
chip_gen: v7x
topology: tpu7x:2x2x1
jax: 0.10.0
libtpu: 0.0.40
codegen_flags: <defaults>
</compile_context>

<pallas_src>
import functools

import numpy as np

import jax
import jax.numpy as jnp
from jax import lax
from jax.experimental import pallas as pl
from jax.experimental.pallas import tpu as pltpu


TB = 8                                # images per grid step (= one sublane tile)
VMEM_LIMIT_BYTES = 32 * 1024 * 1024   # ~3 MB actually used; safe on v5e/v6e/v7x


# ------------------------------- fused kernel ------------------------------- #

def _lightnn_kernel(x_ref, t1_ref, b1_ref, t2_ref, b2_ref,
                    w1_ref, fb1_ref, w2_ref, fb2_ref,
                    o_ref, a1_scr, f_scr):
    """Whole LightNN forward for one batch tile of TB images.

    Layout: activations are h-major with the TB images on the sublane axis,
    so conv row windows and 2x2 pool pairs are tile-aligned slices.

      x_ref : [34, TB, 96]   vertically padded input, lane = w*3 + cin
      t1_ref: [3, 96, 512]   conv1 block-Toeplitz (horizontal pad folded in),
                             col = parity*256 + wo*16 + cout
      t2_ref: [3, 256, 256]  conv2 block-Toeplitz, col = parity*128 + wo*16 + cout
      w1_ref: [1024, 256]    fc1 weights, rows permuted to (ho, wo, c) lane order
      w2_ref: [256, 128]     fc2 weights, N padded 10 -> 128
      o_ref : [TB, 128]      logits (padded), full-lane store
      a1_scr: [18, TB, 256]  conv1 pooled output framed by conv2's zero pad rows
      f_scr : [2, TB, 512]   flattened features (one row per conv2 h-chunk)
    """
    f32 = jnp.float32

    # conv2's vertical-pad rows (always zero).
    zpad = jnp.zeros((TB, 256), f32)
    a1_scr[0] = zpad
    a1_scr[17] = zpad

    # ---- conv1 (3x3, SAME) + bias + ReLU + 2x2/2 max-pool, h-chunked -------
    def conv1_chunk(c, carry):
        h0 = c * 8                                      # output rows h0 .. h0+7
        acc = jnp.dot(x_ref[pl.ds(h0, 8), :, :].reshape(8 * TB, 96),
                      t1_ref[0], preferred_element_type=f32)
        for kh in (1, 2):
            lhs = x_ref[pl.ds(h0 + kh, 8), :, :].reshape(8 * TB, 96)
            acc = acc + jnp.dot(lhs, t1_ref[kh], preferred_element_type=f32)
        y = jnp.maximum(acc + b1_ref[...], 0.0)         # [64, 512]
        yh = jnp.maximum(y[:, :256], y[:, 256:])        # horizontal 2x pool -> [64, 256]
        for j in range(4):                              # vertical 2x pool (tile-aligned)
            r0 = 2 * j * TB
            a1_scr[1 + c * 4 + j] = jnp.maximum(yh[r0:r0 + TB],
                                                yh[r0 + TB:r0 + 2 * TB])
        return carry

    lax.fori_loop(0, 4, conv1_chunk, 0)

    # ---- conv2 (3x3, SAME) + bias + ReLU + 2x2/2 max-pool, h-chunked -------
    def conv2_chunk(c, carry):
        h0 = c * 8                                      # output rows h0 .. h0+7
        acc = jnp.dot(a1_scr[pl.ds(h0, 8), :, :].reshape(8 * TB, 256),
                      t2_ref[0], preferred_element_type=f32)
        for kh in (1, 2):
            lhs = a1_scr[pl.ds(h0 + kh, 8), :, :].reshape(8 * TB, 256)
            acc = acc + jnp.dot(lhs, t2_ref[kh], preferred_element_type=f32)
        y = jnp.maximum(acc + b2_ref[...], 0.0)         # [64, 256]
        yh = jnp.maximum(y[:, :128], y[:, 128:])        # [64, 128]
        pieces = []
        for j in range(4):
            r0 = 2 * j * TB
            pieces.append(jnp.maximum(yh[r0:r0 + TB], yh[r0 + TB:r0 + 2 * TB]))
        f_scr[c] = jnp.concatenate(pieces, axis=1)      # [TB, 512]
        return carry

    lax.fori_loop(0, 2, conv2_chunk, 0)

    # ---- classifier: fc1 + ReLU (+ Dropout = identity at eval) + fc2 -------
    feats = jnp.concatenate([f_scr[0], f_scr[1]], axis=1)        # [TB, 1024]
    h1 = jnp.dot(feats, w1_ref[...], preferred_element_type=f32) + fb1_ref[...]
    h1 = jnp.maximum(h1, 0.0)
    out = jnp.dot(h1, w2_ref[...], preferred_element_type=f32) + fb2_ref[...]
    o_ref[...] = out.astype(o_ref.dtype)


# --------------------------------- wrapper ---------------------------------- #

@functools.partial(jax.jit, static_argnames=("num_classes",))
def lightnn_forward(x_nchw, prep, num_classes=10):
    B, Cin, H, W = x_nchw.shape                        # (B, 3, 32, 32)
    assert (Cin, H, W) == (3, 32, 32)
    Bp = -(-B // TB) * TB

    # [B,3,H,W] -> [H, B, W*Cin] (h-major, lane = w*Cin + ci); pad h and batch.
    xh = jnp.transpose(x_nchw, (2, 0, 3, 1)).reshape(H, B, W * Cin)
    xh = jnp.pad(xh, ((1, 1), (0, Bp - B), (0, 0)))    # [34, Bp, 96]

    out = pl.pallas_call(
        _lightnn_kernel,
        out_shape=jax.ShapeDtypeStruct((Bp, 128), jnp.float32),
        grid=(Bp // TB,),
        in_specs=[
            pl.BlockSpec((H + 2, TB, W * Cin), lambda i: (0, i, 0)),  # x tile
            pl.BlockSpec((3, 96, 512), lambda i: (0, 0, 0)),          # t1 (resident)
            pl.BlockSpec((1, 512), lambda i: (0, 0)),                 # conv1 bias
            pl.BlockSpec((3, 256, 256), lambda i: (0, 0, 0)),         # t2 (resident)
            pl.BlockSpec((1, 256), lambda i: (0, 0)),                 # conv2 bias
            pl.BlockSpec((1024, 256), lambda i: (0, 0)),              # fc1 w (resident)
            pl.BlockSpec((1, 256), lambda i: (0, 0)),                 # fc1 b
            pl.BlockSpec((256, 128), lambda i: (0, 0)),               # fc2 w (N padded)
            pl.BlockSpec((1, 128), lambda i: (0, 0)),                 # fc2 b
        ],
        out_specs=pl.BlockSpec((TB, 128), lambda i: (i, 0)),
        scratch_shapes=[pltpu.VMEM((18, TB, 256), jnp.float32),
                        pltpu.VMEM((2, TB, 512), jnp.float32)],
        compiler_params=pltpu.CompilerParams(
            dimension_semantics=("parallel",),
            vmem_limit_bytes=VMEM_LIMIT_BYTES),
    )(xh, prep["t1"], prep["b1"], prep["t2"], prep["b2"],
      prep["w1"], prep["fb1"], prep["w2"], prep["fb2"])
    return out[:B, :num_classes]


# --------------------------- parameter preparation -------------------------- #

def _toeplitz_conv_weights(w_hwio, W):
    """[3,3,Cin,Cout] HWIO conv weights -> [3, W*Cin, 2*(W//2)*Cout].

    Horizontal 'SAME' padding is folded in (out-of-range taps simply absent).
    Column block 0 holds even output-w positions, block 1 odd ones, so the
    kernel's horizontal 2x max-pool is a plain elementwise maximum of halves.
    """
    w_np = np.asarray(w_hwio, np.float32)
    KH, KW, Cin, Cout = w_np.shape
    Wo = W // 2
    t = np.zeros((KH, W * Cin, 2 * Wo * Cout), np.float32)
    for kh in range(KH):
        for kw in range(KW):
            for w_out in range(W):
                w_in = w_out + kw - 1
                if w_in < 0 or w_in >= W:
                    continue                      # horizontal zero pad folded in
                parity, wo = w_out % 2, w_out // 2
                col0 = parity * (Wo * Cout) + wo * Cout
                row0 = w_in * Cin
                t[kh, row0:row0 + Cin, col0:col0 + Cout] = w_np[kh, kw]
    return jnp.asarray(t)


def prepare_params(params):
    """One-time weight preprocessing (outside the per-call hot path)."""
    prep = {
        "t1": _toeplitz_conv_weights(params["conv1_w"], W=32),           # [3, 96, 512]
        "b1": jnp.tile(params["conv1_b"], 2 * 16).reshape(1, 512),
        "t2": _toeplitz_conv_weights(params["conv2_w"], W=16),           # [3, 256, 256]
        "b2": jnp.tile(params["conv2_b"], 2 * 8).reshape(1, 256),
    }
    # fc1: permute rows once so it consumes the kernel's (ho, wo, c) lane order
    # while keeping PyTorch's NCHW flatten semantics.
    Hf = Wf = 8
    Cf = params["conv2_w"].shape[-1]                   # 16
    l = np.arange(Hf * Wf * Cf)
    ho, wo, co = l // (Wf * Cf), (l // Cf) % Wf, l % Cf
    perm = co * (Hf * Wf) + ho * Wf + wo
    prep["w1"] = params["fc1_w"][perm, :]
    prep["fb1"] = params["fc1_b"].reshape(1, -1)
    # fc2: pad N=num_classes -> 128 so the logits store is full-lane; slice later.
    kf, nf = params["fc2_w"].shape
    prep["w2"] = jnp.zeros((kf, 128), jnp.float32).at[:, :nf].set(params["fc2_w"])
    prep["fb2"] = jnp.zeros((1, 128), jnp.float32).at[:, :nf].set(params["fc2_b"])
    return prep


# ------------------------------- parameters --------------------------------- #

def init_params(key, num_classes=10):
    ks = jax.random.split(key, 8)
    n = lambda k, s, sc: sc * jax.random.normal(k, s, jnp.float32)
    return {
        # conv weights stored HWIO; fc weights stored [in, out] (x @ W).
        "conv1_w": n(ks[0], (3, 3, 3, 16), 0.10),
        "conv1_b": n(ks[1], (16,), 0.10),
        "conv2_w": n(ks[2], (3, 3, 16, 16), 0.05),
        "conv2_b": n(ks[3], (16,), 0.05),
        "fc1_w":   n(ks[4], (1024, 256), 0.02),
        "fc1_b":   n(ks[5], (256,), 0.02),
        "fc2_w":   n(ks[6], (256, num_classes), 0.05),
        "fc2_b":   n(ks[7], (num_classes,), 0.05),
    }


# ------------------------------ pure-JAX check ------------------------------- #

def reference_forward(x_nchw, params):
    x = jnp.transpose(x_nchw, (0, 2, 3, 1))

    def conv(x, w, b):
        y = lax.conv_general_dilated(
            x, w, (1, 1), "SAME", dimension_numbers=("NHWC", "HWIO", "NHWC"))
        return jax.nn.relu(y + b)

    def pool(x):
        return lax.reduce_window(x, -jnp.inf, lax.max,
                                 (1, 2, 2, 1), (1, 2, 2, 1), "VALID")

    x = pool(conv(x, params["conv1_w"], params["conv1_b"]))
    x = pool(conv(x, params["conv2_w"], params["conv2_b"]))
    B = x.shape[0]
    x = jnp.transpose(x, (0, 3, 1, 2)).reshape(B, -1)     # NCHW flatten (torch order)
    x = jax.nn.relu(x @ params["fc1_w"] + params["fc1_b"])
    return x @ params["fc2_w"] + params["fc2_b"]


# ---------------------------------- main ------------------------------------- #

if __name__ == "__main__":
    key = jax.random.PRNGKey(0)
    pkey, xkey = jax.random.split(key)
    params = init_params(pkey)
    prep = prepare_params(params)

    # Linear(1024, 256) implies 16 * 8 * 8 features after two 2x pools,
    # i.e. a 32x32x3 (CIFAR-like) input.  B=16 -> 2 batch-tile grid steps.
    x = jax.random.normal(xkey, (16, 3, 32, 32), jnp.float32)

    out = jax.block_until_ready(lightnn_forward(x, prep))
    assert out.shape == (16, 10), out.shape

    ref = reference_forward(x, params)
    max_err = float(jnp.max(jnp.abs(out - ref)))
    assert jnp.allclose(out, ref, rtol=1e-3, atol=1e-3), max_err

    print("KERNEL_OK")
</pallas_src>

<mosaic_0001>
module attributes {stable_mosaic.version = 11 : i64} {
  func.func @_lightnn_kernel(%arg0: i32, %arg1: memref<34x8x96xf32, #tpu.memory_space<vmem>>, %arg2: memref<3x96x512xf32, #tpu.memory_space<vmem>>, %arg3: memref<1x512xf32, #tpu.memory_space<vmem>>, %arg4: memref<3x256x256xf32, #tpu.memory_space<vmem>>, %arg5: memref<1x256xf32, #tpu.memory_space<vmem>>, %arg6: memref<1024x256xf32, #tpu.memory_space<vmem>>, %arg7: memref<1x256xf32, #tpu.memory_space<vmem>>, %arg8: memref<256x128xf32, #tpu.memory_space<vmem>>, %arg9: memref<1x128xf32, #tpu.memory_space<vmem>>, %arg10: memref<8x128xf32, #tpu.memory_space<vmem>>, %arg11: memref<18x8x256xf32, #tpu.memory_space<vmem>>, %arg12: memref<2x8x512xf32, #tpu.memory_space<vmem>>) attributes {dimension_semantics = [#tpu.dimension_semantics<parallel>], iteration_bounds = array<i64: 2>, scalar_prefetch = 0 : i64, scratch_operands = 2 : i64, tpu.core_type = #tpu.core_type<tc>, window_params = [{transform_indices = @transform_0, window_bounds = array<i64: 34, 8, 96>}, {pipeline_mode = #tpu.pipeline_mode<synchronous>, transform_indices = @transform_1, window_bounds = array<i64: 3, 96, 512>}, {pipeline_mode = #tpu.pipeline_mode<synchronous>, transform_indices = @transform_2, window_bounds = array<i64: 1, 512>}, {pipeline_mode = #tpu.pipeline_mode<synchronous>, transform_indices = @transform_3, window_bounds = array<i64: 3, 256, 256>}, {pipeline_mode = #tpu.pipeline_mode<synchronous>, transform_indices = @transform_4, window_bounds = array<i64: 1, 256>}, {pipeline_mode = #tpu.pipeline_mode<synchronous>, transform_indices = @transform_5, window_bounds = array<i64: 1024, 256>}, {pipeline_mode = #tpu.pipeline_mode<synchronous>, transform_indices = @transform_6, window_bounds = array<i64: 1, 256>}, {pipeline_mode = #tpu.pipeline_mode<synchronous>, transform_indices = @transform_7, window_bounds = array<i64: 256, 128>}, {pipeline_mode = #tpu.pipeline_mode<synchronous>, transform_indices = @transform_8, window_bounds = array<i64: 1, 128>}, {transform_indices = @transform_9, window_bounds = array<i64: 8, 128>}]} {
    %cst = arith.constant 0.000000e+00 : f32
    %0 = vector.broadcast %cst : f32 to vector<8x256xf32>
    %c0 = arith.constant 0 : index
    %c0_0 = arith.constant 0 : index
    %c0_1 = arith.constant 0 : index
    %1 = vector.load %arg11[%c0, %c0_0, %c0_1] : memref<18x8x256xf32, #tpu.memory_space<vmem>>, vector<1x8x256xf32>
    %2 = vector.shape_cast %1 : vector<1x8x256xf32> to vector<8x256xf32>
    %3 = vector.shape_cast %0 : vector<8x256xf32> to vector<1x8x256xf32>
    tpu.vector_store %arg11[%c0, %c0_0, %c0_1], %3 {strides = array<i32>} : memref<18x8x256xf32, #tpu.memory_space<vmem>>, vector<1x8x256xf32>,
    %c17 = arith.constant 17 : index
    %c0_2 = arith.constant 0 : index
    %c0_3 = arith.constant 0 : index
    %4 = vector.load %arg11[%c17, %c0_2, %c0_3] : memref<18x8x256xf32, #tpu.memory_space<vmem>>, vector<1x8x256xf32>
    %5 = vector.shape_cast %4 : vector<1x8x256xf32> to vector<8x256xf32>
    %6 = vector.shape_cast %0 : vector<8x256xf32> to vector<1x8x256xf32>
    tpu.vector_store %arg11[%c17, %c0_2, %c0_3], %6 {strides = array<i32>} : memref<18x8x256xf32, #tpu.memory_space<vmem>>, vector<1x8x256xf32>,
    %c0_i32 = arith.constant 0 : i32
    %c4_i32 = arith.constant 4 : i32
    %7 = arith.addi %c0_i32, %c4_i32 : i32
    %c1_i32 = arith.constant 1 : i32
    scf.for %arg13 = %c0_i32 to %7 step %c1_i32  : i32 {
      %c8_i32 = arith.constant 8 : i32
      %27 = arith.muli %arg13, %c8_i32 : i32
      %28 = arith.index_cast %27 : i32 to index
      %c0_26 = arith.constant 0 : index
      %c0_27 = arith.constant 0 : index
      %29 = vector.load %arg1[%28, %c0_26, %c0_27] : memref<34x8x96xf32, #tpu.memory_space<vmem>>, vector<8x8x96xf32>
      %30 = vector.shape_cast %29 : vector<8x8x96xf32> to vector<64x96xf32>
      %c0_28 = arith.constant 0 : index
      %c0_29 = arith.constant 0 : index
      %c0_30 = arith.constant 0 : index
      %31 = vector.load %arg2[%c0_28, %c0_29, %c0_30] : memref<3x96x512xf32, #tpu.memory_space<vmem>>, vector<1x96x512xf32>
      %32 = vector.shape_cast %31 : vector<1x96x512xf32> to vector<96x512xf32>
      %cst_31 = arith.constant dense<0.000000e+00> : vector<64x512xf32>
      %33 = tpu.matmul %30, %32, %cst_31 {dimension_numbers = #tpu.dot_dimension_numbers<[1], [0], [0], [1], [0, 0, 1, 1], [], []>} : vector<64x96xf32>, vector<96x512xf32>, vector<64x512xf32> -> vector<64x512xf32>
      %c1_i32_32 = arith.constant 1 : i32
      %34 = arith.addi %27, %c1_i32_32 : i32
      %35 = arith.index_cast %34 : i32 to index
      %c0_33 = arith.constant 0 : index
      %c0_34 = arith.constant 0 : index
      %36 = vector.load %arg1[%35, %c0_33, %c0_34] : memref<34x8x96xf32, #tpu.memory_space<vmem>>, vector<8x8x96xf32>
      %37 = vector.shape_cast %36 : vector<8x8x96xf32> to vector<64x96xf32>
      %c1_35 = arith.constant 1 : index
      %c0_36 = arith.constant 0 : index
      %c0_37 = arith.constant 0 : index
      %38 = vector.load %arg2[%c1_35, %c0_36, %c0_37] : memref<3x96x512xf32, #tpu.memory_space<vmem>>, vector<1x96x512xf32>
      %39 = vector.shape_cast %38 : vector<1x96x512xf32> to vector<96x512xf32>
      %cst_38 = arith.constant dense<0.000000e+00> : vector<64x512xf32>
      %40 = tpu.matmul %37, %39, %cst_38 {dimension_numbers = #tpu.dot_dimension_numbers<[1], [0], [0], [1], [0, 0, 1, 1], [], []>} : vector<64x96xf32>, vector<96x512xf32>, vector<64x512xf32> -> vector<64x512xf32>
      %41 = arith.addf %33, %40 : vector<64x512xf32>
      %c2_i32_39 = arith.constant 2 : i32
      %42 = arith.addi %27, %c2_i32_39 : i32
      %43 = arith.index_cast %42 : i32 to index
      %c0_40 = arith.constant 0 : index
      %c0_41 = arith.constant 0 : index
      %44 = vector.load %arg1[%43, %c0_40, %c0_41] : memref<34x8x96xf32, #tpu.memory_space<vmem>>, vector<8x8x96xf32>
      %45 = vector.shape_cast %44 : vector<8x8x96xf32> to vector<64x96xf32>
      %c2 = arith.constant 2 : index
      %c0_42 = arith.constant 0 : index
      %c0_43 = arith.constant 0 : index
      %46 = vector.load %arg2[%c2, %c0_42, %c0_43] : memref<3x96x512xf32, #tpu.memory_space<vmem>>, vector<1x96x512xf32>
      %47 = vector.shape_cast %46 : vector<1x96x512xf32> to vector<96x512xf32>
      %cst_44 = arith.constant dense<0.000000e+00> : vector<64x512xf32>
      %48 = tpu.matmul %45, %47, %cst_44 {dimension_numbers = #tpu.dot_dimension_numbers<[1], [0], [0], [1], [0, 0, 1, 1], [], []>} : vector<64x96xf32>, vector<96x512xf32>, vector<64x512xf32> -> vector<64x512xf32>
      %49 = arith.addf %41, %48 : vector<64x512xf32>
      %c0_45 = arith.constant 0 : index
      %c0_46 = arith.constant 0 : index
      %50 = vector.load %arg3[%c0_45, %c0_46] : memref<1x512xf32, #tpu.memory_space<vmem>>, vector<1x512xf32>
      %51 = vector.broadcast %50 : vector<1x512xf32> to vector<64x512xf32>
      %52 = arith.addf %49, %51 : vector<64x512xf32>
      %cst_47 = arith.constant 0.000000e+00 : f32
      %53 = vector.broadcast %cst_47 : f32 to vector<64x512xf32>
      %54 = arith.maximumf %52, %53 : vector<64x512xf32>
      %55 = vector.extract_strided_slice %54 {offsets = [0, 0], sizes = [64, 256], strides = [1, 1]} : vector<64x512xf32> to vector<64x256xf32>
      %56 = vector.extract_strided_slice %54 {offsets = [0, 256], sizes = [64, 256], strides = [1, 1]} : vector<64x512xf32> to vector<64x256xf32>
      %57 = arith.maximumf %55, %56 : vector<64x256xf32>
      %58 = vector.extract_strided_slice %57 {offsets = [0, 0], sizes = [8, 256], strides = [1, 1]} : vector<64x256xf32> to vector<8x256xf32>
      %59 = vector.extract_strided_slice %57 {offsets = [8, 0], sizes = [8, 256], strides = [1, 1]} : vector<64x256xf32> to vector<8x256xf32>
      %60 = arith.maximumf %58, %59 : vector<8x256xf32>
      %c4_i32_48 = arith.constant 4 : i32
      %61 = arith.muli %arg13, %c4_i32_48 : i32
      %c1_i32_49 = arith.constant 1 : i32
      %62 = arith.addi %c1_i32_49, %61 : i32
      %c0_i32_50 = arith.constant 0 : i32
      %63 = arith.addi %62, %c0_i32_50 : i32
      %64 = arith.index_cast %63 : i32 to index
      %c0_51 = arith.constant 0 : index
      %c0_52 = arith.constant 0 : index
      %65 = vector.load %arg11[%64, %c0_51, %c0_52] : memref<18x8x256xf32, #tpu.memory_space<vmem>>, vector<1x8x256xf32>
      %66 = vector.shape_cast %65 : vector<1x8x256xf32> to vector<8x256xf32>
      %67 = vector.shape_cast %60 : vector<8x256xf32> to vector<1x8x256xf32>
      tpu.vector_store %arg11[%64, %c0_51, %c0_52], %67 {strides = array<i32>} : memref<18x8x256xf32, #tpu.memory_space<vmem>>, vector<1x8x256xf32>,
      %68 = vector.extract_strided_slice %57 {offsets = [16, 0], sizes = [8, 256], strides = [1, 1]} : vector<64x256xf32> to vector<8x256xf32>
      %69 = vector.extract_strided_slice %57 {offsets = [24, 0], sizes = [8, 256], strides = [1, 1]} : vector<64x256xf32> to vector<8x256xf32>
      %70 = arith.maximumf %68, %69 : vector<8x256xf32>
      %c4_i32_53 = arith.constant 4 : i32
      %71 = arith.muli %arg13, %c4_i32_53 : i32
      %c1_i32_54 = arith.constant 1 : i32
      %72 = arith.addi %c1_i32_54, %71 : i32
      %c1_i32_55 = arith.constant 1 : i32
      %73 = arith.addi %72, %c1_i32_55 : i32
      %74 = arith.index_cast %73 : i32 to index
      %c0_56 = arith.constant 0 : index
      %c0_57 = arith.constant 0 : index
      %75 = vector.load %arg11[%74, %c0_56, %c0_57] : memref<18x8x256xf32, #tpu.memory_space<vmem>>, vector<1x8x256xf32>
      %76 = vector.shape_cast %75 : vector<1x8x256xf32> to vector<8x256xf32>
      %77 = vector.shape_cast %70 : vector<8x256xf32> to vector<1x8x256xf32>
      tpu.vector_store %arg11[%74, %c0_56, %c0_57], %77 {strides = array<i32>} : memref<18x8x256xf32, #tpu.memory_space<vmem>>, vector<1x8x256xf32>,
      %78 = vector.extract_strided_slice %57 {offsets = [32, 0], sizes = [8, 256], strides = [1, 1]} : vector<64x256xf32> to vector<8x256xf32>
      %79 = vector.extract_strided_slice %57 {offsets = [40, 0], sizes = [8, 256], strides = [1, 1]} : vector<64x256xf32> to vector<8x256xf32>
      %80 = arith.maximumf %78, %79 : vector<8x256xf32>
      %c4_i32_58 = arith.constant 4 : i32
      %81 = arith.muli %arg13, %c4_i32_58 : i32
      %c1_i32_59 = arith.constant 1 : i32
      %82 = arith.addi %c1_i32_59, %81 : i32
      %c2_i32_60 = arith.constant 2 : i32
      %83 = arith.addi %82, %c2_i32_60 : i32
      %84 = arith.index_cast %83 : i32 to index
      %c0_61 = arith.constant 0 : index
      %c0_62 = arith.constant 0 : index
      %85 = vector.load %arg11[%84, %c0_61, %c0_62] : memref<18x8x256xf32, #tpu.memory_space<vmem>>, vector<1x8x256xf32>
      %86 = vector.shape_cast %85 : vector<1x8x256xf32> to vector<8x256xf32>
      %87 = vector.shape_cast %80 : vector<8x256xf32> to vector<1x8x256xf32>
      tpu.vector_store %arg11[%84, %c0_61, %c0_62], %87 {strides = array<i32>} : memref<18x8x256xf32, #tpu.memory_space<vmem>>, vector<1x8x256xf32>,
      %88 = vector.extract_strided_slice %57 {offsets = [48, 0], sizes = [8, 256], strides = [1, 1]} : vector<64x256xf32> to vector<8x256xf32>
      %89 = vector.extract_strided_slice %57 {offsets = [56, 0], sizes = [8, 256], strides = [1, 1]} : vector<64x256xf32> to vector<8x256xf32>
      %90 = arith.maximumf %88, %89 : vector<8x256xf32>
      %c4_i32_63 = arith.constant 4 : i32
      %91 = arith.muli %arg13, %c4_i32_63 : i32
      %c1_i32_64 = arith.constant 1 : i32
      %92 = arith.addi %c1_i32_64, %91 : i32
      %c3_i32 = arith.constant 3 : i32
      %93 = arith.addi %92, %c3_i32 : i32
      %94 = arith.index_cast %93 : i32 to index
      %c0_65 = arith.constant 0 : index
      %c0_66 = arith.constant 0 : index
      %95 = vector.load %arg11[%94, %c0_65, %c0_66] : memref<18x8x256xf32, #tpu.memory_space<vmem>>, vector<1x8x256xf32>
      %96 = vector.shape_cast %95 : vector<1x8x256xf32> to vector<8x256xf32>
      %97 = vector.shape_cast %90 : vector<8x256xf32> to vector<1x8x256xf32>
      tpu.vector_store %arg11[%94, %c0_65, %c0_66], %97 {strides = array<i32>} : memref<18x8x256xf32, #tpu.memory_space<vmem>>, vector<1x8x256xf32>,
    }
    %c4_i32_4 = arith.constant 4 : i32
    %c0_i32_5 = arith.constant 0 : i32
    %c2_i32 = arith.constant 2 : i32
    %8 = arith.addi %c0_i32_5, %c2_i32 : i32
    %c1_i32_6 = arith.constant 1 : i32
    scf.for %arg13 = %c0_i32_5 to %8 step %c1_i32_6  : i32 {
      %c8_i32 = arith.constant 8 : i32
      %27 = arith.muli %arg13, %c8_i32 : i32
      %28 = arith.index_cast %27 : i32 to index
      %c0_26 = arith.constant 0 : index
      %c0_27 = arith.constant 0 : index
      %29 = vector.load %arg11[%28, %c0_26, %c0_27] : memref<18x8x256xf32, #tpu.memory_space<vmem>>, vector<8x8x256xf32>
      %30 = vector.shape_cast %29 : vector<8x8x256xf32> to vector<64x256xf32>
      %c0_28 = arith.constant 0 : index
      %c0_29 = arith.constant 0 : index
      %c0_30 = arith.constant 0 : index
      %31 = vector.load %arg4[%c0_28, %c0_29, %c0_30] : memref<3x256x256xf32, #tpu.memory_space<vmem>>, vector<1x256x256xf32>
      %32 = vector.shape_cast %31 : vector<1x256x256xf32> to vector<256x256xf32>
      %cst_31 = arith.constant dense<0.000000e+00> : vector<64x256xf32>
      %33 = tpu.matmul %30, %32, %cst_31 {dimension_numbers = #tpu.dot_dimension_numbers<[1], [0], [0], [1], [0, 0, 1, 1], [], []>} : vector<64x256xf32>, vector<256x256xf32>, vector<64x256xf32> -> vector<64x256xf32>
      %c1_i32_32 = arith.constant 1 : i32
      %34 = arith.addi %27, %c1_i32_32 : i32
      %35 = arith.index_cast %34 : i32 to index
      %c0_33 = arith.constant 0 : index
      %c0_34 = arith.constant 0 : index
      %36 = vector.load %arg11[%35, %c0_33, %c0_34] : memref<18x8x256xf32, #tpu.memory_space<vmem>>, vector<8x8x256xf32>
      %37 = vector.shape_cast %36 : vector<8x8x256xf32> to vector<64x256xf32>
      %c1_35 = arith.constant 1 : index
      %c0_36 = arith.constant 0 : index
      %c0_37 = arith.constant 0 : index
      %38 = vector.load %arg4[%c1_35, %c0_36, %c0_37] : memref<3x256x256xf32, #tpu.memory_space<vmem>>, vector<1x256x256xf32>
      %39 = vector.shape_cast %38 : vector<1x256x256xf32> to vector<256x256xf32>
      %cst_38 = arith.constant dense<0.000000e+00> : vector<64x256xf32>
      %40 = tpu.matmul %37, %39, %cst_38 {dimension_numbers = #tpu.dot_dimension_numbers<[1], [0], [0], [1], [0, 0, 1, 1], [], []>} : vector<64x256xf32>, vector<256x256xf32>, vector<64x256xf32> -> vector<64x256xf32>
      %41 = arith.addf %33, %40 : vector<64x256xf32>
      %c2_i32_39 = arith.constant 2 : i32
      %42 = arith.addi %27, %c2_i32_39 : i32
      %43 = arith.index_cast %42 : i32 to index
      %c0_40 = arith.constant 0 : index
      %c0_41 = arith.constant 0 : index
      %44 = vector.load %arg11[%43, %c0_40, %c0_41] : memref<18x8x256xf32, #tpu.memory_space<vmem>>, vector<8x8x256xf32>
      %45 = vector.shape_cast %44 : vector<8x8x256xf32> to vector<64x256xf32>
      %c2 = arith.constant 2 : index
      %c0_42 = arith.constant 0 : index
      %c0_43 = arith.constant 0 : index
      %46 = vector.load %arg4[%c2, %c0_42, %c0_43] : memref<3x256x256xf32, #tpu.memory_space<vmem>>, vector<1x256x256xf32>
      %47 = vector.shape_cast %46 : vector<1x256x256xf32> to vector<256x256xf32>
      %cst_44 = arith.constant dense<0.000000e+00> : vector<64x256xf32>
      %48 = tpu.matmul %45, %47, %cst_44 {dimension_numbers = #tpu.dot_dimension_numbers<[1], [0], [0], [1], [0, 0, 1, 1], [], []>} : vector<64x256xf32>, vector<256x256xf32>, vector<64x256xf32> -> vector<64x256xf32>
      %49 = arith.addf %41, %48 : vector<64x256xf32>
      %c0_45 = arith.constant 0 : index
      %c0_46 = arith.constant 0 : index
      %50 = vector.load %arg5[%c0_45, %c0_46] : memref<1x256xf32, #tpu.memory_space<vmem>>, vector<1x256xf32>
      %51 = vector.broadcast %50 : vector<1x256xf32> to vector<64x256xf32>
      %52 = arith.addf %49, %51 : vector<64x256xf32>
      %cst_47 = arith.constant 0.000000e+00 : f32
      %53 = vector.broadcast %cst_47 : f32 to vector<64x256xf32>
      %54 = arith.maximumf %52, %53 : vector<64x256xf32>
      %55 = vector.extract_strided_slice %54 {offsets = [0, 0], sizes = [64, 128], strides = [1, 1]} : vector<64x256xf32> to vector<64x128xf32>
      %56 = vector.extract_strided_slice %54 {offsets = [0, 128], sizes = [64, 128], strides = [1, 1]} : vector<64x256xf32> to vector<64x128xf32>
      %57 = arith.maximumf %55, %56 : vector<64x128xf32>
      %58 = vector.extract_strided_slice %57 {offsets = [0, 0], sizes = [8, 128], strides = [1, 1]} : vector<64x128xf32> to vector<8x128xf32>
      %59 = vector.extract_strided_slice %57 {offsets = [8, 0], sizes = [8, 128], strides = [1, 1]} : vector<64x128xf32> to vector<8x128xf32>
      %60 = arith.maximumf %58, %59 : vector<8x128xf32>
      %61 = vector.extract_strided_slice %57 {offsets = [16, 0], sizes = [8, 128], strides = [1, 1]} : vector<64x128xf32> to vector<8x128xf32>
      %62 = vector.extract_strided_slice %57 {offsets = [24, 0], sizes = [8, 128], strides = [1, 1]} : vector<64x128xf32> to vector<8x128xf32>
      %63 = arith.maximumf %61, %62 : vector<8x128xf32>
      %64 = vector.extract_strided_slice %57 {offsets = [32, 0], sizes = [8, 128], strides = [1, 1]} : vector<64x128xf32> to vector<8x128xf32>
      %65 = vector.extract_strided_slice %57 {offsets = [40, 0], sizes = [8, 128], strides = [1, 1]} : vector<64x128xf32> to vector<8x128xf32>
      %66 = arith.maximumf %64, %65 : vector<8x128xf32>
      %67 = vector.extract_strided_slice %57 {offsets = [48, 0], sizes = [8, 128], strides = [1, 1]} : vector<64x128xf32> to vector<8x128xf32>
      %68 = vector.extract_strided_slice %57 {offsets = [56, 0], sizes = [8, 128], strides = [1, 1]} : vector<64x128xf32> to vector<8x128xf32>
      %69 = arith.maximumf %67, %68 : vector<8x128xf32>
      %70 = tpu.concatenate %60, %63, %66, %69 in 1 : vector<8x128xf32>, vector<8x128xf32>, vector<8x128xf32>, vector<8x128xf32> -> vector<8x512xf32>
      %71 = arith.index_cast %arg13 : i32 to index
      %c0_48 = arith.constant 0 : index
      %c0_49 = arith.constant 0 : index
      %72 = vector.load %arg12[%71, %c0_48, %c0_49] : memref<2x8x512xf32, #tpu.memory_space<vmem>>, vector<1x8x512xf32>
      %73 = vector.shape_cast %72 : vector<1x8x512xf32> to vector<8x512xf32>
      %74 = vector.shape_cast %70 : vector<8x512xf32> to vector<1x8x512xf32>
      tpu.vector_store %arg12[%71, %c0_48, %c0_49], %74 {strides = array<i32>} : memref<2x8x512xf32, #tpu.memory_space<vmem>>, vector<1x8x512xf32>,
    }
    %c2_i32_7 = arith.constant 2 : i32
    %c0_8 = arith.constant 0 : index
    %c0_9 = arith.constant 0 : index
    %c0_10 = arith.constant 0 : index
    %9 = vector.load %arg12[%c0_8, %c0_9, %c0_10] : memref<2x8x512xf32, #tpu.memory_space<vmem>>, vector<1x8x512xf32>
    %10 = vector.shape_cast %9 : vector<1x8x512xf32> to vector<8x512xf32>
    %c1 = arith.constant 1 : index
    %c0_11 = arith.constant 0 : index
    %c0_12 = arith.constant 0 : index
    %11 = vector.load %arg12[%c1, %c0_11, %c0_12] : memref<2x8x512xf32, #tpu.memory_space<vmem>>, vector<1x8x512xf32>
    %12 = vector.shape_cast %11 : vector<1x8x512xf32> to vector<8x512xf32>
    %13 = tpu.concatenate %10, %12 in 1 : vector<8x512xf32>, vector<8x512xf32> -> vector<8x1024xf32>
    %c0_13 = arith.constant 0 : index
    %c0_14 = arith.constant 0 : index
    %14 = vector.load %arg6[%c0_13, %c0_14] : memref<1024x256xf32, #tpu.memory_space<vmem>>, vector<1024x256xf32>
    %cst_15 = arith.constant dense<0.000000e+00> : vector<8x256xf32>
    %15 = tpu.matmul %13, %14, %cst_15 {dimension_numbers = #tpu.dot_dimension_numbers<[1], [0], [0], [1], [0, 0, 1, 1], [], []>} : vector<8x1024xf32>, vector<1024x256xf32>, vector<8x256xf32> -> vector<8x256xf32>
    %c0_16 = arith.constant 0 : index
    %c0_17 = arith.constant 0 : index
    %16 = vector.load %arg7[%c0_16, %c0_17] : memref<1x256xf32, #tpu.memory_space<vmem>>, vector<1x256xf32>
    %17 = vector.broadcast %16 : vector<1x256xf32> to vector<8x256xf32>
    %18 = arith.addf %15, %17 : vector<8x256xf32>
    %cst_18 = arith.constant 0.000000e+00 : f32
    %19 = vector.broadcast %cst_18 : f32 to vector<8x256xf32>
    %20 = arith.maximumf %18, %19 : vector<8x256xf32>
    %c0_19 = arith.constant 0 : index
    %c0_20 = arith.constant 0 : index
    %21 = vector.load %arg8[%c0_19, %c0_20] : memref<256x128xf32, #tpu.memory_space<vmem>>, vector<256x128xf32>
    %cst_21 = arith.constant dense<0.000000e+00> : vector<8x128xf32>
    %22 = tpu.matmul %20, %21, %cst_21 {dimension_numbers = #tpu.dot_dimension_numbers<[1], [0], [0], [1], [0, 0, 1, 1], [], []>} : vector<8x256xf32>, vector<256x128xf32>, vector<8x128xf32> -> vector<8x128xf32>
    %c0_22 = arith.constant 0 : index
    %c0_23 = arith.constant 0 : index
    %23 = vector.load %arg9[%c0_22, %c0_23] : memref<1x128xf32, #tpu.memory_space<vmem>>, vector<1x128xf32>
    %24 = vector.broadcast %23 : vector<1x128xf32> to vector<8x128xf32>
    %25 = arith.addf %22, %24 : vector<8x128xf32>
    %c0_24 = arith.constant 0 : index
    %c0_25 = arith.constant 0 : index
    %26 = vector.load %arg10[%c0_24, %c0_25] : memref<8x128xf32, #tpu.memory_space<vmem>>, vector<8x128xf32>
    tpu.vector_store %arg10[%c0_24, %c0_25], %25 {strides = array<i32>} : memref<8x128xf32, #tpu.memory_space<vmem>>, vector<8x128xf32>,
    return
  }
  func.func @transform_0(%arg0: i32) -> (i32, i32, i32) {
    %c0_i32 = arith.constant 0 : i32
    %c0_i32_0 = arith.constant 0 : i32
    %c0_i32_1 = arith.constant 0 : i32
    return %c0_i32, %arg0, %c0_i32_0 : i32, i32, i32
  }
  func.func @transform_1(%arg0: i32) -> (i32, i32, i32) {
    %c0_i32 = arith.constant 0 : i32
    %c0_i32_0 = arith.constant 0 : i32
    %c0_i32_1 = arith.constant 0 : i32
    %c0_i32_2 = arith.constant 0 : i32
    return %c0_i32, %c0_i32_0, %c0_i32_1 : i32, i32, i32
  }
  func.func @transform_2(%arg0: i32) -> (i32, i32) {
    %c0_i32 = arith.constant 0 : i32
    %c0_i32_0 = arith.constant 0 : i32
    %c0_i32_1 = arith.constant 0 : i32
    return %c0_i32, %c0_i32_0 : i32, i32
  }
  func.func @transform_3(%arg0: i32) -> (i32, i32, i32) {
    %c0_i32 = arith.constant 0 : i32
    %c0_i32_0 = arith.constant 0 : i32
    %c0_i32_1 = arith.constant 0 : i32
    %c0_i32_2 = arith.constant 0 : i32
    return %c0_i32, %c0_i32_0, %c0_i32_1 : i32, i32, i32
  }
  func.func @transform_4(%arg0: i32) -> (i32, i32) {
    %c0_i32 = arith.constant 0 : i32
    %c0_i32_0 = arith.constant 0 : i32
    %c0_i32_1 = arith.constant 0 : i32
    return %c0_i32, %c0_i32_0 : i32, i32
  }
  func.func @transform_5(%arg0: i32) -> (i32, i32) {
    %c0_i32 = arith.constant 0 : i32
    %c0_i32_0 = arith.constant 0 : i32
    %c0_i32_1 = arith.constant 0 : i32
    return %c0_i32, %c0_i32_0 : i32, i32
  }
  func.func @transform_6(%arg0: i32) -> (i32, i32) {
    %c0_i32 = arith.constant 0 : i32
    %c0_i32_0 = arith.constant 0 : i32
    %c0_i32_1 = arith.constant 0 : i32
    return %c0_i32, %c0_i32_0 : i32, i32
  }
  func.func @transform_7(%arg0: i32) -> (i32, i32) {
    %c0_i32 = arith.constant 0 : i32
    %c0_i32_0 = arith.constant 0 : i32
    %c0_i32_1 = arith.constant 0 : i32
    return %c0_i32, %c0_i32_0 : i32, i32
  }
  func.func @transform_8(%arg0: i32) -> (i32, i32) {
    %c0_i32 = arith.constant 0 : i32
    %c0_i32_0 = arith.constant 0 : i32
    %c0_i32_1 = arith.constant 0 : i32
    return %c0_i32, %c0_i32_0 : i32, i32
  }
  func.func @transform_9(%arg0: i32) -> (i32, i32) {
    %c0_i32 = arith.constant 0 : i32
    %c0_i32_0 = arith.constant 0 : i32
    return %arg0, %c0_i32 : i32, i32
  }
}

</mosaic_0001>

<bundles_post_ra>
// kernel: lightnn_forward.1
= control target key start
LH: loop header
LB: loop body
LE: loop exit
PB: predicated region body
PF: predicated region fallthrough
CT: control target
= control target key end

     0   :  { %s6892_s0 = inlined_call_operand.vmem [shape: f32[34,16,96], index: 0, kind: input, shape index: {}]   ;;  %s6893_s1 = inlined_call_operand.vmem [shape: f32[3,96,512], index: 1, kind: input, shape index: {}]   ;;  %s6894_s2 = inlined_call_operand.vmem [shape: f32[1,512], index: 2, kind: input, shape index: {}]   ;;  %s6895_s3 = inlined_call_operand.vmem [shape: f32[3,256,256], index: 3, kind: input, shape index: {}]   ;;  %s6896_s4 = inlined_call_operand.vmem [shape: f32[1,256], index: 4, kind: input, shape index: {}]   ;;  %s6897_s5 = inlined_call_operand.vmem [shape: f32[1024,256], index: 5, kind: input, shape index: {}]   ;;  %s6898_s6 = inlined_call_operand.vmem [shape: f32[1,256], index: 6, kind: input, shape index: {}]   ;;  %s6899_s7 = inlined_call_operand.vmem [shape: f32[256,128], index: 7, kind: input, shape index: {}]   ;;  %s6900_s8 = inlined_call_operand.vmem [shape: f32[1,128], index: 8, kind: input, shape index: {}]   ;;  %s6901_s9 = inlined_call_operand.hbm [shape: f32[16,128], index: 9, kind: output, shape index: {}]  }
   0x1   :  { %6904 = sst [smem:[#allocation10_spill]] %s6892_s0 }
   0x2   :  { %14 = vsyncpa [#allocation6], 0 }
   0x3   :  { %16 = vsyncpa [#allocation6 + $0x1], 0  ;;  %s4444_s30 = smov 0   ;;  %s4446_s10 = smov 0  }
   0x4   :  { %s4448_s11 = smov 0   ;;  %s4450_s12 = smov 0  }
   0x5 LB: > { %6905 = sst [smem:[#allocation8_spill]] %s4377_s11  ;;  %s6902_s13 = sadd.s32 4294967295, %s4381_s12   ;;  %s4381_s12 = sphi %s4450_s12, %s6915_s12   ;;  %s4377_s11 = sphi %s4448_s11, %s6912_s11   ;;  %s4373_s10 = sphi %s4446_s10, %s6914_s10   ;;  %s4369_s30 = sphi %s4444_s30, %s6913_s30  }
   0x6   : > { %s3083_s14 = sadd.s32 4294967294, %s4381_s12   ;;  %s4467_s15 = sadd.s32 1, %s4381_s12  }
   0x7   : > { %s29_s16 = sadd.s32 1, %s4377_s11  ;;  %s26_s17 = ssub.s32 %s4381_s12, %s4467_s15 }
   0x8   : > { %p36_p0 = scmp.ne.s32.totalorder %s4377_s11, %s4373_s10  ;;  %p27_p1 = scmp.eq.s32.totalorder %s26_s17, 0 }
   0x9   : > { %p37_p2 = scmp.eq.s32.totalorder %s4381_s12, 0  ;;  %p234_p3 = scmp.eq.s32.totalorder %s6902_s13, 1 }
   0xa   : > { %p239_p4 = scmp.ne.s32.totalorder %s4373_s10, %s4369_s30  ;;  %p240_p7 = scmp.eq.s32.totalorder %s3083_s14, 1 }
   0xb   : > { %s4480_s18 = scalar_select %p27_p1, %s4377_s11, %s29_s16  }
   0xc   : > { %p38_p5 = por %p37_p2, %p36_p0  ;;  %p4482_p6 = por %p234_p3, %p36_p0 }
   0xd   : > { %6906 = sst [smem:[#allocation9_spill]] %s4480_s18  ;;  %p4486_p8 = por %p240_p7, %p239_p4 }
   0xe   : > { %p3085_p9 = scmp.ge.s32.totalorder %s4381_s12, 2 }
  0x10   : > { %280 = sbr.rel (%p3085_p9) target bundleno = 50 (0x32), region = 48 }
  0x17   : > { %283 = sbr.rel (!%p38_p5) target bundleno = 50 (0x32), region = 52  ;;  %s285_s21 = sand.u32 (%p38_p5), 1, %s4377_s11  }
  0x18   : > { %s3086_s22 = sshll.u32 (%p38_p5), %s4381_s12, 3  ;;  %s4252_s23 = smul.u32 (%p38_p5), 272, %s285_s21 }
  0x19   : > { %s6909_s0 = sld [smem:[#allocation10_spill]] (%p38_p5) }
  0x1a   : > { %s4506_s27 = scalar_lea.vmem (%p38_p5), [#allocation4], %s4252_s23 }
  0x1f   : > { %s4498_s26 = scalar_lea.vmem %s6909_s0, %s3086_s22 }
  0x20   : > { %v383_v0 = vld [vmem:[%s4498_s26] sm:$0xff]  ;;  %v385_v1 = vld [vmem:[%s4498_s26 + $0x10] sm:$0xff] }
  0x21   : > { %v387_v2 = vld [vmem:[%s4498_s26 + $0x20] sm:$0xff]  ;;  %v389_v3 = vld [vmem:[%s4498_s26 + $0x30] sm:$0xff]  ;;  %384 = vst [vmem:[%s4506_s27] sm:$0xff] %v383_v0  ;;  %386 = vst [vmem:[%s4506_s27 + $0x8] sm:$0xff] %v385_v1 }
  0x22   : > { %v391_v4 = vld [vmem:[%s4498_s26 + $0x40] sm:$0xff]  ;;  %v393_v5 = vld [vmem:[%s4498_s26 + $0x50] sm:$0xff]  ;;  %388 = vst [vmem:[%s4506_s27 + $0x10] sm:$0xff] %v387_v2  ;;  %390 = vst [vmem:[%s4506_s27 + $0x18] sm:$0xff] %v389_v3 }
  0x23   : > { %392 = vst [vmem:[%s4506_s27 + $0x20] sm:$0xff] %v391_v4  ;;  %394 = vst [vmem:[%s4506_s27 + $0x28] sm:$0xff] %v393_v5  ;;  %v395_v6 = vld [vmem:[%s4498_s26 + $0x60] sm:$0xff]  ;;  %v397_v7 = vld [vmem:[%s4498_s26 + $0x70] sm:$0xff] }
  0x24   : > { %v399_v8 = vld [vmem:[%s4498_s26 + $0x80] sm:$0xff]  ;;  %396 = vst [vmem:[%s4506_s27 + $0x30] sm:$0xff] %v395_v6  ;;  %398 = vst [vmem:[%s4506_s27 + $0x38] sm:$0xff] %v397_v7  ;;  %v401_v9 = vld [vmem:[%s4498_s26 + $0x90] sm:$0xff] }
  0x25   : > { %400 = vst [vmem:[%s4506_s27 + $0x40] sm:$0xff] %v399_v8  ;;  %v403_v10 = vld [vmem:[%s4498_s26 + $0xa0] sm:$0xff]  ;;  %v405_v11 = vld [vmem:[%s4498_s26 + $0xb0] sm:$0xff]  ;;  %402 = vst [vmem:[%s4506_s27 + $0x48] sm:$0xff] %v401_v9 }
  0x26   : > { %404 = vst [vmem:[%s4506_s27 + $0x50] sm:$0xff] %v403_v10  ;;  %406 = vst [vmem:[%s4506_s27 + $0x58] sm:$0xff] %v405_v11  ;;  %v407_v12 = vld [vmem:[%s4498_s26 + $0xc0] sm:$0xff]  ;;  %v409_v13 = vld [vmem:[%s4498_s26 + $0xd0] sm:$0xff] }
  0x27   : > { %v411_v14 = vld [vmem:[%s4498_s26 + $0xe0] sm:$0xff]  ;;  %408 = vst [vmem:[%s4506_s27 + $0x60] sm:$0xff] %v407_v12  ;;  %410 = vst [vmem:[%s4506_s27 + $0x68] sm:$0xff] %v409_v13  ;;  %v413_v15 = vld [vmem:[%s4498_s26 + $0xf0] sm:$0xff] }
  0x28   : > { %412 = vst [vmem:[%s4506_s27 + $0x70] sm:$0xff] %v411_v14  ;;  %v415_v16 = vld [vmem:[%s4498_s26 + $0x100] sm:$0xff]  ;;  %v417_v17 = vld [vmem:[%s4498_s26 + $0x110] sm:$0xff]  ;;  %414 = vst [vmem:[%s4506_s27 + $0x78] sm:$0xff] %v413_v15 }
  0x29   : > { %416 = vst [vmem:[%s4506_s27 + $0x80] sm:$0xff] %v415_v16  ;;  %418 = vst [vmem:[%s4506_s27 + $0x88] sm:$0xff] %v417_v17  ;;  %v419_v18 = vld [vmem:[%s4498_s26 + $0x120] sm:$0xff]  ;;  %v421_v19 = vld [vmem:[%s4498_s26 + $0x130] sm:$0xff] }
  0x2a   : > { %v423_v20 = vld [vmem:[%s4498_s26 + $0x140] sm:$0xff]  ;;  %420 = vst [vmem:[%s4506_s27 + $0x90] sm:$0xff] %v419_v18  ;;  %422 = vst [vmem:[%s4506_s27 + $0x98] sm:$0xff] %v421_v19  ;;  %v425_v21 = vld [vmem:[%s4498_s26 + $0x150] sm:$0xff] }
  0x2b   : > { %424 = vst [vmem:[%s4506_s27 + $0xa0] sm:$0xff] %v423_v20  ;;  %v427_v22 = vld [vmem:[%s4498_s26 + $0x160] sm:$0xff]  ;;  %v429_v23 = vld [vmem:[%s4498_s26 + $0x170] sm:$0xff]  ;;  %426 = vst [vmem:[%s4506_s27 + $0xa8] sm:$0xff] %v425_v21 }
  0x2c   : > { %428 = vst [vmem:[%s4506_s27 + $0xb0] sm:$0xff] %v427_v22  ;;  %430 = vst [vmem:[%s4506_s27 + $0xb8] sm:$0xff] %v429_v23  ;;  %v431_v24 = vld [vmem:[%s4498_s26 + $0x180] sm:$0xff]  ;;  %v433_v25 = vld [vmem:[%s4498_s26 + $0x190] sm:$0xff] }
  0x2d   : > { %v435_v26 = vld [vmem:[%s4498_s26 + $0x1a0] sm:$0xff]  ;;  %432 = vst [vmem:[%s4506_s27 + $0xc0] sm:$0xff] %v431_v24  ;;  %434 = vst [vmem:[%s4506_s27 + $0xc8] sm:$0xff] %v433_v25  ;;  %v437_v27 = vld [vmem:[%s4498_s26 + $0x1b0] sm:$0xff] }
  0x2e   : > { %436 = vst [vmem:[%s4506_s27 + $0xd0] sm:$0xff] %v435_v26  ;;  %v439_v28 = vld [vmem:[%s4498_s26 + $0x1c0] sm:$0xff]  ;;  %v441_v29 = vld [vmem:[%s4498_s26 + $0x1d0] sm:$0xff]  ;;  %438 = vst [vmem:[%s4506_s27 + $0xd8] sm:$0xff] %v437_v27 }
  0x2f   : > { %440 = vst [vmem:[%s4506_s27 + $0xe0] sm:$0xff] %v439_v28  ;;  %442 = vst [vmem:[%s4506_s27 + $0xe8] sm:$0xff] %v441_v29  ;;  %v443_v30 = vld [vmem:[%s4498_s26 + $0x1e0] sm:$0xff]  ;;  %v445_v31 = vld [vmem:[%s4498_s26 + $0x1f0] sm:$0xff] }
  0x30   : > { %v447_v32 = vld [vmem:[%s4498_s26 + $0x200] sm:$0xff]  ;;  %444 = vst [vmem:[%s4506_s27 + $0xf0] sm:$0xff] %v443_v30  ;;  %446 = vst [vmem:[%s4506_s27 + $0xf8] sm:$0xff] %v445_v31  ;;  %v449_v33 = vld [vmem:[%s4498_s26 + $0x210] sm:$0xff] }
  0x31   : > { %448 = vst [vmem:[%s4506_s27 + $0x100] sm:$0xff] %v447_v32  ;;  %450 = vst [vmem:[%s4506_s27 + $0x108] sm:$0xff] %v449_v33 }
  0x32 PF: > { %p3087_p10 = scmp.ge.s32.totalorder %s4381_s12, 1  ;;  %p455_p11 = scmp.lt.s32.totalorder %s4381_s12, 3 }
  0x34   : > { %p456_p12 = pnand %p3087_p10, %p455_p11 }
  0x35   : > { %s4573_s28 = sand.u32 (!%p456_p12), 1, %s4373_s10   ;;  %v4391_v34 = vmov (!%p456_p12), 0.0   ;;  %s4581_s21 = smov (!%p456_p12), 0  }
  0x36   : > { %459 = sbr.rel (%p456_p12) target bundleno = 1344 (0x540), region = 90  ;;  %s3088_s14 = sshll.u32 (!%p456_p12), %s4573_s28, 3  ;;  %497 = vst [vmem:[#allocation2] sm:$0xff] (!%p456_p12), %v4391_v34  ;;  %498 = vst [vmem:[#allocation2 + $0x8] sm:$0xff] (!%p456_p12), %v4391_v34 }
  0x37   : > { %s4253_s29 = smul.u32 (!%p456_p12), 272, %s4573_s28  ;;  %500 = vst [vmem:[#allocation2 + $0x110] sm:$0xff] (!%p456_p12), %v4391_v34  ;;  %501 = vst [vmem:[#allocation2 + $0x118] sm:$0xff] (!%p456_p12), %v4391_v34  ;;  %s4579_s17 = scalar_lea.vmem (!%p456_p12), [#allocation5], %s3088_s14 }
  0x39   : > { %s4577_s16 = scalar_lea.vmem (!%p456_p12), [#allocation4], %s4253_s29 }
  0x3d LB: >> { %v3102_v35 = vld [vmem:[%s6893_s1 + $0x188] sm:$0xff]  ;;  %v3104_v37 = vld [vmem:[%s6893_s1 + $0x198] sm:$0xff]  ;;  %v3101_v40 = vld [vmem:[%s6893_s1 + $0x180] sm:$0xff]  ;;  %v4392_v42 = vmov 0.0   ;;  %s3445_s0 = sshll.u32 %s4385_s21, 6  ;;  %vm627_vm0 = vcmask 785408   ;;  %s4385_s21 = sphi %s4581_s21, %s507_s21  }
  0x3e   : >> { %v3106_v36 = vld [vmem:[%s6893_s1 + $0x1a8] sm:$0xff]  ;;  %v3108_v39 = vld [vmem:[%s6893_s1 + $0x1b8] sm:$0xff]  ;;  %v3105_v41 = vld [vmem:[%s6893_s1 + $0x1a0] sm:$0xff]  ;;  %716 = vmatprep.mubr.f32.mxu0 %v4392_v42  ;;  %829 = vmatprep.mubr.f32.mxu1 %v4392_v42  ;;  %s4748_s24 = scalar_lea.vmem %s4577_s16, %s3445_s0 [#allocation4]  ;;  %s507_s21 = sadd.s32 1, %s4385_s21  }
  0x3f   : >> { %v3492_v38 = vpack.c.bf16 %v3106_v36, %v3102_v35  ;;  %v3516_v43 = vpack.c.bf16 %v3108_v39, %v3104_v37  ;;  %v3494_v44 = vpack.c.bf16 %v3105_v41, %v3101_v40  ;;  %v3103_v45 = vld [vmem:[%s6893_s1 + $0x190] sm:$0xff]  ;;  %v3110_v47 = vld [vmem:[%s6893_s1 + $0x1c8] sm:$0xff]  ;;  %v3112_v50 = vld [vmem:[%s6893_s1 + $0x1d8] sm:$0xff]  ;;  %p504_p13 = scmp.ge.s32.totalorder %s507_s21, 4  }
  0x40   : >> { %v3107_v46 = vld [vmem:[%s6893_s1 + $0x1b0] sm:$0xff]  ;;  %v3114_v49 = vld [vmem:[%s6893_s1 + $0x1e8] sm:$0xff]  ;;  %v3116_v51 = vld [vmem:[%s6893_s1 + $0x1f8] sm:$0xff] }
  0x41   : >> { %3493 = vmatprep.subr.bf16.mxu0 %v3492_v38  ;;  %v3518_v48 = vpack.c.bf16 %v3107_v46, %v3103_v45  ;;  %3517 = vmatprep.subr.bf16.mxu1 %v3516_v43  ;;  %v3496_v52 = vpack.c.bf16 %v3114_v49, %v3110_v47  ;;  %v3520_v53 = vpack.c.bf16 %v3116_v51, %v3112_v50  ;;  %v3109_v54 = vld [vmem:[%s6893_s1 + $0x1c0] sm:$0xff]  ;;  %v3111_v56 = vld [vmem:[%s6893_s1 + $0x1d0] sm:$0xff]  ;;  %v3118_v59 = vld [vmem:[%s6893_s1 + $0x208] sm:$0xff] }
  0x42   : >> { %3495 = vmatpush1.bf16.msra.mxu0 %v3494_v44  ;;  %v3113_v55 = vld [vmem:[%s6893_s1 + $0x1e0] sm:$0xff]  ;;  %v3115_v58 = vld [vmem:[%s6893_s1 + $0x1f0] sm:$0xff]  ;;  %v3122_v60 = vld [vmem:[%s6893_s1 + $0x228] sm:$0xff] }
  0x43   : >> { %3519 = vmatpush1.bf16.msra.mxu1 %v3518_v48  ;;  %v3498_v57 = vpack.c.bf16 %v3113_v55, %v3109_v54  ;;  %3497 = vmatprep.subr.bf16.mxu0 %v3496_v52  ;;  %v3522_v61 = vpack.c.bf16 %v3115_v58, %v3111_v56  ;;  %v3500_v62 = vpack.c.bf16 %v3122_v60, %v3118_v59  ;;  %v3120_v63 = vld [vmem:[%s6893_s1 + $0x218] sm:$0xff]  ;;  %v3117_v1 = vld [vmem:[%s6893_s1 + $0x200] sm:$0xff]  ;;  %v3119_v4 = vld [vmem:[%s6893_s1 + $0x210] sm:$0xff] }
  0x44   : >> { %3521 = vmatprep.subr.bf16.mxu1 %v3520_v53  ;;  %v3124_v0 = vld [vmem:[%s6893_s1 + $0x238] sm:$0xff]  ;;  %v3121_v3 = vld [vmem:[%s6893_s1 + $0x220] sm:$0xff]  ;;  %v3123_v5 = vld [vmem:[%s6893_s1 + $0x230] sm:$0xff] }
  0x45   : >> { %v3524_v2 = vpack.c.bf16 %v3124_v0, %v3120_v63  ;;  %v3502_v6 = vpack.c.bf16 %v3121_v3, %v3117_v1  ;;  %v3126_v7 = vld [vmem:[%s6893_s1 + $0x248] sm:$0xff]  ;;  %v3128_v9 = vld [vmem:[%s6893_s1 + $0x258] sm:$0xff]  ;;  %v3526_v10 = vpack.c.bf16 %v3123_v5, %v3119_v4  ;;  %v3125_v13 = vld [vmem:[%s6893_s1 + $0x240] sm:$0xff] }
  0x46   : >> { %3499 = vmatpush1.bf16.msra.mxu0 %v3498_v57  ;;  %v3130_v8 = vld [vmem:[%s6893_s1 + $0x268] sm:$0xff]  ;;  %v3132_v12 = vld [vmem:[%s6893_s1 + $0x278] sm:$0xff]  ;;  %v3129_v14 = vld [vmem:[%s6893_s1 + $0x260] sm:$0xff] }
  0x47   : >> { %3523 = vmatpush1.bf16.msra.mxu1 %v3522_v61  ;;  %3501 = vmatprep.subr.bf16.mxu0 %v3500_v62  ;;  %v3504_v11 = vpack.c.bf16 %v3130_v8, %v3126_v7  ;;  %v3528_v15 = vpack.c.bf16 %v3132_v12, %v3128_v9  ;;  %v3127_v16 = vld [vmem:[%s6893_s1 + $0x250] sm:$0xff]  ;;  %v3134_v18 = vld [vmem:[%s6893_s1 + $0x288] sm:$0xff]  ;;  %v3136_v20 = vld [vmem:[%s6893_s1 + $0x298] sm:$0xff]  ;;  %v3506_v22 = vpack.c.bf16 %v3129_v14, %v3125_v13 }
  0x48   : >> { %3525 = vmatprep.subr.bf16.mxu1 %v3524_v2  ;;  %v3131_v17 = vld [vmem:[%s6893_s1 + $0x270] sm:$0xff]  ;;  %v3138_v19 = vld [vmem:[%s6893_s1 + $0x2a8] sm:$0xff]  ;;  %v3140_v21 = vld [vmem:[%s6893_s1 + $0x2b8] sm:$0xff] }
  0x49   : >> { %v3530_v23 = vpack.c.bf16 %v3131_v17, %v3127_v16  ;;  %v3508_v24 = vpack.c.bf16 %v3138_v19, %v3134_v18  ;;  %v3133_v25 = vld [vmem:[%s6893_s1 + $0x280] sm:$0xff]  ;;  %v3135_v27 = vld [vmem:[%s6893_s1 + $0x290] sm:$0xff]  ;;  %v3532_v28 = vpack.c.bf16 %v3140_v21, %v3136_v20  ;;  %v3142_v30 = vld [vmem:[%s6893_s1 + $0x2c8] sm:$0xff] }
  0x4a   : >> { %3503 = vmatpush1.bf16.msra.mxu0 %v3502_v6  ;;  %v3137_v26 = vld [vmem:[%s6893_s1 + $0x2a0] sm:$0xff]  ;;  %v3139_v29 = vld [vmem:[%s6893_s1 + $0x2b0] sm:$0xff]  ;;  %v3146_v31 = vld [vmem:[%s6893_s1 + $0x2e8] sm:$0xff] }
  0x4b   : >> { %3527 = vmatpush1.bf16.msra.mxu1 %v3526_v10  ;;  %3505 = vmatprep.subr.bf16.mxu0 %v3504_v11  ;;  %v3144_v32 = vld [vmem:[%s6893_s1 + $0x2d8] sm:$0xff]  ;;  %v3510_v34 = vpack.c.bf16 %v3137_v26, %v3133_v25  ;;  %v3534_v35 = vpack.c.bf16 %v3139_v29, %v3135_v27  ;;  %v3512_v36 = vpack.c.bf16 %v3146_v31, %v3142_v30  ;;  %v3141_v37 = vld [vmem:[%s6893_s1 + $0x2c0] sm:$0xff]  ;;  %v3143_v39 = vld [vmem:[%s6893_s1 + $0x2d0] sm:$0xff] }
  0x4c   : >> { %3529 = vmatprep.subr.bf16.mxu1 %v3528_v15  ;;  %v3148_v33 = vld [vmem:[%s6893_s1 + $0x2f8] sm:$0xff]  ;;  %v3145_v38 = vld [vmem:[%s6893_s1 + $0x2e0] sm:$0xff]  ;;  %v3147_v41 = vld [vmem:[%s6893_s1 + $0x2f0] sm:$0xff] }
  0x4d   : >> { %v3536_v40 = vpack.c.bf16 %v3148_v33, %v3144_v32  ;;  %v520_v43 = vld [vmem:[%s6893_s1 + $0x8] sm:$0xff]  ;;  %v522_v45 = vld [vmem:[%s6893_s1 + $0x18] sm:$0xff]  ;;  %v3514_v47 = vpack.c.bf16 %v3145_v38, %v3141_v37  ;;  %v3538_v48 = vpack.c.bf16 %v3147_v41, %v3143_v39  ;;  %v519_v50 = vld [vmem:[%s6893_s1] sm:$0xff] }
  0x4e   : >> { %3507 = vmatpush1.bf16.msra.mxu0 %v3506_v22  ;;  %v524_v44 = vld [vmem:[%s6893_s1 + $0x28] sm:$0xff]  ;;  %v526_v46 = vld [vmem:[%s6893_s1 + $0x38] sm:$0xff]  ;;  %v523_v51 = vld [vmem:[%s6893_s1 + $0x20] sm:$0xff] }
  0x4f   : >> { %3531 = vmatpush1.bf16.msra.mxu1 %v3530_v23  ;;  %3509 = vmatprep.subr.bf16.mxu0 %v3508_v24  ;;  %v3540_v49 = vpack.c.bf16 %v524_v44, %v520_v43  ;;  %v3564_v52 = vpack.c.bf16 %v526_v46, %v522_v45  ;;  %v521_v53 = vld [vmem:[%s6893_s1 + $0x10] sm:$0xff]  ;;  %v528_v55 = vld [vmem:[%s6893_s1 + $0x48] sm:$0xff]  ;;  %v3542_v58 = vpack.c.bf16 %v523_v51, %v519_v50  ;;  %v530_v59 = vld [vmem:[%s6893_s1 + $0x58] sm:$0xff] }
  0x50   : >> { %3533 = vmatprep.subr.bf16.mxu1 %v3532_v28  ;;  %v525_v54 = vld [vmem:[%s6893_s1 + $0x30] sm:$0xff]  ;;  %v532_v56 = vld [vmem:[%s6893_s1 + $0x68] sm:$0xff]  ;;  %v534_v60 = vld [vmem:[%s6893_s1 + $0x78] sm:$0xff] }
  0x51   : >> { %v4769_v57 = vld [vmem:[%s4748_s24 + $0x8] sm:$0xff]  ;;  %v3566_v61 = vpack.c.bf16 %v525_v54, %v521_v53  ;;  %v3544_v62 = vpack.c.bf16 %v532_v56, %v528_v55  ;;  %v527_v63 = vld [vmem:[%s6893_s1 + $0x40] sm:$0xff]  ;;  %v529_v1 = vld [vmem:[%s6893_s1 + $0x50] sm:$0xff]  ;;  %v3568_v2 = vpack.c.bf16 %v534_v60, %v530_v59 }
  0x52   : >> { %3511 = vmatpush1.bf16.msra.mxu0 %v3510_v34  ;;  %v531_v0 = vld [vmem:[%s6893_s1 + $0x60] sm:$0xff]  ;;  %v533_v3 = vld [vmem:[%s6893_s1 + $0x70] sm:$0xff]  ;;  %v536_v4 = vld [vmem:[%s6893_s1 + $0x88] sm:$0xff] }
  0x53   : >> { %3535 = vmatpush1.bf16.msra.mxu1 %v3534_v35  ;;  %3513 = vmatprep.subr.bf16.mxu0 %v3512_v36  ;;  %v540_v5 = vld [vmem:[%s6893_s1 + $0xa8] sm:$0xff]  ;;  %v4800_v6 = vld [vmem:[%s4748_s24 + $0x10] sm:$0xff]  ;;  %v538_v7 = vld [vmem:[%s6893_s1 + $0x98] sm:$0xff]  ;;  %v3546_v9 = vpack.c.bf16 %v531_v0, %v527_v63  ;;  %v3570_v10 = vpack.c.bf16 %v533_v3, %v529_v1 }
  0x54   : >> { %3537 = vmatprep.subr.bf16.mxu1 %v3536_v40  ;;  %v542_v8 = vld [vmem:[%s6893_s1 + $0xb8] sm:$0xff]  ;;  %v3548_v11 = vpack.c.bf16 %v540_v5, %v536_v4  ;;  %v535_v12 = vld [vmem:[%s6893_s1 + $0x80] sm:$0xff]  ;;  %v537_v14 = vld [vmem:[%s6893_s1 + $0x90] sm:$0xff] }
  0x55   : >> { %v539_v13 = vld [vmem:[%s6893_s1 + $0xa0] sm:$0xff]  ;;  %v3572_v15 = vpack.c.bf16 %v542_v8, %v538_v7  ;;  %v541_v16 = vld [vmem:[%s6893_s1 + $0xb0] sm:$0xff]  ;;  %v544_v17 = vld [vmem:[%s6893_s1 + $0xc8] sm:$0xff] }
  0x56   : >> { %3515 = vmatpush1.bf16.msra.mxu0 %v3514_v47  ;;  %v548_v18 = vld [vmem:[%s6893_s1 + $0xe8] sm:$0xff]  ;;  %v4834_v19 = vld [vmem:[%s4748_s24 + $0x18] sm:$0xff]  ;;  %v3550_v22 = vpack.c.bf16 %v539_v13, %v535_v12  ;;  %v3574_v23 = vpack.c.bf16 %v541_v16, %v537_v14  ;;  %v543_v25 = vld [vmem:[%s6893_s1 + $0xc0] sm:$0xff] }
  0x57   : >> { %3539 = vmatpush1.bf16.msra.mxu1 %v3538_v48  ;;  %3541 = vmatprep.subr.bf16.mxu0 %v3540_v49  ;;  %v546_v20 = vld [vmem:[%s6893_s1 + $0xd8] sm:$0xff]  ;;  %v3552_v24 = vpack.c.bf16 %v548_v18, %v544_v17  ;;  %v547_v26 = vld [vmem:[%s6893_s1 + $0xe0] sm:$0xff]  ;;  %v545_v27 = vld [vmem:[%s6893_s1 + $0xd0] sm:$0xff] }
  0x58   : >> { %3565 = vmatprep.subr.bf16.mxu1 %v3564_v52  ;;  %v550_v21 = vld [vmem:[%s6893_s1 + $0xf8] sm:$0xff]  ;;  %v549_v29 = vld [vmem:[%s6893_s1 + $0xf0] sm:$0xff]  ;;  %v552_v30 = vld [vmem:[%s6893_s1 + $0x108] sm:$0xff]  ;;  %v3554_v35 = vpack.c.bf16 %v547_v26, %v543_v25 }
  0x59   : >> { %3149 = vmatmul.mubr.msk.f32.vlgmr.msra.gmra.mrb[0].mxu0 %vm627_vm0, %v4769_v57  ;;  %v3576_v28 = vpack.c.bf16 %v550_v21, %v546_v20  ;;  %v556_v31 = vld [vmem:[%s6893_s1 + $0x128] sm:$0xff]  ;;  %v4867_v32 = vld [vmem:[%s4748_s24 + $0x20] sm:$0xff]  ;;  %v554_v33 = vld [vmem:[%s6893_s1 + $0x118] sm:$0xff]  ;;  %v3578_v36 = vpack.c.bf16 %v549_v29, %v545_v27 }
  0x5a   : >> { %3157 = vmatmul.mubr.msk.f32.vlgmr.msra.gmra.mrb[0].mxu1 %vm627_vm0, %v4769_v57  ;;  %3543 = vmatpush1.bf16.msra.mxu0 %v3542_v58  ;;  %v558_v34 = vld [vmem:[%s6893_s1 + $0x138] sm:$0xff]  ;;  %v3556_v37 = vpack.c.bf16 %v556_v31, %v552_v30  ;;  %v551_v38 = vld [vmem:[%s6893_s1 + $0x100] sm:$0xff]  ;;  %v553_v40 = vld [vmem:[%s6893_s1 + $0x110] sm:$0xff] }
  0x5b   : >> { %3567 = vmatpush1.bf16.msra.mxu1 %v3566_v61  ;;  %722 = vmatprep.mubr.f32.mxu0 %v4392_v42  ;;  %v555_v39 = vld [vmem:[%s6893_s1 + $0x120] sm:$0xff]  ;;  %v3580_v41 = vpack.c.bf16 %v558_v34, %v554_v33  ;;  %v557_v43 = vld [vmem:[%s6893_s1 + $0x130] sm:$0xff]  ;;  %v560_v44 = vld [vmem:[%s6893_s1 + $0x148] sm:$0xff] }
  0x5c   : >> { %835 = vmatprep.mubr.f32.mxu1 %v4392_v42  ;;  %3545 = vmatprep.subr.bf16.mxu0 %v3544_v62  ;;  %v564_v45 = vld [vmem:[%s6893_s1 + $0x168] sm:$0xff]  ;;  %v562_v47 = vld [vmem:[%s6893_s1 + $0x158] sm:$0xff]  ;;  %v3558_v49 = vpack.c.bf16 %v555_v39, %v551_v38  ;;  %v3582_v50 = vpack.c.bf16 %v557_v43, %v553_v40  ;;  %v559_v52 = vld [vmem:[%s6893_s1 + $0x140] sm:$0xff] }
  0x5d   : >> { %3150 = vmatmul.mubr.msk.f32.gmra.mrb[2].mxu0 %vm627_vm0, %v4800_v6  ;;  %3569 = vmatprep.subr.bf16.mxu1 %v3568_v2  ;;  %v4900_v46 = vld [vmem:[%s4748_s24 + $0x28] sm:$0xff]  ;;  %v566_v48 = vld [vmem:[%s6893_s1 + $0x178] sm:$0xff]  ;;  %v3560_v51 = vpack.c.bf16 %v564_v45, %v560_v44  ;;  %v563_v53 = vld [vmem:[%s6893_s1 + $0x160] sm:$0xff] }
  0x5e   : >> { %3158 = vmatmul.mubr.msk.f32.gmra.mrb[2].mxu1 %vm627_vm0, %v4800_v6  ;;  %728 = vmatprep.mubr.f32.mxu0 %v4392_v42  ;;  %v561_v54 = vld [vmem:[%s6893_s1 + $0x150] sm:$0xff]  ;;  %v3584_v55 = vpack.c.bf16 %v566_v48, %v562_v47  ;;  %v3192_v58 = vld [vmem:[%s6893_s1 + $0x308] sm:$0xff]  ;;  %v3194_v61 = vld [vmem:[%s6893_s1 + $0x318] sm:$0xff]  ;;  %v3562_v63 = vpack.c.bf16 %v563_v53, %v559_v52 }
  0x5f   : >> { %841 = vmatprep.mubr.f32.mxu1 %v4392_v42  ;;  %3547 = vmatpush1.bf16.msra.mxu0 %v3546_v9  ;;  %v565_v56 = vld [vmem:[%s6893_s1 + $0x170] sm:$0xff]  ;;  %v3196_v59 = vld [vmem:[%s6893_s1 + $0x328] sm:$0xff]  ;;  %v3198_v62 = vld [vmem:[%s6893_s1 + $0x338] sm:$0xff] }
  0x60   : >> { %3571 = vmatpush1.bf16.msra.mxu1 %v3570_v10  ;;  %3549 = vmatprep.subr.bf16.mxu0 %v3548_v11  ;;  %v4933_v60 = vld [vmem:[%s4748_s24 + $0x30] sm:$0xff]  ;;  %v3586_v0 = vpack.c.bf16 %v565_v56, %v561_v54  ;;  %v3588_v1 = vpack.c.bf16 %v3196_v59, %v3192_v58  ;;  %v3612_v2 = vpack.c.bf16 %v3198_v62, %v3194_v61  ;;  %v4948_v3 = vld [vmem:[%s4748_s24 + $0x38] sm:$0xff]  ;;  %v4957_v4 = vld [vmem:[%s4748_s24 + $0x40] sm:$0xff] }
  0x61   : >> { %3151 = vmatmul.mubr.msk.f32.gmra.mrb[4].mxu0 %vm627_vm0, %v4834_v19  ;;  %3573 = vmatprep.subr.bf16.mxu1 %v3572_v15  ;;  %v3191_v5 = vld [vmem:[%s6893_s1 + $0x300] sm:$0xff]  ;;  %v3193_v8 = vld [vmem:[%s6893_s1 + $0x310] sm:$0xff]  ;;  %v3200_v10 = vld [vmem:[%s6893_s1 + $0x348] sm:$0xff] }
  0x62   : >> { %3159 = vmatmul.mubr.msk.f32.gmra.mrb[4].mxu1 %vm627_vm0, %v4834_v19  ;;  %734 = vmatprep.mubr.f32.mxu0 %v4392_v42  ;;  %v3195_v7 = vld [vmem:[%s6893_s1 + $0x320] sm:$0xff]  ;;  %v3197_v9 = vld [vmem:[%s6893_s1 + $0x330] sm:$0xff]  ;;  %v3204_v11 = vld [vmem:[%s6893_s1 + $0x368] sm:$0xff] }
  0x63   : >> { %847 = vmatprep.mubr.f32.mxu1 %v4392_v42  ;;  %3551 = vmatpush1.bf16.msra.mxu0 %v3550_v22  ;;  %v511_v12 = vld [vmem:[%s4748_s24] sm:$0xff]  ;;  %v3590_v13 = vpack.c.bf16 %v3195_v7, %v3191_v5  ;;  %v3202_v14 = vld [vmem:[%s6893_s1 + $0x358] sm:$0xff]  ;;  %v3614_v16 = vpack.c.bf16 %v3197_v9, %v3193_v8  ;;  %v3592_v17 = vpack.c.bf16 %v3204_v11, %v3200_v10  ;;  %v3201_v21 = vld [vmem:[%s6893_s1 + $0x350] sm:$0xff] }
  0x64   : >> { %3575 = vmatpush1.bf16.msra.mxu1 %v3574_v23  ;;  %3553 = vmatprep.subr.bf16.mxu0 %v3552_v24  ;;  %v3206_v15 = vld [vmem:[%s6893_s1 + $0x378] sm:$0xff]  ;;  %v3199_v18 = vld [vmem:[%s6893_s1 + $0x340] sm:$0xff]  ;;  %v3205_v23 = vld [vmem:[%s6893_s1 + $0x370] sm:$0xff] }
  0x65   : >> { %3152 = vmatmul.mubr.msk.f32.gmra.mrb[6].mxu0 %vm627_vm0, %v4867_v32  ;;  %3577 = vmatprep.subr.bf16.mxu1 %v3576_v28  ;;  %v3203_v20 = vld [vmem:[%s6893_s1 + $0x360] sm:$0xff]  ;;  %v3616_v22 = vpack.c.bf16 %v3206_v15, %v3202_v14  ;;  %v3208_v24 = vld [vmem:[%s6893_s1 + $0x388] sm:$0xff]  ;;  %v3210_v26 = vld [vmem:[%s6893_s1 + $0x398] sm:$0xff]  ;;  %v3618_v29 = vpack.c.bf16 %v3205_v23, %v3201_v21 }
  0x66   : >> { %3160 = vmatmul.mubr.msk.f32.gmra.mrb[6].mxu1 %vm627_vm0, %v4867_v32  ;;  %740 = vmatprep.mubr.f32.mxu0 %v4392_v42  ;;  %v3212_v25 = vld [vmem:[%s6893_s1 + $0x3a8] sm:$0xff]  ;;  %v3214_v27 = vld [vmem:[%s6893_s1 + $0x3b8] sm:$0xff]  ;;  %v3594_v28 = vpack.c.bf16 %v3203_v20, %v3199_v18  ;;  %v3207_v31 = vld [vmem:[%s6893_s1 + $0x380] sm:$0xff] }
  0x67   : >> { %853 = vmatprep.mubr.f32.mxu1 %v4392_v42  ;;  %3555 = vmatpush1.bf16.msra.mxu0 %v3554_v35  ;;  %v3596_v30 = vpack.c.bf16 %v3212_v25, %v3208_v24  ;;  %v3211_v33 = vld [vmem:[%s6893_s1 + $0x3a0] sm:$0xff]  ;;  %v3209_v34 = vld [vmem:[%s6893_s1 + $0x390] sm:$0xff]  ;;  %v3620_v35 = vpack.c.bf16 %v3214_v27, %v3210_v26  ;;  %v3220_v38 = vld [vmem:[%s6893_s1 + $0x3e8] sm:$0xff] }
  0x68   : >> { %3579 = vmatpush1.bf16.msra.mxu1 %v3578_v36  ;;  %3557 = vmatprep.subr.bf16.mxu0 %v3556_v37  ;;  %v3213_v36 = vld [vmem:[%s6893_s1 + $0x3b0] sm:$0xff]  ;;  %v3216_v37 = vld [vmem:[%s6893_s1 + $0x3c8] sm:$0xff]  ;;  %v3218_v39 = vld [vmem:[%s6893_s1 + $0x3d8] sm:$0xff] }
  0x69   : >> { %3153 = vmatmul.mubr.msk.f32.gmra.mrb[8].mxu0 %vm627_vm0, %v4900_v46  ;;  %3581 = vmatprep.subr.bf16.mxu1 %v3580_v41  ;;  %v3222_v40 = vld [vmem:[%s6893_s1 + $0x3f8] sm:$0xff]  ;;  %v3598_v41 = vpack.c.bf16 %v3211_v33, %v3207_v31  ;;  %v3622_v43 = vpack.c.bf16 %v3213_v36, %v3209_v34  ;;  %v3600_v44 = vpack.c.bf16 %v3220_v38, %v3216_v37  ;;  %v3219_v45 = vld [vmem:[%s6893_s1 + $0x3e0] sm:$0xff]  ;;  %v3217_v47 = vld [vmem:[%s6893_s1 + $0x3d0] sm:$0xff] }
  0x6a   : >> { %3161 = vmatmul.mubr.msk.f32.gmra.mrb[8].mxu1 %vm627_vm0, %v4900_v46  ;;  %746 = vmatprep.mubr.f32.mxu0 %v4392_v42  ;;  %v3624_v48 = vpack.c.bf16 %v3222_v40, %v3218_v39  ;;  %v3226_v52 = vld [vmem:[%s6893_s1 + $0x418] sm:$0xff]  ;;  %v3223_v58 = vld [vmem:[%s6893_s1 + $0x400] sm:$0xff]  ;;  %v3225_v61 = vld [vmem:[%s6893_s1 + $0x410] sm:$0xff] }
  0x6b   : >> { %859 = vmatprep.mubr.f32.mxu1 %v4392_v42  ;;  %3559 = vmatpush1.bf16.msra.mxu0 %v3558_v49  ;;  %v3221_v49 = vld [vmem:[%s6893_s1 + $0x3f0] sm:$0xff]  ;;  %v3230_v53 = vld [vmem:[%s6893_s1 + $0x438] sm:$0xff]  ;;  %v3227_v59 = vld [vmem:[%s6893_s1 + $0x420] sm:$0xff] }
  0x6c   : >> { %3583 = vmatpush1.bf16.msra.mxu1 %v3582_v50  ;;  %3561 = vmatprep.subr.bf16.mxu0 %v3560_v51  ;;  %v3224_v50 = vld [vmem:[%s6893_s1 + $0x408] sm:$0xff]  ;;  %v3628_v62 = vpack.c.bf16 %v3230_v53, %v3226_v52  ;;  %v3238_v5 = vld [vmem:[%s6893_s1 + $0x478] sm:$0xff]  ;;  %v3606_v7 = vpack.c.bf16 %v3227_v59, %v3223_v58  ;;  %v3231_v10 = vld [vmem:[%s6893_s1 + $0x440] sm:$0xff] }
  0x6d   : >> { %3154 = vmatmul.mubr.msk.f32.gmra.mrb[10].mxu0 %vm627_vm0, %v4933_v60  ;;  %3585 = vmatprep.subr.bf16.mxu1 %v3584_v55  ;;  %v3228_v51 = vld [vmem:[%s6893_s1 + $0x428] sm:$0xff]  ;;  %v3626_v55 = vpack.c.bf16 %v3221_v49, %v3217_v47  ;;  %v3235_v11 = vld [vmem:[%s6893_s1 + $0x460] sm:$0xff]  ;;  %v3237_v14 = vld [vmem:[%s6893_s1 + $0x470] sm:$0xff] }
  0x6e   : >> { %3162 = vmatmul.mubr.msk.f32.gmra.mrb[10].mxu1 %vm627_vm0, %v4933_v60  ;;  %752 = vmatprep.mubr.f32.mxu0 %v4392_v42  ;;  %v3604_v56 = vpack.c.bf16 %v3228_v51, %v3224_v50  ;;  %v3610_v15 = vpack.c.bf16 %v3235_v11, %v3231_v10 }
  0x6f   : >> { %865 = vmatprep.mubr.f32.mxu1 %v4392_v42  ;;  %3563 = vmatpush1.bf16.msra.mxu0 %v3562_v63  ;;  %v3229_v63 = vld [vmem:[%s6893_s1 + $0x430] sm:$0xff] }
  0x70   : >> { %3587 = vmatpush1.bf16.msra.mxu1 %v3586_v0  ;;  %3589 = vmatprep.subr.bf16.mxu0 %v3588_v1  ;;  %v3232_v0 = vld [vmem:[%s6893_s1 + $0x448] sm:$0xff]  ;;  %v3630_v8 = vpack.c.bf16 %v3229_v63, %v3225_v61 }
  0x71   : >> { %3155 = vmatmul.mubr.msk.f32.gmra.mrb[12].mxu0 %vm627_vm0, %v4948_v3  ;;  %3613 = vmatprep.subr.bf16.mxu1 %v3612_v2  ;;  %v3236_v1 = vld [vmem:[%s6893_s1 + $0x468] sm:$0xff]  ;;  %v3234_v2 = vld [vmem:[%s6893_s1 + $0x458] sm:$0xff] }
  0x72   : >> { %3163 = vmatmul.mubr.msk.f32.gmra.mrb[12].mxu1 %vm627_vm0, %v4948_v3  ;;  %758 = vmatprep.mubr.f32.mxu0 %v4392_v42  ;;  %v3608_v9 = vpack.c.bf16 %v3236_v1, %v3232_v0 }
  0x73   : >> { %871 = vmatprep.mubr.f32.mxu1 %v4392_v42 }
  0x75   : >> { %3156 = vmatmul.mubr.msk.f32.gmra.mrb[14].mxu0 %vm627_vm0, %v4957_v4 }
  0x76   : >> { %3164 = vmatmul.mubr.msk.f32.gmra.mrb[14].mxu1 %vm627_vm0, %v4957_v4  ;;  %966 = vmatprep.mubr.f32.mxu0 %v4392_v42 }
  0x77   : >> { %1079 = vmatprep.mubr.f32.mxu1 %v4392_v42 }
  0x79   : >> { %3165 = vmatmul.mubr.msk.f32.vlgmr.msra.gmra.mrb[0].mxu0 %vm627_vm0, %v511_v12 }
  0x7a   : >> { %3173 = vmatmul.mubr.msk.f32.vlgmr.msra.gmra.mrb[0].mxu1 %vm627_vm0, %v511_v12  ;;  %3591 = vmatpush1.bf16.msra.mxu0 %v3590_v13  ;;  %v3632_v12 = vpack.c.bf16 %v3238_v5, %v3234_v2  ;;  %v3233_v13 = vld [vmem:[%s6893_s1 + $0x450] sm:$0xff] }
  0x7b   : >> { %3615 = vmatpush1.bf16.msra.mxu1 %v3614_v16  ;;  %972 = vmatprep.mubr.f32.mxu0 %v4392_v42  ;;  %v3634_v16 = vpack.c.bf16 %v3237_v14, %v3233_v13 }
  0x7c   : >> { %1085 = vmatprep.mubr.f32.mxu1 %v4392_v42  ;;  %3593 = vmatprep.subr.bf16.mxu0 %v3592_v17 }
  0x7d   : >> { %3166 = vmatmul.mubr.msk.f32.gmra.mrb[2].mxu0 %vm627_vm0, %v4769_v57  ;;  %3617 = vmatprep.subr.bf16.mxu1 %v3616_v22 }
  0x7e   : >> { %3174 = vmatmul.mubr.msk.f32.gmra.mrb[2].mxu1 %vm627_vm0, %v4769_v57  ;;  %978 = vmatprep.mubr.f32.mxu0 %v4392_v42  ;;  %v3215_v57 = vld [vmem:[%s6893_s1 + $0x3c0] sm:$0xff] }
  0x7f   : >> { %1091 = vmatprep.mubr.f32.mxu1 %v4392_v42  ;;  %3595 = vmatpush1.bf16.msra.mxu0 %v3594_v28  ;;  %v3602_v54 = vpack.c.bf16 %v3219_v45, %v3215_v57 }
  0x80   : >> { %3619 = vmatpush1.bf16.msra.mxu1 %v3618_v29  ;;  %3597 = vmatprep.subr.bf16.mxu0 %v3596_v30 }
  0x81   : >> { %3167 = vmatmul.mubr.msk.f32.gmra.mrb[4].mxu0 %vm627_vm0, %v4800_v6  ;;  %3621 = vmatprep.subr.bf16.mxu1 %v3620_v35 }
  0x82   : >> { %3175 = vmatmul.mubr.msk.f32.gmra.mrb[4].mxu1 %vm627_vm0, %v4800_v6  ;;  %984 = vmatprep.mubr.f32.mxu0 %v4392_v42 }
  0x83   : >> { %1097 = vmatprep.mubr.f32.mxu1 %v4392_v42  ;;  %3599 = vmatpush1.bf16.msra.mxu0 %v3598_v41 }
  0x84   : >> { %3623 = vmatpush1.bf16.msra.mxu1 %v3622_v43  ;;  %3601 = vmatprep.subr.bf16.mxu0 %v3600_v44 }
  0x85   : >> { %3168 = vmatmul.mubr.msk.f32.gmra.mrb[6].mxu0 %vm627_vm0, %v4834_v19  ;;  %3625 = vmatprep.subr.bf16.mxu1 %v3624_v48 }
  0x86   : >> { %3176 = vmatmul.mubr.msk.f32.gmra.mrb[6].mxu1 %vm627_vm0, %v4834_v19  ;;  %990 = vmatprep.mubr.f32.mxu0 %v4392_v42 }
  0x87   : >> { %1103 = vmatprep.mubr.f32.mxu1 %v4392_v42  ;;  %3603 = vmatpush1.bf16.msra.mxu0 %v3602_v54 }
  0x88   : >> { %3627 = vmatpush1.bf16.msra.mxu1 %v3626_v55  ;;  %3605 = vmatprep.subr.bf16.mxu0 %v3604_v56 }
  0x89   : >> { %3169 = vmatmul.mubr.msk.f32.gmra.mrb[8].mxu0 %vm627_vm0, %v4867_v32  ;;  %3629 = vmatprep.subr.bf16.mxu1 %v3628_v62 }
  0x8a   : >> { %3177 = vmatmul.mubr.msk.f32.gmra.mrb[8].mxu1 %vm627_vm0, %v4867_v32  ;;  %996 = vmatprep.mubr.f32.mxu0 %v4392_v42 }
  0x8b   : >> { %1109 = vmatprep.mubr.f32.mxu1 %v4392_v42  ;;  %3607 = vmatpush1.bf16.msra.mxu0 %v3606_v7 }
  0x8c   : >> { %3631 = vmatpush1.bf16.msra.mxu1 %v3630_v8  ;;  %3609 = vmatprep.subr.bf16.mxu0 %v3608_v9 }
  0x8d   : >> { %3170 = vmatmul.mubr.msk.f32.gmra.mrb[10].mxu0 %vm627_vm0, %v4900_v46  ;;  %3633 = vmatprep.subr.bf16.mxu1 %v3632_v12 }
  0x8e   : >> { %3178 = vmatmul.mubr.msk.f32.gmra.mrb[10].mxu1 %vm627_vm0, %v4900_v46  ;;  %1002 = vmatprep.mubr.f32.mxu0 %v4392_v42 }
  0x8f   : >> { %1115 = vmatprep.mubr.f32.mxu1 %v4392_v42  ;;  %3611 = vmatpush1.bf16.msra.mxu0 %v3610_v15 }
  0x90   : >> { %3635 = vmatpush1.bf16.msra.mxu1 %v3634_v16 }
  0x91   : >> { %3171 = vmatmul.mubr.msk.f32.gmra.mrb[12].mxu0 %vm627_vm0, %v4933_v60 }
  0x92   : >> { %3179 = vmatmul.mubr.msk.f32.gmra.mrb[12].mxu1 %vm627_vm0, %v4933_v60  ;;  %1008 = vmatprep.mubr.f32.mxu0 %v4392_v42 }
  0x93   : >> { %1121 = vmatprep.mubr.f32.mxu1 %v4392_v42 }
  0x95   : >> { %3172 = vmatmul.mubr.msk.f32.gmra.mrb[14].mxu0 %vm627_vm0, %v4948_v3 }
  0x96   : >> { %3180 = vmatmul.mubr.msk.f32.gmra.mrb[14].mxu1 %vm627_vm0, %v4948_v3  ;;  %1276 = vmatprep.mubr.f32.mxu0 %v4392_v42 }
  0x97   : >> { %1389 = vmatprep.mubr.f32.mxu1 %v4392_v42 }
  0x99   : >> { %3239 = vmatmul.mubr.msk.f32.vlgmr.msra.gmra.mrb[0].mxu0 %vm627_vm0, %v4800_v6 }
  0x9a   : >> { %3247 = vmatmul.mubr.msk.f32.vlgmr.msra.gmra.mrb[0].mxu1 %vm627_vm0, %v4800_v6  ;;  %1282 = vmatprep.mubr.f32.mxu0 %v4392_v42  ;;  %v3190_v6 = vld [vmem:[%s4748_s24 + $0x48] sm:$0xff]  ;;  %s5222_s24 = scalar_lea.vmem [#allocation2], %s3445_s0  ;;  %s5254_s0 = smov (%p504_p13), 0  }
  0x9b   : >> { %1395 = vmatprep.mubr.f32.mxu1 %v4392_v42 }
  0x9d   : >> { %3240 = vmatmul.mubr.msk.f32.gmra.mrb[2].mxu0 %vm627_vm0, %v4834_v19 }
  0x9e   : >> { %3248 = vmatmul.mubr.msk.f32.gmra.mrb[2].mxu1 %vm627_vm0, %v4834_v19  ;;  %1288 = vmatprep.mubr.f32.mxu0 %v4392_v42  ;;  %v1472_v19 = vlaneseq }
  0x9f   : >> { %1401 = vmatprep.mubr.f32.mxu1 %v4392_v42 }
  0xa1   : >> { %3241 = vmatmul.mubr.msk.f32.gmra.mrb[4].mxu0 %vm627_vm0, %v4867_v32 }
  0xa2   : >> { %3249 = vmatmul.mubr.msk.f32.gmra.mrb[4].mxu1 %vm627_vm0, %v4867_v32  ;;  %1294 = vmatprep.mubr.f32.mxu0 %v4392_v42  ;;  %v1473_v32 = vshrl.u32 %v1472_v19, 7 }
  0xa3   : >> { %1407 = vmatprep.mubr.f32.mxu1 %v4392_v42 }
  0xa4   : >> { %v5195_v17 = vsub.s32 1, %v1473_v32 }
  0xa5   : >> { %3242 = vmatmul.mubr.msk.f32.gmra.mrb[6].mxu0 %vm627_vm0, %v4900_v46 }
  0xa6   : >> { %3250 = vmatmul.mubr.msk.f32.gmra.mrb[6].mxu1 %vm627_vm0, %v4900_v46  ;;  %1300 = vmatprep.mubr.f32.mxu0 %v4392_v42  ;;  %v5190_v46 = vsub.s32 0, %v1473_v32 }
  0xa7   : >> { %1413 = vmatprep.mubr.f32.mxu1 %v4392_v42 }
  0xa9   : >> { %3243 = vmatmul.mubr.msk.f32.gmra.mrb[8].mxu0 %vm627_vm0, %v4933_v60 }
  0xaa   : >> { %3251 = vmatmul.mubr.msk.f32.gmra.mrb[8].mxu1 %vm627_vm0, %v4933_v60  ;;  %1306 = vmatprep.mubr.f32.mxu0 %v4392_v42  ;;  %v1470_v60 = vld [vmem:[%s6894_s2] sm:$0xf] }
  0xab   : >> { %1419 = vmatprep.mubr.f32.mxu1 %v4392_v42  ;;  %v5198_v18 = vrot.slane %v1470_v60, %v5190_v46  ;;  %v5203_v20 = vrot.slane %v1470_v60, %v5195_v17 }
  0xad   : >> { %3244 = vmatmul.mubr.msk.f32.gmra.mrb[10].mxu0 %vm627_vm0, %v4948_v3 }
  0xae   : >> { %3252 = vmatmul.mubr.msk.f32.gmra.mrb[10].mxu1 %vm627_vm0, %v4948_v3  ;;  %1312 = vmatprep.mubr.f32.mxu0 %v4392_v42  ;;  %v1482_v3 = vsub.s32 2, %v1473_v32 }
  0xaf   : >> { %1425 = vmatprep.mubr.f32.mxu1 %v4392_v42 }
  0xb1   : >> { %3245 = vmatmul.mubr.msk.f32.gmra.mrb[12].mxu0 %vm627_vm0, %v4957_v4 }
  0xb2   : >> { %3253 = vmatmul.mubr.msk.f32.gmra.mrb[12].mxu1 %vm627_vm0, %v4957_v4  ;;  %1318 = vmatprep.mubr.f32.mxu0 %v4392_v42  ;;  %v1486_v4 = vsub.s32 3, %v1473_v32 }
  0xb3   : >> { %1431 = vmatprep.mubr.f32.mxu1 %v4392_v42  ;;  %v5200_v42 = vrot.slane %v1470_v60, %v1482_v3 }
  0xb4   : >> { %v5205_v21 = vrot.slane %v1470_v60, %v1486_v4 }
  0xb5   : >> { %3246 = vmatmul.mubr.msk.f32.gmra.mrb[14].mxu0 %vm627_vm0, %v3190_v6 }
  0xb6   : >> { %3254 = vmatmul.mubr.msk.f32.gmra.mrb[14].mxu1 %vm627_vm0, %v3190_v6 }
 0x16c   : >> { %v1278_v22 = vpop.f32.mrb[0].mxu0 }
 0x16d   : >> { %v1492_v23 = vadd.f32 %v5198_v18, %v1278_v22  ;;  %v1391_v24 = vpop.f32.mrb[0].mxu1  ;;  %v1280_v25 = vpop.f32.mrb[1].mxu0 }
 0x16e   : >> { %v1494_v26 = vadd.f32 %v5200_v42, %v1391_v24  ;;  %v1493_v27 = vadd.f32 %v5203_v20, %v1280_v25  ;;  %v1393_v28 = vpop.f32.mrb[1].mxu1 }
 0x16f   : >> { %v1524_v29 = vmax.f32 %v1492_v23, 0.0  ;;  %v1495_v30 = vadd.f32 %v5205_v21, %v1393_v28 }
 0x170   : >> { %v1526_v31 = vmax.f32 %v1494_v26, 0.0  ;;  %v1525_v33 = vmax.f32 %v1493_v27, 0.0  ;;  %v1284_v34 = vpop.f32.mrb[2].mxu0 }
 0x171   : >> { %v1527_v35 = vmax.f32 %v1495_v30, 0.0  ;;  %v1496_v36 = vadd.f32 %v5198_v18, %v1284_v34  ;;  %v1397_v37 = vpop.f32.mrb[2].mxu1  ;;  %v1286_v38 = vpop.f32.mrb[3].mxu0 }
 0x172   : >> { %v1556_v39 = vmax.f32 %v1524_v29, %v1526_v31  ;;  %v1498_v40 = vadd.f32 %v5200_v42, %v1397_v37  ;;  %v1497_v41 = vadd.f32 %v5203_v20, %v1286_v38  ;;  %v1399_v43 = vpop.f32.mrb[3].mxu1 }
 0x173   : >> { %v1557_v44 = vmax.f32 %v1525_v33, %v1527_v35  ;;  %v1528_v57 = vmax.f32 %v1496_v36, 0.0  ;;  %v1499_v45 = vadd.f32 %v5205_v21, %v1399_v43 }
 0x174   : >> { %v1530_v47 = vmax.f32 %v1498_v40, 0.0  ;;  %v1529_v48 = vmax.f32 %v1497_v41, 0.0  ;;  %v1290_v49 = vpop.f32.mrb[4].mxu0 }
 0x175   : >> { %v1531_v50 = vmax.f32 %v1499_v45, 0.0  ;;  %v1500_v51 = vadd.f32 %v5198_v18, %v1290_v49  ;;  %v1403_v52 = vpop.f32.mrb[4].mxu1  ;;  %v1292_v53 = vpop.f32.mrb[5].mxu0 }
 0x176   : >> { %v1558_v54 = vmax.f32 %v1528_v57, %v1530_v47  ;;  %v1502_v55 = vadd.f32 %v5200_v42, %v1403_v52  ;;  %v1501_v56 = vadd.f32 %v5203_v20, %v1292_v53  ;;  %v1405_v58 = vpop.f32.mrb[5].mxu1 }
 0x177   : >> { %v1559_v59 = vmax.f32 %v1529_v48, %v1531_v50  ;;  %v1532_v61 = vmax.f32 %v1500_v51, 0.0  ;;  %v1503_v62 = vadd.f32 %v5205_v21, %v1405_v58 }
 0x178   : >> { %v1572_v63 = vmax.f32 %v1556_v39, %v1558_v54  ;;  %v1534_v0 = vmax.f32 %v1502_v55, 0.0  ;;  %v1533_v1 = vmax.f32 %v1501_v56, 0.0  ;;  %v1296_v2 = vpop.f32.mrb[6].mxu0 }
 0x179   : >> { %v1573_v5 = vmax.f32 %v1557_v44, %v1559_v59  ;;  %v1535_v7 = vmax.f32 %v1503_v62, 0.0  ;;  %v1504_v8 = vadd.f32 %v5198_v18, %v1296_v2  ;;  %v1409_v9 = vpop.f32.mrb[6].mxu1  ;;  %v1298_v10 = vpop.f32.mrb[7].mxu0 }
 0x17a   : >> { %3257 = vst [vmem:[%s5222_s24 + $0x10] sm:$0xff] %v1572_v63  ;;  %v1560_v11 = vmax.f32 %v1532_v61, %v1534_v0  ;;  %v1506_v12 = vadd.f32 %v5200_v42, %v1409_v9  ;;  %v1505_v13 = vadd.f32 %v5203_v20, %v1298_v10  ;;  %v1411_v14 = vpop.f32.mrb[7].mxu1 }
 0x17b   : >> { %3258 = vst [vmem:[%s5222_s24 + $0x18] sm:$0xff] %v1573_v5  ;;  %v1561_v15 = vmax.f32 %v1533_v1, %v1535_v7  ;;  %v1536_v16 = vmax.f32 %v1504_v8, 0.0  ;;  %v1507_v6 = vadd.f32 %v5205_v21, %v1411_v14 }
 0x17c   : >> { %v1538_v19 = vmax.f32 %v1506_v12, 0.0  ;;  %v1537_v32 = vmax.f32 %v1505_v13, 0.0  ;;  %v1302_v60 = vpop.f32.mrb[8].mxu0 }
 0x17d   : >> { %v1539_v3 = vmax.f32 %v1507_v6, 0.0  ;;  %v1508_v4 = vadd.f32 %v5198_v18, %v1302_v60  ;;  %v1415_v22 = vpop.f32.mrb[8].mxu1  ;;  %v1304_v23 = vpop.f32.mrb[9].mxu0 }
 0x17e   : >> { %v1562_v24 = vmax.f32 %v1536_v16, %v1538_v19  ;;  %v1510_v25 = vadd.f32 %v5200_v42, %v1415_v22  ;;  %v1509_v26 = vadd.f32 %v5203_v20, %v1304_v23  ;;  %v1417_v27 = vpop.f32.mrb[9].mxu1 }
 0x17f   : >> { %v1563_v28 = vmax.f32 %v1537_v32, %v1539_v3  ;;  %v1540_v29 = vmax.f32 %v1508_v4, 0.0  ;;  %v1511_v30 = vadd.f32 %v5205_v21, %v1417_v27 }
 0x180   : >> { %v1581_v31 = vmax.f32 %v1560_v11, %v1562_v24  ;;  %v1542_v33 = vmax.f32 %v1510_v25, 0.0  ;;  %v1541_v34 = vmax.f32 %v1509_v26, 0.0  ;;  %v1308_v35 = vpop.f32.mrb[10].mxu0 }
 0x181   : >> { %v1582_v36 = vmax.f32 %v1561_v15, %v1563_v28  ;;  %v1543_v37 = vmax.f32 %v1511_v30, 0.0  ;;  %v1512_v38 = vadd.f32 %v5198_v18, %v1308_v35  ;;  %v1421_v39 = vpop.f32.mrb[10].mxu1  ;;  %v1310_v40 = vpop.f32.mrb[11].mxu0 }
 0x182   : >> { %3261 = vst [vmem:[%s5222_s24 + $0x20] sm:$0xff] %v1581_v31  ;;  %v1564_v41 = vmax.f32 %v1540_v29, %v1542_v33  ;;  %v1514_v43 = vadd.f32 %v5200_v42, %v1421_v39  ;;  %v1513_v44 = vadd.f32 %v5203_v20, %v1310_v40  ;;  %v1423_v57 = vpop.f32.mrb[11].mxu1 }
 0x183   : >> { %3262 = vst [vmem:[%s5222_s24 + $0x28] sm:$0xff] %v1582_v36  ;;  %v1565_v45 = vmax.f32 %v1541_v34, %v1543_v37  ;;  %v1544_v47 = vmax.f32 %v1512_v38, 0.0  ;;  %v1515_v48 = vadd.f32 %v5205_v21, %v1423_v57 }
 0x184   : >> { %v1546_v49 = vmax.f32 %v1514_v43, 0.0  ;;  %v1545_v50 = vmax.f32 %v1513_v44, 0.0  ;;  %v1314_v51 = vpop.f32.mrb[12].mxu0 }
 0x185   : >> { %v1547_v52 = vmax.f32 %v1515_v48, 0.0  ;;  %v1516_v53 = vadd.f32 %v5198_v18, %v1314_v51  ;;  %v1427_v54 = vpop.f32.mrb[12].mxu1  ;;  %v1316_v55 = vpop.f32.mrb[13].mxu0 }
 0x186   : >> { %v1566_v56 = vmax.f32 %v1544_v47, %v1546_v49  ;;  %v1518_v58 = vadd.f32 %v5200_v42, %v1427_v54  ;;  %v1517_v59 = vadd.f32 %v5203_v20, %v1316_v55  ;;  %v1429_v61 = vpop.f32.mrb[13].mxu1 }
 0x187   : >> { %v1567_v62 = vmax.f32 %v1545_v50, %v1547_v52  ;;  %v1548_v63 = vmax.f32 %v1516_v53, 0.0  ;;  %v1519_v0 = vadd.f32 %v5205_v21, %v1429_v61 }
 0x188   : >> { %v1589_v1 = vmax.f32 %v1564_v41, %v1566_v56  ;;  %v1550_v2 = vmax.f32 %v1518_v58, 0.0  ;;  %v1549_v5 = vmax.f32 %v1517_v59, 0.0  ;;  %v1320_v7 = vpop.f32.mrb[14].mxu0 }
 0x189   : >> { %v1590_v8 = vmax.f32 %v1565_v45, %v1567_v62  ;;  %v1551_v9 = vmax.f32 %v1519_v0, 0.0  ;;  %v1520_v10 = vadd.f32 %v5198_v18, %v1320_v7  ;;  %v1433_v11 = vpop.f32.mrb[14].mxu1  ;;  %v1322_v12 = vpop.f32.mrb[15].mxu0 }
 0x18a   : >> { %3265 = vst [vmem:[%s5222_s24 + $0x30] sm:$0xff] %v1589_v1  ;;  %v1568_v13 = vmax.f32 %v1548_v63, %v1550_v2  ;;  %v1522_v14 = vadd.f32 %v5200_v42, %v1433_v11  ;;  %v1521_v15 = vadd.f32 %v5203_v20, %v1322_v12  ;;  %v1435_v16 = vpop.f32.mrb[15].mxu1 }
 0x18b   : >> { %3266 = vst [vmem:[%s5222_s24 + $0x38] sm:$0xff] %v1590_v8  ;;  %v1569_v6 = vmax.f32 %v1549_v5, %v1551_v9  ;;  %v1552_v19 = vmax.f32 %v1520_v10, 0.0  ;;  %v1523_v32 = vadd.f32 %v5205_v21, %v1435_v16 }
 0x18c   : >> { %v1554_v60 = vmax.f32 %v1522_v14, 0.0  ;;  %v1553_v3 = vmax.f32 %v1521_v15, 0.0 }
 0x18d   : >> { %v1555_v4 = vmax.f32 %v1523_v32, 0.0  ;;  %506 = sbr.rel (!%p504_p13) target bundleno = 61 (0x3d), region = 165 }
 0x18e   : >> { %v1570_v18 = vmax.f32 %v1552_v19, %v1554_v60 }
 0x18f   : >> { %v1571_v22 = vmax.f32 %v1553_v3, %v1555_v4 }
 0x190   : >> { %v1597_v23 = vmax.f32 %v1568_v13, %v1570_v18 }
 0x191   : >> { %v1598_v24 = vmax.f32 %v1569_v6, %v1571_v22 }
 0x192   : >> { %3269 = vst [vmem:[%s5222_s24 + $0x40] sm:$0xff] %v1597_v23 }
 0x193   : >> { %3270 = vst [vmem:[%s5222_s24 + $0x48] sm:$0xff] %v1598_v24 }
 0x194 LB: >> { %v3293_v42 = vld [vmem:[%s6895_s3 + $0x208] sm:$0xff]  ;;  %v3295_v20 = vld [vmem:[%s6895_s3 + $0x218] sm:$0xff]  ;;  %v3292_v27 = vld [vmem:[%s6895_s3 + $0x200] sm:$0xff]  ;;  %s3453_s24 = sshll.u32 %s4389_s0, 7  ;;  %s3456_s11 = sshll.u32 %s4389_s0, 5  ;;  %s4389_s0 = sphi %s5254_s0, %s1610_s0  }
 0x195   : >> { %v1632_v21 = vld [vmem:[%s6895_s3 + $0x8] sm:$0xff]  ;;  %v3636_v25 = vpack.c.bf16 %v3295_v20, %v3293_v42  ;;  %v1634_v26 = vld [vmem:[%s6895_s3 + $0x18] sm:$0xff]  ;;  %v3294_v28 = vld [vmem:[%s6895_s3 + $0x210] sm:$0xff]  ;;  %s5554_s25 = scalar_lea.vmem [#allocation2], %s3453_s24  ;;  %s2278_s22 = scalar_lea.vmem [#allocation3], %s3456_s11 }
 0x196   : >> { %v3700_v29 = vpack.c.bf16 %v1634_v26, %v1632_v21  ;;  %v3638_v30 = vpack.c.bf16 %v3294_v28, %v3292_v27  ;;  %v1631_v31 = vld [vmem:[%s6895_s3] sm:$0xff]  ;;  %v1633_v33 = vld [vmem:[%s6895_s3 + $0x10] sm:$0xff]  ;;  %v3297_v34 = vld [vmem:[%s6895_s3 + $0x228] sm:$0xff]  ;;  %s1610_s0 = sadd.s32 1, %s4389_s0  }
 0x197   : >> { %3637 = vmatprep.subr.bf16.mxu1 %v3636_v25  ;;  %v3702_v35 = vpack.c.bf16 %v1633_v33, %v1631_v31  ;;  %v3299_v36 = vld [vmem:[%s6895_s3 + $0x238] sm:$0xff]  ;;  %v1636_v37 = vld [vmem:[%s6895_s3 + $0x28] sm:$0xff]  ;;  %v3296_v41 = vld [vmem:[%s6895_s3 + $0x220] sm:$0xff]  ;;  %p1607_p0 = scmp.ge.s32.totalorder %s1610_s0, 2  }
 0x198   : >> { %v1638_v38 = vld [vmem:[%s6895_s3 + $0x38] sm:$0xff]  ;;  %3701 = vmatprep.subr.bf16.mxu0 %v3700_v29  ;;  %3639 = vmatpush1.bf16.msra.mxu1 %v3638_v30  ;;  %v3640_v39 = vpack.c.bf16 %v3299_v36, %v3297_v34  ;;  %v3298_v43 = vld [vmem:[%s6895_s3 + $0x230] sm:$0xff]  ;;  %v1635_v44 = vld [vmem:[%s6895_s3 + $0x20] sm:$0xff]  ;;  %s6910_s18 = sadd.s32 (%p1607_p0), 4294967295, %s4381_s12   ;;  %s2970_s29 = sshll.u32 (%p1607_p0), %s4579_s17, 4  ;;  %s6849_s29 = int_to_ptr.vmem [resolvable:$true] %s2970_s29 }
 0x199   : >> { %v3704_v40 = vpack.c.bf16 %v1638_v38, %v1636_v37  ;;  %3703 = vmatpush1.bf16.msra.mxu0 %v3702_v35  ;;  %v3642_v57 = vpack.c.bf16 %v3298_v43, %v3296_v41  ;;  %v1637_v45 = vld [vmem:[%s6895_s3 + $0x30] sm:$0xff]  ;;  %v3301_v47 = vld [vmem:[%s6895_s3 + $0x248] sm:$0xff]  ;;  %v3303_v48 = vld [vmem:[%s6895_s3 + $0x258] sm:$0xff]  ;;  %s3442_s27 = sshll.u32 (%p1607_p0), %s6910_s18, 7  ;;  %s2957_s11 = scalar_lea.sflag (%p1607_p0), [#allocation6], %s4573_s28 }
 0x19a   : >> { %3641 = vmatprep.subr.bf16.mxu1 %v3640_v39  ;;  %v3706_v49 = vpack.c.bf16 %v1637_v45, %v1635_v44  ;;  %v3644_v50 = vpack.c.bf16 %v3303_v48, %v3301_v47  ;;  %v1640_v51 = vld [vmem:[%s6895_s3 + $0x48] sm:$0xff]  ;;  %v1642_v52 = vld [vmem:[%s6895_s3 + $0x58] sm:$0xff]  ;;  %v3300_v53 = vld [vmem:[%s6895_s3 + $0x240] sm:$0xff]  ;;  %s6847_s14 = scalar_lea.hbm (%p1607_p0), %s6901_s9, %s3442_s27  ;;  %s4393_s23 = smov (%p1607_p0), [#allocation5]  }
 0x19b   : >> { %3705 = vmatprep.subr.bf16.mxu0 %v3704_v40  ;;  %v3708_v54 = vpack.c.bf16 %v1642_v52, %v1640_v51  ;;  %v3302_v55 = vld [vmem:[%s6895_s3 + $0x250] sm:$0xff]  ;;  %v1639_v56 = vld [vmem:[%s6895_s3 + $0x40] sm:$0xff]  ;;  %v3305_v61 = vld [vmem:[%s6895_s3 + $0x268] sm:$0xff]  ;;  %s4315_s26 = sshll.u32 (%p1607_p0), %s4393_s23, 4  ;;  %s4316_s26 = int_to_ptr.vmem [resolvable:$false] %s4315_s26 }
 0x19c   : >> { %v1641_v58 = vld [vmem:[%s6895_s3 + $0x50] sm:$0xff]  ;;  %3643 = vmatpush1.bf16.msra.mxu1 %v3642_v57  ;;  %v3646_v59 = vpack.c.bf16 %v3302_v55, %v3300_v53  ;;  %v3307_v62 = vld [vmem:[%s6895_s3 + $0x278] sm:$0xff]  ;;  %v1644_v63 = vld [vmem:[%s6895_s3 + $0x68] sm:$0xff]  ;;  %s4317_s16 = scalar_lea.vmem (%p1607_p0), %s4316_s26, 256  ;;  %p4318_p4 = scmp.lt.s32.totalorder (%p1607_p0), %s6849_s29, %s4316_s26 }
 0x19d   : >> { %3707 = vmatpush1.bf16.msra.mxu0 %v3706_v49  ;;  %3645 = vmatprep.subr.bf16.mxu1 %v3644_v50  ;;  %v3710_v0 = vpack.c.bf16 %v1641_v58, %v1639_v56  ;;  %v3648_v1 = vpack.c.bf16 %v3307_v62, %v3305_v61  ;;  %v1646_v2 = vld [vmem:[%s6895_s3 + $0x78] sm:$0xff]  ;;  %v3304_v5 = vld [vmem:[%s6895_s3 + $0x260] sm:$0xff]  ;;  %v3306_v7 = vld [vmem:[%s6895_s3 + $0x270] sm:$0xff] }
 0x19e   : >> { %3709 = vmatprep.subr.bf16.mxu0 %v3708_v54  ;;  %v3712_v8 = vpack.c.bf16 %v1646_v2, %v1644_v63  ;;  %v1643_v9 = vld [vmem:[%s6895_s3 + $0x60] sm:$0xff]  ;;  %v1645_v10 = vld [vmem:[%s6895_s3 + $0x70] sm:$0xff]  ;;  %v3309_v11 = vld [vmem:[%s6895_s3 + $0x288] sm:$0xff]  ;;  %v3650_v15 = vpack.c.bf16 %v3306_v7, %v3304_v5 }
 0x19f   : >> { %v3311_v12 = vld [vmem:[%s6895_s3 + $0x298] sm:$0xff]  ;;  %v1648_v13 = vld [vmem:[%s6895_s3 + $0x88] sm:$0xff]  ;;  %v3714_v16 = vpack.c.bf16 %v1645_v10, %v1643_v9  ;;  %v3308_v19 = vld [vmem:[%s6895_s3 + $0x280] sm:$0xff] }
 0x1a0   : >> { %v1650_v14 = vld [vmem:[%s6895_s3 + $0x98] sm:$0xff]  ;;  %3647 = vmatpush1.bf16.msra.mxu1 %v3646_v59  ;;  %v3652_v6 = vpack.c.bf16 %v3311_v12, %v3309_v11  ;;  %v3310_v32 = vld [vmem:[%s6895_s3 + $0x290] sm:$0xff]  ;;  %v1647_v60 = vld [vmem:[%s6895_s3 + $0x80] sm:$0xff] }
 0x1a1   : >> { %3711 = vmatpush1.bf16.msra.mxu0 %v3710_v0  ;;  %3649 = vmatprep.subr.bf16.mxu1 %v3648_v1  ;;  %v3716_v3 = vpack.c.bf16 %v1650_v14, %v1648_v13  ;;  %v1649_v4 = vld [vmem:[%s6895_s3 + $0x90] sm:$0xff]  ;;  %v3313_v18 = vld [vmem:[%s6895_s3 + $0x2a8] sm:$0xff]  ;;  %v3315_v22 = vld [vmem:[%s6895_s3 + $0x2b8] sm:$0xff]  ;;  %v3654_v42 = vpack.c.bf16 %v3310_v32, %v3308_v19 }
 0x1a2   : >> { %3713 = vmatprep.subr.bf16.mxu0 %v3712_v8  ;;  %v1652_v23 = vld [vmem:[%s6895_s3 + $0xa8] sm:$0xff]  ;;  %v1654_v24 = vld [vmem:[%s6895_s3 + $0xb8] sm:$0xff]  ;;  %v3718_v20 = vpack.c.bf16 %v1649_v4, %v1647_v60  ;;  %v3656_v21 = vpack.c.bf16 %v3315_v22, %v3313_v18  ;;  %v3312_v25 = vld [vmem:[%s6895_s3 + $0x2a0] sm:$0xff] }
 0x1a3   : >> { %v3314_v26 = vld [vmem:[%s6895_s3 + $0x2b0] sm:$0xff]  ;;  %v1651_v27 = vld [vmem:[%s6895_s3 + $0xa0] sm:$0xff]  ;;  %v3720_v28 = vpack.c.bf16 %v1654_v24, %v1652_v23  ;;  %v3317_v30 = vld [vmem:[%s6895_s3 + $0x2c8] sm:$0xff] }
 0x1a4   : >> { %3651 = vmatpush1.bf16.msra.mxu1 %v3650_v15  ;;  %v1653_v29 = vld [vmem:[%s6895_s3 + $0xb0] sm:$0xff]  ;;  %v3319_v31 = vld [vmem:[%s6895_s3 + $0x2d8] sm:$0xff]  ;;  %v1656_v33 = vld [vmem:[%s6895_s3 + $0xc8] sm:$0xff]  ;;  %v3658_v35 = vpack.c.bf16 %v3314_v26, %v3312_v25 }
 0x1a5   : >> { %3715 = vmatpush1.bf16.msra.mxu0 %v3714_v16  ;;  %3653 = vmatprep.subr.bf16.mxu1 %v3652_v6  ;;  %v1658_v34 = vld [vmem:[%s6895_s3 + $0xd8] sm:$0xff]  ;;  %v3722_v36 = vpack.c.bf16 %v1653_v29, %v1651_v27  ;;  %v3660_v37 = vpack.c.bf16 %v3319_v31, %v3317_v30  ;;  %v3316_v38 = vld [vmem:[%s6895_s3 + $0x2c0] sm:$0xff]  ;;  %v3318_v39 = vld [vmem:[%s6895_s3 + $0x2d0] sm:$0xff] }
 0x1a6   : >> { %3717 = vmatprep.subr.bf16.mxu0 %v3716_v3  ;;  %v1655_v40 = vld [vmem:[%s6895_s3 + $0xc0] sm:$0xff]  ;;  %v3724_v41 = vpack.c.bf16 %v1658_v34, %v1656_v33  ;;  %v1657_v43 = vld [vmem:[%s6895_s3 + $0xd0] sm:$0xff]  ;;  %v3321_v44 = vld [vmem:[%s6895_s3 + $0x2e8] sm:$0xff]  ;;  %v3662_v48 = vpack.c.bf16 %v3318_v39, %v3316_v38 }
 0x1a7   : >> { %v3323_v57 = vld [vmem:[%s6895_s3 + $0x2f8] sm:$0xff]  ;;  %v1660_v45 = vld [vmem:[%s6895_s3 + $0xe8] sm:$0xff]  ;;  %v3726_v49 = vpack.c.bf16 %v1657_v43, %v1655_v40  ;;  %v3320_v51 = vld [vmem:[%s6895_s3 + $0x2e0] sm:$0xff] }
 0x1a8   : >> { %3655 = vmatpush1.bf16.msra.mxu1 %v3654_v42  ;;  %v1662_v47 = vld [vmem:[%s6895_s3 + $0xf8] sm:$0xff]  ;;  %v3664_v50 = vpack.c.bf16 %v3323_v57, %v3321_v44  ;;  %v3322_v52 = vld [vmem:[%s6895_s3 + $0x2f0] sm:$0xff]  ;;  %v1659_v53 = vld [vmem:[%s6895_s3 + $0xe0] sm:$0xff] }
 0x1a9   : >> { %3719 = vmatpush1.bf16.msra.mxu0 %v3718_v20  ;;  %3657 = vmatprep.subr.bf16.mxu1 %v3656_v21  ;;  %v3728_v54 = vpack.c.bf16 %v1662_v47, %v1660_v45  ;;  %v1661_v55 = vld [vmem:[%s6895_s3 + $0xf0] sm:$0xff]  ;;  %v3325_v56 = vld [vmem:[%s6895_s3 + $0x308] sm:$0xff]  ;;  %v3327_v58 = vld [vmem:[%s6895_s3 + $0x318] sm:$0xff]  ;;  %v3666_v62 = vpack.c.bf16 %v3322_v52, %v3320_v51 }
 0x1aa   : >> { %3721 = vmatprep.subr.bf16.mxu0 %v3720_v28  ;;  %v1664_v59 = vld [vmem:[%s6895_s3 + $0x108] sm:$0xff]  ;;  %v1666_v61 = vld [vmem:[%s6895_s3 + $0x118] sm:$0xff]  ;;  %v3730_v63 = vpack.c.bf16 %v1661_v55, %v1659_v53  ;;  %v3668_v0 = vpack.c.bf16 %v3327_v58, %v3325_v56  ;;  %v3324_v1 = vld [vmem:[%s6895_s3 + $0x300] sm:$0xff] }
 0x1ab   : >> { %v3326_v2 = vld [vmem:[%s6895_s3 + $0x310] sm:$0xff]  ;;  %v1663_v5 = vld [vmem:[%s6895_s3 + $0x100] sm:$0xff]  ;;  %v3732_v7 = vpack.c.bf16 %v1666_v61, %v1664_v59  ;;  %v3329_v9 = vld [vmem:[%s6895_s3 + $0x328] sm:$0xff] }
 0x1ac   : >> { %3659 = vmatpush1.bf16.msra.mxu1 %v3658_v35  ;;  %v1665_v8 = vld [vmem:[%s6895_s3 + $0x110] sm:$0xff]  ;;  %v3331_v10 = vld [vmem:[%s6895_s3 + $0x338] sm:$0xff]  ;;  %v1668_v11 = vld [vmem:[%s6895_s3 + $0x128] sm:$0xff]  ;;  %v3670_v13 = vpack.c.bf16 %v3326_v2, %v3324_v1 }
 0x1ad   : >> { %3723 = vmatpush1.bf16.msra.mxu0 %v3722_v36  ;;  %3661 = vmatprep.subr.bf16.mxu1 %v3660_v37  ;;  %v1670_v12 = vld [vmem:[%s6895_s3 + $0x138] sm:$0xff]  ;;  %v3734_v14 = vpack.c.bf16 %v1665_v8, %v1663_v5  ;;  %v3672_v15 = vpack.c.bf16 %v3331_v10, %v3329_v9  ;;  %v3328_v16 = vld [vmem:[%s6895_s3 + $0x320] sm:$0xff]  ;;  %v3330_v6 = vld [vmem:[%s6895_s3 + $0x330] sm:$0xff] }
 0x1ae   : >> { %3725 = vmatprep.subr.bf16.mxu0 %v3724_v41  ;;  %v1667_v19 = vld [vmem:[%s6895_s3 + $0x120] sm:$0xff]  ;;  %v3736_v32 = vpack.c.bf16 %v1670_v12, %v1668_v11  ;;  %v1669_v60 = vld [vmem:[%s6895_s3 + $0x130] sm:$0xff]  ;;  %v3333_v3 = vld [vmem:[%s6895_s3 + $0x348] sm:$0xff]  ;;  %v3674_v23 = vpack.c.bf16 %v3330_v6, %v3328_v16 }
 0x1af   : >> { %v3335_v4 = vld [vmem:[%s6895_s3 + $0x358] sm:$0xff]  ;;  %v1672_v18 = vld [vmem:[%s6895_s3 + $0x148] sm:$0xff]  ;;  %v3738_v24 = vpack.c.bf16 %v1669_v60, %v1667_v19  ;;  %v3332_v20 = vld [vmem:[%s6895_s3 + $0x340] sm:$0xff] }
 0x1b0   : >> { %3663 = vmatpush1.bf16.msra.mxu1 %v3662_v48  ;;  %v1674_v22 = vld [vmem:[%s6895_s3 + $0x158] sm:$0xff]  ;;  %v3676_v42 = vpack.c.bf16 %v3335_v4, %v3333_v3  ;;  %v3334_v21 = vld [vmem:[%s6895_s3 + $0x350] sm:$0xff]  ;;  %v1671_v25 = vld [vmem:[%s6895_s3 + $0x140] sm:$0xff] }
 0x1b1   : >> { %3727 = vmatpush1.bf16.msra.mxu0 %v3726_v49  ;;  %3665 = vmatprep.subr.bf16.mxu1 %v3664_v50  ;;  %v3740_v26 = vpack.c.bf16 %v1674_v22, %v1672_v18  ;;  %v1673_v27 = vld [vmem:[%s6895_s3 + $0x150] sm:$0xff]  ;;  %v3337_v28 = vld [vmem:[%s6895_s3 + $0x368] sm:$0xff]  ;;  %v3339_v29 = vld [vmem:[%s6895_s3 + $0x378] sm:$0xff]  ;;  %v3678_v33 = vpack.c.bf16 %v3334_v21, %v3332_v20 }
 0x1b2   : >> { %3729 = vmatprep.subr.bf16.mxu0 %v3728_v54  ;;  %v1676_v30 = vld [vmem:[%s6895_s3 + $0x168] sm:$0xff]  ;;  %v1678_v31 = vld [vmem:[%s6895_s3 + $0x178] sm:$0xff]  ;;  %v3336_v34 = vld [vmem:[%s6895_s3 + $0x360] sm:$0xff]  ;;  %v3742_v35 = vpack.c.bf16 %v1673_v27, %v1671_v25  ;;  %v3680_v36 = vpack.c.bf16 %v3339_v29, %v3337_v28 }
 0x1b3   : >> { %v3338_v37 = vld [vmem:[%s6895_s3 + $0x370] sm:$0xff]  ;;  %v1675_v38 = vld [vmem:[%s6895_s3 + $0x160] sm:$0xff]  ;;  %v3744_v40 = vpack.c.bf16 %v1678_v31, %v1676_v30  ;;  %v3341_v41 = vld [vmem:[%s6895_s3 + $0x388] sm:$0xff] }
 0x1b4   : >> { %3667 = vmatpush1.bf16.msra.mxu1 %v3666_v62  ;;  %v1677_v39 = vld [vmem:[%s6895_s3 + $0x170] sm:$0xff]  ;;  %v3343_v43 = vld [vmem:[%s6895_s3 + $0x398] sm:$0xff]  ;;  %v1680_v57 = vld [vmem:[%s6895_s3 + $0x188] sm:$0xff]  ;;  %v3682_v48 = vpack.c.bf16 %v3338_v37, %v3336_v34 }
 0x1b5   : >> { %3731 = vmatpush1.bf16.msra.mxu0 %v3730_v63  ;;  %3669 = vmatprep.subr.bf16.mxu1 %v3668_v0  ;;  %v5557_v44 = vld [vmem:[%s5554_s25 + $0x18] sm:$0xff]  ;;  %v1616_v47 = vld [vmem:[%s5554_s25 + $0x8] sm:$0xff]  ;;  %v3746_v49 = vpack.c.bf16 %v1677_v39, %v1675_v38  ;;  %v3684_v50 = vpack.c.bf16 %v3343_v43, %v3341_v41  ;;  %v3340_v51 = vld [vmem:[%s6895_s3 + $0x380] sm:$0xff] }
 0x1b6   : >> { %3733 = vmatprep.subr.bf16.mxu0 %v3732_v7  ;;  %v1682_v45 = vld [vmem:[%s6895_s3 + $0x198] sm:$0xff]  ;;  %1844 = vmatprep.mubr.f32.mxu1 %v5557_v44  ;;  %v3342_v52 = vld [vmem:[%s6895_s3 + $0x390] sm:$0xff]  ;;  %v1679_v53 = vld [vmem:[%s6895_s3 + $0x180] sm:$0xff] }
 0x1b7   : >> { %1957 = vmatprep.mubr.f32.mxu0 %v1616_v47  ;;  %v3748_v54 = vpack.c.bf16 %v1682_v45, %v1680_v57  ;;  %v1681_v55 = vld [vmem:[%s6895_s3 + $0x190] sm:$0xff]  ;;  %v3345_v56 = vld [vmem:[%s6895_s3 + $0x3a8] sm:$0xff]  ;;  %v3347_v58 = vld [vmem:[%s6895_s3 + $0x3b8] sm:$0xff]  ;;  %v3686_v62 = vpack.c.bf16 %v3342_v52, %v3340_v51 }
 0x1b8   : >> { %3671 = vmatpush1.bf16.msra.mxu1 %v3670_v13  ;;  %v1684_v59 = vld [vmem:[%s6895_s3 + $0x1a8] sm:$0xff]  ;;  %v1686_v61 = vld [vmem:[%s6895_s3 + $0x1b8] sm:$0xff]  ;;  %v3750_v63 = vpack.c.bf16 %v1681_v55, %v1679_v53  ;;  %v3688_v0 = vpack.c.bf16 %v3347_v58, %v3345_v56  ;;  %v3344_v1 = vld [vmem:[%s6895_s3 + $0x3a0] sm:$0xff] }
 0x1b9   : >> { %3735 = vmatpush1.bf16.msra.mxu0 %v3734_v14  ;;  %3673 = vmatprep.subr.bf16.mxu1 %v3672_v15  ;;  %v3346_v2 = vld [vmem:[%s6895_s3 + $0x3b0] sm:$0xff]  ;;  %v1683_v5 = vld [vmem:[%s6895_s3 + $0x1a0] sm:$0xff]  ;;  %v3752_v7 = vpack.c.bf16 %v1686_v61, %v1684_v59  ;;  %v3349_v9 = vld [vmem:[%s6895_s3 + $0x3c8] sm:$0xff] }
 0x1ba   : >> { %3737 = vmatprep.subr.bf16.mxu0 %v3736_v32  ;;  %v1685_v8 = vld [vmem:[%s6895_s3 + $0x1b0] sm:$0xff]  ;;  %v3351_v10 = vld [vmem:[%s6895_s3 + $0x3d8] sm:$0xff]  ;;  %v1688_v11 = vld [vmem:[%s6895_s3 + $0x1c8] sm:$0xff]  ;;  %v3690_v13 = vpack.c.bf16 %v3346_v2, %v3344_v1 }
 0x1bb   : >> { %v1690_v12 = vld [vmem:[%s6895_s3 + $0x1d8] sm:$0xff]  ;;  %v3754_v14 = vpack.c.bf16 %v1685_v8, %v1683_v5  ;;  %v3692_v15 = vpack.c.bf16 %v3351_v10, %v3349_v9  ;;  %v3348_v16 = vld [vmem:[%s6895_s3 + $0x3c0] sm:$0xff]  ;;  %v3350_v6 = vld [vmem:[%s6895_s3 + $0x3d0] sm:$0xff] }
 0x1bc   : >> { %3675 = vmatpush1.bf16.msra.mxu1 %v3674_v23  ;;  %v1687_v19 = vld [vmem:[%s6895_s3 + $0x1c0] sm:$0xff]  ;;  %v3756_v32 = vpack.c.bf16 %v1690_v12, %v1688_v11  ;;  %v1689_v60 = vld [vmem:[%s6895_s3 + $0x1d0] sm:$0xff]  ;;  %v3353_v3 = vld [vmem:[%s6895_s3 + $0x3e8] sm:$0xff]  ;;  %v3694_v23 = vpack.c.bf16 %v3350_v6, %v3348_v16 }
 0x1bd   : >> { %3739 = vmatpush1.bf16.msra.mxu0 %v3738_v24  ;;  %3677 = vmatprep.subr.bf16.mxu1 %v3676_v42  ;;  %v3355_v4 = vld [vmem:[%s6895_s3 + $0x3f8] sm:$0xff]  ;;  %v1692_v18 = vld [vmem:[%s6895_s3 + $0x1e8] sm:$0xff]  ;;  %v3758_v24 = vpack.c.bf16 %v1689_v60, %v1687_v19  ;;  %v3352_v20 = vld [vmem:[%s6895_s3 + $0x3e0] sm:$0xff] }
 0x1be   : >> { %3741 = vmatprep.subr.bf16.mxu0 %v3740_v26  ;;  %v1694_v22 = vld [vmem:[%s6895_s3 + $0x1f8] sm:$0xff]  ;;  %v3696_v42 = vpack.c.bf16 %v3355_v4, %v3353_v3  ;;  %v3354_v21 = vld [vmem:[%s6895_s3 + $0x3f0] sm:$0xff]  ;;  %v1691_v25 = vld [vmem:[%s6895_s3 + $0x1e0] sm:$0xff] }
 0x1bf   : >> { %v3760_v26 = vpack.c.bf16 %v1694_v22, %v1692_v18  ;;  %v1693_v27 = vld [vmem:[%s6895_s3 + $0x1f0] sm:$0xff]  ;;  %v3375_v28 = vld [vmem:[%s6895_s3 + $0x408] sm:$0xff]  ;;  %v3377_v29 = vld [vmem:[%s6895_s3 + $0x418] sm:$0xff]  ;;  %v3698_v30 = vpack.c.bf16 %v3354_v21, %v3352_v20 }
 0x1c0   : >> { %3679 = vmatpush1.bf16.msra.mxu1 %v3678_v33  ;;  %v3762_v31 = vpack.c.bf16 %v1693_v27, %v1691_v25  ;;  %v3764_v33 = vpack.c.bf16 %v3377_v29, %v3375_v28  ;;  %v3374_v34 = vld [vmem:[%s6895_s3 + $0x400] sm:$0xff]  ;;  %v3381_v37 = vld [vmem:[%s6895_s3 + $0x438] sm:$0xff]  ;;  %v3276_v38 = vld [vmem:[%s5554_s25 + $0x10] sm:$0xff] }
 0x1c1   : >> { %3743 = vmatpush1.bf16.msra.mxu0 %v3742_v35  ;;  %3681 = vmatprep.subr.bf16.mxu1 %v3680_v36  ;;  %v3376_v35 = vld [vmem:[%s6895_s3 + $0x410] sm:$0xff]  ;;  %v3379_v36 = vld [vmem:[%s6895_s3 + $0x428] sm:$0xff]  ;;  %v3378_v43 = vld [vmem:[%s6895_s3 + $0x420] sm:$0xff] }
 0x1c2   : >> { %3745 = vmatprep.subr.bf16.mxu0 %v3744_v40  ;;  %v3766_v39 = vpack.c.bf16 %v3376_v35, %v3374_v34  ;;  %v1615_v40 = vld [vmem:[%s5554_s25] sm:$0xff]  ;;  %v3768_v41 = vpack.c.bf16 %v3381_v37, %v3379_v36  ;;  %v3380_v57 = vld [vmem:[%s6895_s3 + $0x430] sm:$0xff]  ;;  %v3383_v45 = vld [vmem:[%s6895_s3 + $0x448] sm:$0xff] }
 0x1c3   : >> { %v3385_v47 = vld [vmem:[%s6895_s3 + $0x458] sm:$0xff]  ;;  %v3382_v52 = vld [vmem:[%s6895_s3 + $0x440] sm:$0xff]  ;;  %v3384_v53 = vld [vmem:[%s6895_s3 + $0x450] sm:$0xff] }
 0x1c4   : >> { %3683 = vmatpush1.bf16.msra.mxu1 %v3682_v48  ;;  %v5684_v48 = vld [vmem:[%s5554_s25 + $0x28] sm:$0xff]  ;;  %v3772_v51 = vpack.c.bf16 %v3385_v47, %v3383_v45  ;;  %v3389_v55 = vld [vmem:[%s6895_s3 + $0x478] sm:$0xff]  ;;  %v3774_v58 = vpack.c.bf16 %v3384_v53, %v3382_v52  ;;  %v5708_v59 = vld [vmem:[%s5554_s25 + $0x30] sm:$0xff] }
 0x1c5   : >> { %3747 = vmatpush1.bf16.msra.mxu0 %v3746_v49  ;;  %3685 = vmatprep.subr.bf16.mxu1 %v3684_v50  ;;  %v3770_v49 = vpack.c.bf16 %v3380_v57, %v3378_v43  ;;  %v5687_v50 = vld [vmem:[%s5554_s25 + $0x20] sm:$0xff]  ;;  %v5705_v56 = vld [vmem:[%s5554_s25 + $0x38] sm:$0xff]  ;;  %v5726_v1 = vld [vmem:[%s5554_s25 + $0x48] sm:$0xff] }
 0x1c6   : >> { %3749 = vmatprep.subr.bf16.mxu0 %v3748_v54  ;;  %v3387_v54 = vld [vmem:[%s6895_s3 + $0x468] sm:$0xff]  ;;  %v5730_v5 = vld [vmem:[%s5554_s25 + $0x40] sm:$0xff]  ;;  %v3392_v9 = vld [vmem:[%s6895_s3 + $0x490] sm:$0xff] }
 0x1c7   : >> { %v3776_v61 = vpack.c.bf16 %v3389_v55, %v3387_v54  ;;  %v3390_v8 = vld [vmem:[%s6895_s3 + $0x480] sm:$0xff]  ;;  %v3395_v10 = vld [vmem:[%s6895_s3 + $0x4a8] sm:$0xff]  ;;  %v3397_v11 = vld [vmem:[%s6895_s3 + $0x4b8] sm:$0xff] }
 0x1c8   : >> { %3687 = vmatpush1.bf16.msra.mxu1 %v3686_v62  ;;  %v3386_v62 = vld [vmem:[%s6895_s3 + $0x460] sm:$0xff]  ;;  %v5748_v12 = vld [vmem:[%s5554_s25 + $0x58] sm:$0xff]  ;;  %v3396_v6 = vld [vmem:[%s6895_s3 + $0x4b0] sm:$0xff] }
 0x1c9   : >> { %3751 = vmatpush1.bf16.msra.mxu0 %v3750_v63  ;;  %3689 = vmatprep.subr.bf16.mxu1 %v3688_v0  ;;  %v3391_v63 = vld [vmem:[%s6895_s3 + $0x488] sm:$0xff]  ;;  %v3393_v0 = vld [vmem:[%s6895_s3 + $0x498] sm:$0xff]  ;;  %v3394_v16 = vld [vmem:[%s6895_s3 + $0x4a0] sm:$0xff] }
 0x1ca   : >> { %3753 = vmatprep.subr.bf16.mxu0 %v3752_v7  ;;  %v3780_v7 = vpack.c.bf16 %v3393_v0, %v3391_v63  ;;  %v3399_v19 = vld [vmem:[%s6895_s3 + $0x4c8] sm:$0xff]  ;;  %v3786_v3 = vpack.c.bf16 %v3396_v6, %v3394_v16  ;;  %v5772_v4 = vld [vmem:[%s5554_s25 + $0x60] sm:$0xff]  ;;  %v5789_v20 = vld [vmem:[%s5554_s25 + $0x78] sm:$0xff] }
 0x1cb   : >> { %v3287_v60 = vld [vmem:[%s5554_s25 + $0x68] sm:$0xff]  ;;  %v3398_v22 = vld [vmem:[%s6895_s3 + $0x4c0] sm:$0xff]  ;;  %v5793_v25 = vld [vmem:[%s5554_s25 + $0x70] sm:$0xff] }
 0x1cc   : >> { %3691 = vmatpush1.bf16.msra.mxu1 %v3690_v13  ;;  %v3782_v13 = vpack.c.bf16 %v3392_v9, %v3390_v8  ;;  %v3402_v27 = vld [vmem:[%s6895_s3 + $0x4e0] sm:$0xff]  ;;  %v3404_v28 = vld [vmem:[%s6895_s3 + $0x4f0] sm:$0xff]  ;;  %v3407_v29 = vld [vmem:[%s6895_s3 + $0x508] sm:$0xff] }
 0x1cd   : >> { %3755 = vmatpush1.bf16.msra.mxu0 %v3754_v14  ;;  %3693 = vmatprep.subr.bf16.mxu1 %v3692_v15  ;;  %v5752_v14 = vld [vmem:[%s5554_s25 + $0x50] sm:$0xff]  ;;  %v3784_v15 = vpack.c.bf16 %v3397_v11, %v3395_v10  ;;  %v5814_v34 = vld [vmem:[%s5554_s25 + $0x80] sm:$0xff]  ;;  %v3415_v45 = vld [vmem:[%s6895_s3 + $0x548] sm:$0xff] }
 0x1ce   : >> { %3757 = vmatprep.subr.bf16.mxu0 %v3756_v32  ;;  %v3401_v32 = vld [vmem:[%s6895_s3 + $0x4d8] sm:$0xff]  ;;  %v3406_v36 = vld [vmem:[%s6895_s3 + $0x500] sm:$0xff]  ;;  %v3408_v37 = vld [vmem:[%s6895_s3 + $0x510] sm:$0xff] }
 0x1cf   : >> { %v3788_v18 = vpack.c.bf16 %v3401_v32, %v3399_v19  ;;  %v3410_v43 = vld [vmem:[%s6895_s3 + $0x520] sm:$0xff]  ;;  %v3412_v57 = vld [vmem:[%s6895_s3 + $0x530] sm:$0xff]  ;;  %v3417_v47 = vld [vmem:[%s6895_s3 + $0x558] sm:$0xff] }
 0x1d0   : >> { %3695 = vmatpush1.bf16.msra.mxu1 %v3694_v23  ;;  %v3400_v23 = vld [vmem:[%s6895_s3 + $0x4d0] sm:$0xff]  ;;  %v3414_v52 = vld [vmem:[%s6895_s3 + $0x540] sm:$0xff]  ;;  %v3419_v54 = vld [vmem:[%s6895_s3 + $0x568] sm:$0xff] }
 0x1d1   : >> { %3759 = vmatpush1.bf16.msra.mxu0 %v3758_v24  ;;  %3697 = vmatprep.subr.bf16.mxu1 %v3696_v42  ;;  %v3403_v24 = vld [vmem:[%s6895_s3 + $0x4e8] sm:$0xff]  ;;  %v3405_v42 = vld [vmem:[%s6895_s3 + $0x4f8] sm:$0xff]  ;;  %v3790_v21 = vpack.c.bf16 %v3400_v23, %v3398_v22  ;;  %v3416_v53 = vld [vmem:[%s6895_s3 + $0x550] sm:$0xff] }
 0x1d2   : >> { %3761 = vmatprep.subr.bf16.mxu0 %v3760_v26  ;;  %v3792_v26 = vpack.c.bf16 %v3405_v42, %v3403_v24  ;;  %v3806_v55 = vpack.c.bf16 %v3416_v53, %v3414_v52  ;;  %v3425_v63 = vld [vmem:[%s6895_s3 + $0x598] sm:$0xff]  ;;  %v3424_v8 = vld [vmem:[%s6895_s3 + $0x590] sm:$0xff]  ;;  %v3427_v9 = vld [vmem:[%s6895_s3 + $0x5a8] sm:$0xff] }
 0x1d3   : >> { %v3429_v10 = vld [vmem:[%s6895_s3 + $0x5b8] sm:$0xff]  ;;  %v3428_v16 = vld [vmem:[%s6895_s3 + $0x5b0] sm:$0xff]  ;;  %v3431_v6 = vld [vmem:[%s6895_s3 + $0x5c8] sm:$0xff] }
 0x1d4   : >> { %3699 = vmatpush1.bf16.msra.mxu1 %v3698_v30  ;;  %v3409_v30 = vld [vmem:[%s6895_s3 + $0x518] sm:$0xff]  ;;  %v3435_v22 = vld [vmem:[%s6895_s3 + $0x5e8] sm:$0xff] }
 0x1d5   : >> { %3763 = vmatpush1.bf16.msra.mxu0 %v3762_v31  ;;  %4180 = vmatprep.subr.bf16.mxu1 %v3764_v33  ;;  %v5810_v31 = vld [vmem:[%s5554_s25 + $0x88] sm:$0xff]  ;;  %v3796_v35 = vpack.c.bf16 %v3409_v30, %v3407_v29  ;;  %v3433_v19 = vld [vmem:[%s6895_s3 + $0x5d8] sm:$0xff] }
 0x1d6   : >> { %3765 = vmatprep.subr.bf16.mxu0 %v3764_v33  ;;  %v3794_v33 = vpack.c.bf16 %v3404_v28, %v3402_v27  ;;  %v3437_v23 = vld [vmem:[%s6895_s3 + $0x5f8] sm:$0xff] }
 0x1d7   : >> { %1845 = vmatmul.mubr.f32.vlgmr.msra.gmra.mrb[0].mxu1 %v3276_v38  ;;  %v3824_v42 = vpack.c.bf16 %v3437_v23, %v3435_v22  ;;  %v3373_v28 = vld [vmem:[%s5554_s25 + $0x98] sm:$0xff] }
 0x1d8   : >> { %1958 = vmatmul.mubr.f32.vlgmr.msra.gmra.mrb[0].mxu0 %v1615_v40  ;;  %4196 = vmatpush1.bf16.msra.mxu1 %v3766_v39  ;;  %v3798_v40 = vpack.c.bf16 %v3408_v37, %v3406_v36 }
 0x1d9   : >> { %3767 = vmatpush1.bf16.msra.mxu0 %v3766_v39  ;;  %4181 = vmatprep.subr.bf16.mxu1 %v3768_v41  ;;  %v3413_v39 = vld [vmem:[%s6895_s3 + $0x538] sm:$0xff] }
 0x1da   : >> { %3769 = vmatprep.subr.bf16.mxu0 %v3768_v41  ;;  %1850 = vmatprep.mubr.f32.mxu1 %v5684_v48 }
 0x1db   : >> { %1963 = vmatprep.mubr.f32.mxu0 %v5557_v44  ;;  %1851 = vmatmul.mubr.f32.gmra.mrb[2].mxu1 %v5687_v50  ;;  %v3388_v44 = vld [vmem:[%s6895_s3 + $0x470] sm:$0xff] }
 0x1dc   : >> { %4197 = vmatpush1.bf16.msra.mxu1 %v3770_v49  ;;  %1964 = vmatmul.mubr.f32.gmra.mrb[2].mxu0 %v3276_v38  ;;  %v3778_v2 = vpack.c.bf16 %v3388_v44, %v3386_v62  ;;  %v3411_v38 = vld [vmem:[%s6895_s3 + $0x528] sm:$0xff]  ;;  %v3420_v62 = vld [vmem:[%s6895_s3 + $0x570] sm:$0xff] }
 0x1dd   : >> { %3771 = vmatpush1.bf16.msra.mxu0 %v3770_v49  ;;  %4182 = vmatprep.subr.bf16.mxu1 %v3772_v51  ;;  %v3800_v41 = vpack.c.bf16 %v3413_v39, %v3411_v38  ;;  %v3802_v49 = vpack.c.bf16 %v3412_v57, %v3410_v43  ;;  %v3423_v44 = vld [vmem:[%s6895_s3 + $0x588] sm:$0xff] }
 0x1de   : >> { %3773 = vmatprep.subr.bf16.mxu0 %v3772_v51  ;;  %1856 = vmatprep.mubr.f32.mxu1 %v5705_v56  ;;  %v3804_v51 = vpack.c.bf16 %v3417_v47, %v3415_v45 }
 0x1df   : >> { %1969 = vmatprep.mubr.f32.mxu0 %v5684_v48  ;;  %1857 = vmatmul.mubr.f32.gmra.mrb[4].mxu1 %v5708_v59 }
 0x1e0   : >> { %4198 = vmatpush1.bf16.msra.mxu1 %v3774_v58  ;;  %1970 = vmatmul.mubr.f32.gmra.mrb[4].mxu0 %v5687_v50 }
 0x1e1   : >> { %3775 = vmatpush1.bf16.msra.mxu0 %v3774_v58  ;;  %4183 = vmatprep.subr.bf16.mxu1 %v3776_v61 }
 0x1e2   : >> { %3777 = vmatprep.subr.bf16.mxu0 %v3776_v61  ;;  %1862 = vmatprep.mubr.f32.mxu1 %v5726_v1  ;;  %v3418_v61 = vld [vmem:[%s6895_s3 + $0x560] sm:$0xff] }
 0x1e3   : >> { %1975 = vmatprep.mubr.f32.mxu0 %v5705_v56  ;;  %1863 = vmatmul.mubr.f32.gmra.mrb[6].mxu1 %v5730_v5  ;;  %v3810_v0 = vpack.c.bf16 %v3420_v62, %v3418_v61 }
 0x1e4   : >> { %4199 = vmatpush1.bf16.msra.mxu1 %v3778_v2  ;;  %1976 = vmatmul.mubr.f32.gmra.mrb[6].mxu0 %v5708_v59 }
 0x1e5   : >> { %3779 = vmatpush1.bf16.msra.mxu0 %v3778_v2  ;;  %4184 = vmatprep.subr.bf16.mxu1 %v3780_v7  ;;  %v3812_v2 = vpack.c.bf16 %v3425_v63, %v3423_v44 }
 0x1e6   : >> { %3781 = vmatprep.subr.bf16.mxu0 %v3780_v7  ;;  %1868 = vmatprep.mubr.f32.mxu1 %v5748_v12  ;;  %v3422_v7 = vld [vmem:[%s6895_s3 + $0x580] sm:$0xff] }
 0x1e7   : >> { %1981 = vmatprep.mubr.f32.mxu0 %v5726_v1  ;;  %1869 = vmatmul.mubr.f32.gmra.mrb[8].mxu1 %v5752_v14  ;;  %v3814_v11 = vpack.c.bf16 %v3424_v8, %v3422_v7 }
 0x1e8   : >> { %4200 = vmatpush1.bf16.msra.mxu1 %v3782_v13  ;;  %1982 = vmatmul.mubr.f32.gmra.mrb[8].mxu0 %v5730_v5 }
 0x1e9   : >> { %3783 = vmatpush1.bf16.msra.mxu0 %v3782_v13  ;;  %4185 = vmatprep.subr.bf16.mxu1 %v3784_v15  ;;  %v3816_v13 = vpack.c.bf16 %v3429_v10, %v3427_v9 }
 0x1ea   : >> { %3785 = vmatprep.subr.bf16.mxu0 %v3784_v15  ;;  %1874 = vmatprep.mubr.f32.mxu1 %v3287_v60  ;;  %v3426_v15 = vld [vmem:[%s6895_s3 + $0x5a0] sm:$0xff] }
 0x1eb   : >> { %1987 = vmatprep.mubr.f32.mxu0 %v5748_v12  ;;  %1875 = vmatmul.mubr.f32.gmra.mrb[10].mxu1 %v5772_v4  ;;  %v3818_v32 = vpack.c.bf16 %v3428_v16, %v3426_v15 }
 0x1ec   : >> { %4201 = vmatpush1.bf16.msra.mxu1 %v3786_v3  ;;  %1988 = vmatmul.mubr.f32.gmra.mrb[10].mxu0 %v5752_v14 }
 0x1ed   : >> { %3787 = vmatpush1.bf16.msra.mxu0 %v3786_v3  ;;  %4186 = vmatprep.subr.bf16.mxu1 %v3788_v18  ;;  %v3430_v3 = vld [vmem:[%s6895_s3 + $0x5c0] sm:$0xff] }
 0x1ee   : >> { %3789 = vmatprep.subr.bf16.mxu0 %v3788_v18  ;;  %1880 = vmatprep.mubr.f32.mxu1 %v5789_v20  ;;  %v3432_v18 = vld [vmem:[%s6895_s3 + $0x5d0] sm:$0xff] }
 0x1ef   : >> { %1993 = vmatprep.mubr.f32.mxu0 %v3287_v60  ;;  %1881 = vmatmul.mubr.f32.gmra.mrb[12].mxu1 %v5793_v25  ;;  %v3822_v24 = vpack.c.bf16 %v3432_v18, %v3430_v3 }
 0x1f0   : >> { %4202 = vmatpush1.bf16.msra.mxu1 %v3790_v21  ;;  %1994 = vmatmul.mubr.f32.gmra.mrb[12].mxu0 %v5772_v4 }
 0x1f1   : >> { %3791 = vmatpush1.bf16.msra.mxu0 %v3790_v21  ;;  %4187 = vmatprep.subr.bf16.mxu1 %v3792_v26  ;;  %v3434_v21 = vld [vmem:[%s6895_s3 + $0x5e0] sm:$0xff] }
 0x1f2   : >> { %3793 = vmatprep.subr.bf16.mxu0 %v3792_v26  ;;  %1886 = vmatprep.mubr.f32.mxu1 %v5810_v31  ;;  %v3436_v26 = vld [vmem:[%s6895_s3 + $0x5f0] sm:$0xff] }
 0x1f3   : >> { %1999 = vmatprep.mubr.f32.mxu0 %v5789_v20  ;;  %1887 = vmatmul.mubr.f32.gmra.mrb[14].mxu1 %v5814_v34  ;;  %v3826_v27 = vpack.c.bf16 %v3436_v26, %v3434_v21 }
 0x1f4   : >> { %4203 = vmatpush1.bf16.msra.mxu1 %v3794_v33  ;;  %2000 = vmatmul.mubr.f32.gmra.mrb[14].mxu0 %v5793_v25 }
 0x1f5   : >> { %3795 = vmatpush1.bf16.msra.mxu0 %v3794_v33  ;;  %4188 = vmatprep.subr.bf16.mxu1 %v3796_v35 }
 0x1f6   : >> { %3797 = vmatprep.subr.bf16.mxu0 %v3796_v35  ;;  %2155 = vmatprep.mubr.f32.mxu0 %v5684_v48  ;;  %v3421_v48 = vld [vmem:[%s6895_s3 + $0x578] sm:$0xff] }
 0x1f7   : >> { %2179 = vmatprep.mubr.f32.mxu1 %v3287_v60  ;;  %v3808_v58 = vpack.c.bf16 %v3421_v48, %v3419_v54  ;;  %v3820_v60 = vpack.c.bf16 %v3433_v19, %v3431_v6 }
 0x1f8   : >> { %4204 = vmatpush1.bf16.msra.mxu1 %v3798_v40 }
 0x1f9   : >> { %3799 = vmatpush1.bf16.msra.mxu0 %v3798_v40  ;;  %4189 = vmatprep.subr.bf16.mxu1 %v3800_v41 }
 0x1fa   : >> { %3801 = vmatprep.subr.bf16.mxu0 %v3800_v41 }
 0x1fc   : >> { %4205 = vmatpush1.bf16.msra.mxu1 %v3802_v49 }
 0x1fd   : >> { %3803 = vmatpush1.bf16.msra.mxu0 %v3802_v49  ;;  %4190 = vmatprep.subr.bf16.mxu1 %v3804_v51 }
 0x1fe   : >> { %3805 = vmatprep.subr.bf16.mxu0 %v3804_v51 }
 0x200   : >> { %4206 = vmatpush1.bf16.msra.mxu1 %v3806_v55 }
 0x201   : >> { %3807 = vmatpush1.bf16.msra.mxu0 %v3806_v55  ;;  %4191 = vmatprep.subr.bf16.mxu1 %v3808_v58 }
 0x202   : >> { %3809 = vmatprep.subr.bf16.mxu0 %v3808_v58  ;;  %v2220_v58 = vld [vmem:[%s6896_s4] sm:$0x3] }
 0x203   : >> { %v5939_v61 = vrot.slane %v2220_v58, %v5190_v46  ;;  %v5942_v44 = vrot.slane %v2220_v58, %v5195_v17 }
 0x204   : >> { %4207 = vmatpush1.bf16.msra.mxu1 %v3810_v0 }
 0x205   : >> { %3811 = vmatpush1.bf16.msra.mxu0 %v3810_v0  ;;  %4192 = vmatprep.subr.bf16.mxu1 %v3812_v2 }
 0x206   : >> { %3813 = vmatprep.subr.bf16.mxu0 %v3812_v2 }
 0x208   : >> { %4208 = vmatpush1.bf16.msra.mxu1 %v3814_v11 }
 0x209   : >> { %3815 = vmatpush1.bf16.msra.mxu0 %v3814_v11  ;;  %4193 = vmatprep.subr.bf16.mxu1 %v3816_v13 }
 0x20a   : >> { %3817 = vmatprep.subr.bf16.mxu0 %v3816_v13 }
 0x20c   : >> { %4209 = vmatpush1.bf16.msra.mxu1 %v3818_v32 }
 0x20d   : >> { %3819 = vmatpush1.bf16.msra.mxu0 %v3818_v32  ;;  %4194 = vmatprep.subr.bf16.mxu1 %v3820_v60 }
 0x20e   : >> { %3821 = vmatprep.subr.bf16.mxu0 %v3820_v60 }
 0x210   : >> { %4210 = vmatpush1.bf16.msra.mxu1 %v3822_v24 }
 0x211   : >> { %3823 = vmatpush1.bf16.msra.mxu0 %v3822_v24  ;;  %4195 = vmatprep.subr.bf16.mxu1 %v3824_v42 }
 0x212   : >> { %3825 = vmatprep.subr.bf16.mxu0 %v3824_v42 }
 0x214   : >> { %4211 = vmatpush1.bf16.msra.mxu1 %v3826_v27 }
 0x215   : >> { %3827 = vmatpush1.bf16.msra.mxu0 %v3826_v27 }
 0x217   : >> { %2180 = vmatmul.mubr.f32.vlgmr.msra.gmra.mrb[16].mxu1 %v5772_v4  ;;  %v3372_v4 = vld [vmem:[%s5554_s25 + $0x90] sm:$0xff] }
 0x218   : >> { %2156 = vmatmul.mubr.f32.vlgmr.msra.gmra.mrb[0].mxu0 %v5687_v50  ;;  %2185 = vmatprep.mubr.f32.mxu1 %v5789_v20 }
 0x219   : >> { %2161 = vmatprep.mubr.f32.mxu0 %v5705_v56 }
 0x21b   : >> { %2186 = vmatmul.mubr.f32.gmra.mrb[18].mxu1 %v5793_v25 }
 0x21c   : >> { %2162 = vmatmul.mubr.f32.gmra.mrb[2].mxu0 %v5708_v59  ;;  %2191 = vmatprep.mubr.f32.mxu1 %v5810_v31 }
 0x21d   : >> { %2167 = vmatprep.mubr.f32.mxu0 %v5726_v1 }
 0x21f   : >> { %2192 = vmatmul.mubr.f32.gmra.mrb[20].mxu1 %v5814_v34 }
 0x220   : >> { %2168 = vmatmul.mubr.f32.gmra.mrb[4].mxu0 %v5730_v5  ;;  %2197 = vmatprep.mubr.f32.mxu1 %v3373_v28 }
 0x221   : >> { %2173 = vmatprep.mubr.f32.mxu0 %v5748_v12 }
 0x223   : >> { %2198 = vmatmul.mubr.f32.gmra.mrb[22].mxu1 %v3372_v4 }
 0x224   : >> { %2174 = vmatmul.mubr.f32.gmra.mrb[6].mxu0 %v5752_v14 }
 0x2aa   : >> { %v1846_v50 = vpop.f32.mrb[0].mxu1 }
 0x2ab   : >> { %v1848_v56 = vpop.f32.mrb[1].mxu1 }
 0x2ae   : >> { %v1852_v20 = vpop.f32.mrb[2].mxu1 }
 0x2af   : >> { %v1854_v59 = vpop.f32.mrb[3].mxu1 }
 0x2b2   : >> { %v5925_v25 = vpop.f32.mrb[4].mxu1 }
 0x2b3   : >> { %v5927_v29 = vpop.f32.mrb[5].mxu1 }
 0x2b6   : >> { %v5929_v1 = vpop.f32.mrb[6].mxu1 }
 0x2b7   : >> { %v5931_v30 = vpop.f32.mrb[7].mxu1 }
 0x2ba   : >> { %v1870_v5 = vpop.f32.mrb[8].mxu1 }
 0x2bb   : >> { %v1983_v31 = vpop.f32.mrb[8].mxu0  ;;  %v1872_v33 = vpop.f32.mrb[9].mxu1 }
 0x2bc   : >> { %v1984_v34 = vadd.f32 %v1983_v31, %v1870_v5  ;;  %v1985_v12 = vpop.f32.mrb[9].mxu0 }
 0x2bd   : >> { %v1986_v35 = vadd.f32 %v1985_v12, %v1872_v33 }
 0x2be   : >> { %v1876_v36 = vpop.f32.mrb[10].mxu1 }
 0x2bf   : >> { %v1989_v14 = vpop.f32.mrb[10].mxu0  ;;  %v1878_v37 = vpop.f32.mrb[11].mxu1 }
 0x2c0   : >> { %v1990_v38 = vadd.f32 %v1989_v14, %v1876_v36  ;;  %v1991_v39 = vpop.f32.mrb[11].mxu0 }
 0x2c1   : >> { %v1992_v40 = vadd.f32 %v1991_v39, %v1878_v37 }
 0x2c2   : >> { %v1882_v41 = vpop.f32.mrb[12].mxu1 }
 0x2c3   : >> { %v1995_v43 = vpop.f32.mrb[12].mxu0  ;;  %v1884_v57 = vpop.f32.mrb[13].mxu1 }
 0x2c4   : >> { %v1996_v45 = vadd.f32 %v1995_v43, %v1882_v41  ;;  %v1997_v47 = vpop.f32.mrb[13].mxu0 }
 0x2c5   : >> { %v1998_v49 = vadd.f32 %v1997_v47, %v1884_v57 }
 0x2c6   : >> { %v1888_v51 = vpop.f32.mrb[14].mxu1 }
 0x2c7   : >> { %v2001_v52 = vpop.f32.mrb[14].mxu0  ;;  %v1890_v53 = vpop.f32.mrb[15].mxu1 }
 0x2c8   : >> { %v2002_v54 = vadd.f32 %v2001_v52, %v1888_v51  ;;  %v2003_v48 = vpop.f32.mrb[15].mxu0 }
 0x2c9   : >> { %v5933_v55 = vadd.f32 %v2003_v48, %v1890_v53 }
 0x2ea   : >> { %v2181_v62 = vpop.f32.mrb[16].mxu1 }
 0x2eb   : >> { %v2157_v63 = vpop.f32.mrb[0].mxu0  ;;  %v2212_v0 = vadd.f32 %v2181_v62, %v1984_v34  ;;  %v2183_v2 = vpop.f32.mrb[17].mxu1 }
 0x2ec   : >> { %v4212_v7 = vadd.f32 %v2157_v63, %v1846_v50  ;;  %v2159_v8 = vpop.f32.mrb[1].mxu0  ;;  %v2213_v9 = vadd.f32 %v2183_v2, %v1986_v35 }
 0x2ed   : >> { %v2240_v10 = vadd.f32 %v5939_v61, %v2212_v0  ;;  %v4213_v11 = vadd.f32 %v2159_v8, %v1848_v56 }
 0x2ee   : >> { %v2232_v13 = vadd.f32 %v4212_v7, %v5939_v61  ;;  %v2241_v15 = vadd.f32 %v5942_v44, %v2213_v9  ;;  %v2187_v16 = vpop.f32.mrb[18].mxu1 }
 0x2ef   : >> { %v2256_v6 = vmax.f32 %v2240_v10, 0.0  ;;  %v2233_v19 = vadd.f32 %v4213_v11, %v5942_v44  ;;  %v2163_v32 = vpop.f32.mrb[2].mxu0  ;;  %v2214_v60 = vadd.f32 %v2187_v16, %v1990_v38  ;;  %v2189_v3 = vpop.f32.mrb[19].mxu1 }
 0x2f0   : >> { %v2248_v18 = vmax.f32 %v2232_v13, 0.0  ;;  %v2257_v22 = vmax.f32 %v2241_v15, 0.0  ;;  %v4214_v23 = vadd.f32 %v2163_v32, %v1852_v20  ;;  %v2165_v24 = vpop.f32.mrb[3].mxu0  ;;  %v2215_v42 = vadd.f32 %v2189_v3, %v1992_v40 }
 0x2f1   : >> { %v2249_v21 = vmax.f32 %v2233_v19, 0.0  ;;  %v2242_v26 = vadd.f32 %v5939_v61, %v2214_v60  ;;  %v4215_v27 = vadd.f32 %v2165_v24, %v1854_v59  ;;  %v2294_v24 = vld [vmem:[%s6897_s5 + $0x10] sm:$0xff] (%p1607_p0) }
 0x2f2   : >> { %v2268_v28 = vmax.f32 %v2256_v6, %v2257_v22  ;;  %v2234_v4 = vadd.f32 %v4214_v23, %v5939_v61  ;;  %v2243_v50 = vadd.f32 %v5942_v44, %v2215_v42  ;;  %v2193_v56 = vpop.f32.mrb[20].mxu1  ;;  %v2423_v22 = vld [vmem:[%s6897_s5 + $0x418] sm:$0xff] (%p1607_p0)  ;;  %v2292_v23 = vld [vmem:[%s6897_s5] sm:$0xff] (%p1607_p0) }
 0x2f3   : >> { %v2264_v5 = vmax.f32 %v2248_v18, %v2249_v21  ;;  %v2258_v31 = vmax.f32 %v2242_v26, 0.0  ;;  %v2235_v33 = vadd.f32 %v4215_v27, %v5942_v44  ;;  %v2169_v34 = vpop.f32.mrb[4].mxu0  ;;  %v2216_v12 = vadd.f32 %v2193_v56, %v1996_v45  ;;  %v2195_v20 = vpop.f32.mrb[21].mxu1  ;;  %v2420_v26 = vld [vmem:[%s6897_s5 + $0x400] sm:$0xff] (%p1607_p0)  ;;  %v2422_v27 = vld [vmem:[%s6897_s5 + $0x410] sm:$0xff] (%p1607_p0)  ;;  %v2425_v56 = vld [vmem:[%s6897_s5 + $0x428] sm:$0xff] (%p1607_p0) }
 0x2f4   : >> { %v2250_v35 = vmax.f32 %v2234_v4, 0.0  ;;  %v2259_v36 = vmax.f32 %v2243_v50, 0.0  ;;  %v4216_v14 = vadd.f32 %v2169_v34, %v5925_v25  ;;  %v2171_v37 = vpop.f32.mrb[5].mxu0  ;;  %v2217_v59 = vadd.f32 %v2195_v20, %v1998_v49  ;;  %v2299_v50 = vld [vmem:[%s6897_s5 + $0x38] sm:$0xff] (%p1607_p0)  ;;  %v2296_v34 = vld [vmem:[%s6897_s5 + $0x20] sm:$0xff] (%p1607_p0) }
 0x2f5   : >> { %v2251_v38 = vmax.f32 %v2235_v33, 0.0  ;;  %v2244_v39 = vadd.f32 %v5939_v61, %v2216_v12  ;;  %v4217_v40 = vadd.f32 %v2171_v37, %v5927_v29  ;;  %v3830_v21 = vpack.c.bf16 (%p1607_p0), %v2294_v24, %v2292_v23  ;;  %v2298_v12 = vld [vmem:[%s6897_s5 + $0x30] sm:$0xff] (%p1607_p0)  ;;  %v2424_v20 = vld [vmem:[%s6897_s5 + $0x420] sm:$0xff] (%p1607_p0)  ;;  %v2303_v37 = vld [vmem:[%s6897_s5 + $0x58] sm:$0xff] (%p1607_p0) }
 0x2f6   : >> { %v2269_v41 = vmax.f32 %v2258_v31, %v2259_v36  ;;  %v2236_v43 = vadd.f32 %v4216_v14, %v5939_v61  ;;  %v2245_v57 = vadd.f32 %v5942_v44, %v2217_v59  ;;  %v2199_v47 = vpop.f32.mrb[22].mxu1  ;;  %v3958_v4 = vpack.c.bf16 (%p1607_p0), %v2422_v27, %v2420_v26  ;;  %v2426_v36 = vld [vmem:[%s6897_s5 + $0x430] sm:$0xff] (%p1607_p0)  ;;  %v2301_v14 = vld [vmem:[%s6897_s5 + $0x48] sm:$0xff] (%p1607_p0)  ;;  %v2440_v23 = vld [vmem:[%s6897_s5 + $0x4a0] sm:$0xff] (%p1607_p0) }
 0x2f7   : >> { %v2265_v45 = vmax.f32 %v2250_v35, %v2251_v38  ;;  %v2260_v51 = vmax.f32 %v2244_v39, 0.0  ;;  %v2237_v52 = vadd.f32 %v4217_v40, %v5942_v44  ;;  %v2175_v53 = vpop.f32.mrb[6].mxu0  ;;  %v2218_v48 = vadd.f32 %v2199_v47, %v2002_v54  ;;  %v2201_v25 = vpop.f32.mrb[23].mxu1  ;;  %v2429_v39 = vld [vmem:[%s6897_s5 + $0x448] sm:$0xff] (%p1607_p0)  ;;  %v2431_v40 = vld [vmem:[%s6897_s5 + $0x458] sm:$0xff] (%p1607_p0)  ;;  %v2428_v47 = vld [vmem:[%s6897_s5 + $0x440] sm:$0xff] (%p1607_p0) }
 0x2f8   : >> { %v2274_v58 = vmax.f32 %v2268_v28, %v2269_v41  ;;  %v2252_v49 = vmax.f32 %v2236_v43, 0.0  ;;  %v2261_v62 = vmax.f32 %v2245_v57, 0.0  ;;  %v4218_v63 = vadd.f32 %v2175_v53, %v5929_v1  ;;  %v2177_v0 = vpop.f32.mrb[7].mxu0  ;;  %v2297_v28 = vld [vmem:[%s6897_s5 + $0x28] sm:$0xff] (%p1607_p0)  ;;  %v2300_v41 = vld [vmem:[%s6897_s5 + $0x40] sm:$0xff] (%p1607_p0)  ;;  %v2302_v57 = vld [vmem:[%s6897_s5 + $0x50] sm:$0xff] (%p1607_p0) }
 0x2f9   : >> { %v2272_v29 = vmax.f32 %v2264_v5, %v2265_v45  ;;  %v2253_v2 = vmax.f32 %v2237_v52, 0.0  ;;  %v2246_v7 = vadd.f32 %v5939_v61, %v2218_v48  ;;  %v4219_v8 = vadd.f32 %v2177_v0, %v5931_v30  ;;  %v2427_v5 = vld [vmem:[%s6897_s5 + $0x438] sm:$0xff] (%p1607_p0)  ;;  %v2430_v45 = vld [vmem:[%s6897_s5 + $0x450] sm:$0xff] (%p1607_p0)  ;;  %v2305_v52 = vld [vmem:[%s6897_s5 + $0x68] sm:$0xff] (%p1607_p0) }
 0x2fa   : >> { %2281 = vst [vmem:[%s2278_s22 + $0x10] sm:$0xff] %v2274_v58  ;;  %v2270_v9 = vmax.f32 %v2260_v51, %v2261_v62  ;;  %v2238_v10 = vadd.f32 %v4218_v63, %v5939_v61  ;;  %v2219_v54 = vadd.f32 %v2201_v25, %v5933_v55  ;;  %v2293_v55 = vld [vmem:[%s6897_s5 + $0x8] sm:$0xff] (%p1607_p0)  ;;  %v2295_v61 = vld [vmem:[%s6897_s5 + $0x18] sm:$0xff] (%p1607_p0)  ;;  %v3832_v31 = vpack.c.bf16 (%p1607_p0), %v2299_v50, %v2297_v28  ;;  %v2304_v62 = vld [vmem:[%s6897_s5 + $0x60] sm:$0xff] (%p1607_p0) }
 0x2fb   : >> { %2279 = vst [vmem:[%s2278_s22] sm:$0xff] %v2272_v29  ;;  %v2266_v11 = vmax.f32 %v2252_v49, %v2253_v2  ;;  %v2239_v13 = vadd.f32 %v4219_v8, %v5942_v44  ;;  %v2262_v1 = vmax.f32 %v2246_v7, 0.0  ;;  %v3828_v18 = vpack.c.bf16 (%p1607_p0), %v2295_v61, %v2293_v55  ;;  %v2307_v53 = vld [vmem:[%s6897_s5 + $0x78] sm:$0xff] (%p1607_p0)  ;;  %v2433_v48 = vld [vmem:[%s6897_s5 + $0x468] sm:$0xff] (%p1607_p0)  ;;  %v2306_v63 = vld [vmem:[%s6897_s5 + $0x70] sm:$0xff] (%p1607_p0) }
 0x2fc   : >> { %v2254_v15 = vmax.f32 %v2238_v10, 0.0  ;;  %v2247_v16 = vadd.f32 %v5942_v44, %v2219_v54  ;;  %v2421_v44 = vld [vmem:[%s6897_s5 + $0x408] sm:$0xff] (%p1607_p0)  ;;  %v3960_v33 = vpack.c.bf16 (%p1607_p0), %v2427_v5, %v2425_v56  ;;  %v3834_v35 = vpack.c.bf16 (%p1607_p0), %v2298_v12, %v2296_v34  ;;  %v2435_v49 = vld [vmem:[%s6897_s5 + $0x478] sm:$0xff] (%p1607_p0)  ;;  %v2432_v29 = vld [vmem:[%s6897_s5 + $0x460] sm:$0xff] (%p1607_p0) }
 0x2fd   : >> { %v2255_v6 = vmax.f32 %v2239_v13, 0.0  ;;  %v3956_v42 = vpack.c.bf16 (%p1607_p0), %v2423_v22, %v2421_v44  ;;  %3829 = vmatprep.subr.bf16.mxu1 (%p1607_p0), %v3828_v18  ;;  %v3962_v59 = vpack.c.bf16 (%p1607_p0), %v2426_v36, %v2424_v20  ;;  %v3836_v38 = vpack.c.bf16 (%p1607_p0), %v2303_v37, %v2301_v14  ;;  %v2434_v2 = vld [vmem:[%s6897_s5 + $0x470] sm:$0xff] (%p1607_p0)  ;;  %v2309_v7 = vld [vmem:[%s6897_s5 + $0x88] sm:$0xff] (%p1607_p0)  ;;  %v2311_v8 = vld [vmem:[%s6897_s5 + $0x98] sm:$0xff] (%p1607_p0) }
 0x2fe   : >> { %v2263_v19 = vmax.f32 %v2247_v16, 0.0  ;;  %1609 = sbr.rel (!%p1607_p0) target bundleno = 404 (0x194), region = 176  ;;  %3831 = vmatpush1.bf16.msra.mxu1 (%p1607_p0), %v3830_v21  ;;  %v3964_v43 = vpack.c.bf16 (%p1607_p0), %v2431_v40, %v2429_v39  ;;  %v3838_v51 = vpack.c.bf16 (%p1607_p0), %v2302_v57, %v2300_v41  ;;  %v3966_v25 = vpack.c.bf16 (%p1607_p0), %v2430_v45, %v2428_v47  ;;  %v2439_v10 = vld [vmem:[%s6897_s5 + $0x498] sm:$0xff] (%p1607_p0)  ;;  %v2436_v16 = vld [vmem:[%s6897_s5 + $0x480] sm:$0xff] (%p1607_p0)  ;;  %v2314_v22 = vld [vmem:[%s6897_s5 + $0xb0] sm:$0xff] (%p1607_p0) }
 0x2ff   : >> { %v2267_v32 = vmax.f32 %v2254_v15, %v2255_v6  ;;  %3957 = vmatprep.subr.bf16.mxu0 (%p1607_p0), %v3956_v42  ;;  %3833 = vmatprep.subr.bf16.mxu1 (%p1607_p0), %v3832_v31  ;;  %v3840_v58 = vpack.c.bf16 (%p1607_p0), %v2307_v53, %v2305_v52  ;;  %v3968_v0 = vpack.c.bf16 (%p1607_p0), %v2435_v49, %v2433_v48  ;;  %v2308_v15 = vld [vmem:[%s6897_s5 + $0x80] sm:$0xff] (%p1607_p0)  ;;  %v2442_v42 = vld [vmem:[%s6897_s5 + $0x4b0] sm:$0xff] (%p1607_p0)  ;;  %v2317_v21 = vld [vmem:[%s6897_s5 + $0xc8] sm:$0xff] (%p1607_p0) }
 0x300   : >> { %v2271_v60 = vmax.f32 %v2262_v1, %v2263_v19  ;;  %3959 = vmatpush1.bf16.msra.mxu0 (%p1607_p0), %v3958_v4  ;;  %v3842_v54 = vpack.c.bf16 (%p1607_p0), %v2306_v63, %v2304_v62  ;;  %v3844_v13 = vpack.c.bf16 (%p1607_p0), %v2311_v8, %v2309_v7  ;;  %v2310_v1 = vld [vmem:[%s6897_s5 + $0x90] sm:$0xff] (%p1607_p0)  ;;  %v2312_v18 = vld [vmem:[%s6897_s5 + $0xa0] sm:$0xff] (%p1607_p0)  ;;  %v2319_v26 = vld [vmem:[%s6897_s5 + $0xd8] sm:$0xff] (%p1607_p0)  ;;  %v3978_v50 = vpack.c.bf16 (%p1607_p0), %v2442_v42, %v2440_v23 }
 0x301   : >> { %v2273_v30 = vmax.f32 %v2266_v11, %v2267_v32  ;;  %3961 = vmatprep.subr.bf16.mxu0 (%p1607_p0), %v3960_v33  ;;  %v3970_v11 = vpack.c.bf16 (%p1607_p0), %v2434_v2, %v2432_v29  ;;  %v2438_v19 = vld [vmem:[%s6897_s5 + $0x490] sm:$0xff] (%p1607_p0)  ;;  %v2313_v32 = vld [vmem:[%s6897_s5 + $0xa8] sm:$0xff] (%p1607_p0)  ;;  %v3846_v55 = vpack.c.bf16 (%p1607_p0), %v2310_v1, %v2308_v15  ;;  %v2447_v28 = vld [vmem:[%s6897_s5 + $0x4d8] sm:$0xff] (%p1607_p0)  ;;  %v3850_v4 = vpack.c.bf16 (%p1607_p0), %v2314_v22, %v2312_v18 }
 0x302   : >> { %v2275_v3 = vmax.f32 %v2270_v9, %v2271_v60  ;;  %3835 = vmatpush1.bf16.msra.mxu1 (%p1607_p0), %v3834_v35  ;;  %v2437_v9 = vld [vmem:[%s6897_s5 + $0x488] sm:$0xff] (%p1607_p0)  ;;  %v2315_v60 = vld [vmem:[%s6897_s5 + $0xb8] sm:$0xff] (%p1607_p0)  ;;  %v3974_v61 = vpack.c.bf16 (%p1607_p0), %v2438_v19, %v2436_v16  ;;  %v3852_v56 = vpack.c.bf16 (%p1607_p0), %v2319_v26, %v2317_v21  ;;  %v2316_v5 = vld [vmem:[%s6897_s5 + $0xc0] sm:$0xff] (%p1607_p0) }
 0x303   : >> { %2280 = vst [vmem:[%s2278_s22 + $0x8] sm:$0xff] %v2273_v30  ;;  %3837 = vmatprep.subr.bf16.mxu1 (%p1607_p0), %v3836_v38  ;;  %v3972_v6 = vpack.c.bf16 (%p1607_p0), %v2439_v10, %v2437_v9  ;;  %v2441_v30 = vld [vmem:[%s6897_s5 + $0x4a8] sm:$0xff] (%p1607_p0)  ;;  %v3848_v44 = vpack.c.bf16 (%p1607_p0), %v2315_v60, %v2313_v32  ;;  %v2318_v31 = vld [vmem:[%s6897_s5 + $0xd0] sm:$0xff] (%p1607_p0)  ;;  %v2444_v33 = vld [vmem:[%s6897_s5 + $0x4c0] sm:$0xff] (%p1607_p0) }
 0x304   : >> { %2282 = vst [vmem:[%s2278_s22 + $0x18] sm:$0xff] %v2275_v3  ;;  %3963 = vmatpush1.bf16.msra.mxu0 (%p1607_p0), %v3962_v59  ;;  %v2443_v3 = vld [vmem:[%s6897_s5 + $0x4b8] sm:$0xff] (%p1607_p0)  ;;  %v2445_v27 = vld [vmem:[%s6897_s5 + $0x4c8] sm:$0xff] (%p1607_p0)  ;;  %v2446_v12 = vld [vmem:[%s6897_s5 + $0x4d0] sm:$0xff] (%p1607_p0)  ;;  %v3854_v37 = vpack.c.bf16 (%p1607_p0), %v2318_v31, %v2316_v5  ;;  %s4311_s22 = scalar_lea.vmem (%p1607_p0), %s6849_s29, 128 }
 0x305   : > { %3965 = vmatprep.subr.bf16.mxu0 %v3964_v43  ;;  %v3976_v24 = vpack.c.bf16 %v2443_v3, %v2441_v30  ;;  %v3980_v34 = vpack.c.bf16 %v2447_v28, %v2445_v27  ;;  %v2321_v20 = vld [vmem:[%s6897_s5 + $0xe8] sm:$0xff]  ;;  %v2323_v35 = vld [vmem:[%s6897_s5 + $0xf8] sm:$0xff]  ;;  %v3982_v59 = vpack.c.bf16 %v2446_v12, %v2444_v33  ;;  %v2320_v39 = vld [vmem:[%s6897_s5 + $0xe0] sm:$0xff]  ;;  %p4312_p1 = scmp.ne.s32.totalorder %s6849_s29, %s4311_s22  ;;  %p4319_p5 = scmp.lt.s32.totalorder %s4317_s16, %s4311_s22 }
 0x306   : > { %3839 = vmatpush1.bf16.msra.mxu1 %v3838_v51  ;;  %v2449_v36 = vld [vmem:[%s6897_s5 + $0x4e8] sm:$0xff]  ;;  %v2451_v14 = vld [vmem:[%s6897_s5 + $0x4f8] sm:$0xff]  ;;  %v3856_v38 = vpack.c.bf16 %v2323_v35, %v2321_v20  ;;  %v2322_v40 = vld [vmem:[%s6897_s5 + $0xf0] sm:$0xff] }
 0x307   : > { %3841 = vmatprep.subr.bf16.mxu1 %v3840_v58  ;;  %v2448_v41 = vld [vmem:[%s6897_s5 + $0x4e0] sm:$0xff]  ;;  %v3984_v43 = vpack.c.bf16 %v2451_v14, %v2449_v36  ;;  %v2450_v57 = vld [vmem:[%s6897_s5 + $0x4f0] sm:$0xff]  ;;  %v2325_v47 = vld [vmem:[%s6897_s5 + $0x108] sm:$0xff]  ;;  %v3858_v53 = vpack.c.bf16 %v2322_v40, %v2320_v39  ;;  %p4313_p2 = pnand %p4312_p1, %p4482_p6  ;;  %p4320_p7 = por %p4319_p5, %p4318_p4 }
 0x308   : > { %3967 = vmatpush1.bf16.msra.mxu0 %v3966_v25  ;;  %v2327_v45 = vld [vmem:[%s6897_s5 + $0x118] sm:$0xff]  ;;  %v2453_v51 = vld [vmem:[%s6897_s5 + $0x508] sm:$0xff]  ;;  %v3986_v48 = vpack.c.bf16 %v2450_v57, %v2448_v41  ;;  %v2324_v58 = vld [vmem:[%s6897_s5 + $0x100] sm:$0xff] }
 0x309   : > { %3969 = vmatprep.subr.bf16.mxu0 %v3968_v0  ;;  %v2455_v52 = vld [vmem:[%s6897_s5 + $0x518] sm:$0xff]  ;;  %v3860_v25 = vpack.c.bf16 %v2327_v45, %v2325_v47  ;;  %v2326_v49 = vld [vmem:[%s6897_s5 + $0x110] sm:$0xff]  ;;  %v2452_v62 = vld [vmem:[%s6897_s5 + $0x500] sm:$0xff]  ;;  %p4314_p3 = pneg %p4313_p2 }
 0x30a   : > { %3843 = vmatpush1.bf16.msra.mxu1 %v3842_v54  ;;  %v3988_v63 = vpack.c.bf16 %v2455_v52, %v2453_v51  ;;  %v2454_v0 = vld [vmem:[%s6897_s5 + $0x510] sm:$0xff]  ;;  %v2329_v29 = vld [vmem:[%s6897_s5 + $0x128] sm:$0xff]  ;;  %v2331_v2 = vld [vmem:[%s6897_s5 + $0x138] sm:$0xff]  ;;  %v3862_v9 = vpack.c.bf16 %v2326_v49, %v2324_v58 }
 0x30b   : > { %3845 = vmatprep.subr.bf16.mxu1 %v3844_v13  ;;  %v2457_v7 = vld [vmem:[%s6897_s5 + $0x528] sm:$0xff]  ;;  %v2459_v8 = vld [vmem:[%s6897_s5 + $0x538] sm:$0xff]  ;;  %v3990_v10 = vpack.c.bf16 %v2454_v0, %v2452_v62  ;;  %v3864_v54 = vpack.c.bf16 %v2331_v2, %v2329_v29  ;;  %v2330_v13 = vld [vmem:[%s6897_s5 + $0x130] sm:$0xff]  ;;  %p4321_p10 = pnand %p4320_p7, %p4314_p3 }
 0x30c   : > { %3971 = vmatpush1.bf16.msra.mxu0 %v3970_v11  ;;  %v2328_v11 = vld [vmem:[%s6897_s5 + $0x120] sm:$0xff]  ;;  %v3992_v1 = vpack.c.bf16 %v2459_v8, %v2457_v7  ;;  %v2458_v16 = vld [vmem:[%s6897_s5 + $0x530] sm:$0xff]  ;;  %v2335_v19 = vld [vmem:[%s6897_s5 + $0x158] sm:$0xff] }
 0x30d   : > { %3973 = vmatprep.subr.bf16.mxu0 %v3972_v6  ;;  %v2456_v15 = vld [vmem:[%s6897_s5 + $0x520] sm:$0xff]  ;;  %v2333_v6 = vld [vmem:[%s6897_s5 + $0x148] sm:$0xff]  ;;  %v2463_v60 = vld [vmem:[%s6897_s5 + $0x558] sm:$0xff]  ;;  %v3866_v30 = vpack.c.bf16 %v2330_v13, %v2328_v11 }
 0x30e   : > { %3847 = vmatpush1.bf16.msra.mxu1 %v3846_v55  ;;  %v2461_v32 = vld [vmem:[%s6897_s5 + $0x548] sm:$0xff]  ;;  %v3994_v3 = vpack.c.bf16 %v2458_v16, %v2456_v15  ;;  %v3868_v55 = vpack.c.bf16 %v2335_v19, %v2333_v6  ;;  %v2460_v18 = vld [vmem:[%s6897_s5 + $0x540] sm:$0xff]  ;;  %v2462_v23 = vld [vmem:[%s6897_s5 + $0x550] sm:$0xff] }
 0x30f   : > { %3849 = vmatprep.subr.bf16.mxu1 %v3848_v44  ;;  %v2334_v44 = vld [vmem:[%s6897_s5 + $0x150] sm:$0xff]  ;;  %v3996_v22 = vpack.c.bf16 %v2463_v60, %v2461_v32  ;;  %v2339_v42 = vld [vmem:[%s6897_s5 + $0x178] sm:$0xff]  ;;  %v2465_v21 = vld [vmem:[%s6897_s5 + $0x568] sm:$0xff] }
 0x310   : > { %3975 = vmatpush1.bf16.msra.mxu0 %v3974_v61  ;;  %v2332_v61 = vld [vmem:[%s6897_s5 + $0x140] sm:$0xff]  ;;  %v2467_v26 = vld [vmem:[%s6897_s5 + $0x578] sm:$0xff]  ;;  %v2466_v31 = vld [vmem:[%s6897_s5 + $0x570] sm:$0xff] }
 0x311   : > { %3977 = vmatprep.subr.bf16.mxu0 %v3976_v24  ;;  %v2337_v24 = vld [vmem:[%s6897_s5 + $0x168] sm:$0xff]  ;;  %v3870_v27 = vpack.c.bf16 %v2334_v44, %v2332_v61  ;;  %v2336_v28 = vld [vmem:[%s6897_s5 + $0x160] sm:$0xff]  ;;  %v4000_v33 = vpack.c.bf16 %v2467_v26, %v2465_v21  ;;  %v2343_v12 = vld [vmem:[%s6897_s5 + $0x198] sm:$0xff] }
 0x312   : > { %3851 = vmatpush1.bf16.msra.mxu1 %v3850_v4  ;;  %v3998_v4 = vpack.c.bf16 %v2462_v23, %v2460_v18  ;;  %v2464_v5 = vld [vmem:[%s6897_s5 + $0x560] sm:$0xff]  ;;  %v2284_v20 = vld [vmem:[#allocation3 + $0x8] sm:$0xff]  ;;  %v2471_v36 = vld [vmem:[%s6897_s5 + $0x598] sm:$0xff] }
 0x313   : > { %3853 = vmatprep.subr.bf16.mxu1 %v3852_v56  ;;  %v2338_v56 = vld [vmem:[%s6897_s5 + $0x170] sm:$0xff]  ;;  %v2469_v35 = vld [vmem:[%s6897_s5 + $0x588] sm:$0xff]  ;;  %2624 = vmatprep.mubr.f32.mxu1 %v2284_v20  ;;  %v2340_v39 = vld [vmem:[%s6897_s5 + $0x180] sm:$0xff] }
 0x314   : > { %3979 = vmatpush1.bf16.msra.mxu0 %v3978_v50  ;;  %v3872_v50 = vpack.c.bf16 %v2339_v42, %v2337_v24  ;;  %v2289_v14 = vld [vmem:[#allocation3 + $0x28] sm:$0xff]  ;;  %v2342_v40 = vld [vmem:[%s6897_s5 + $0x190] sm:$0xff]  ;;  %v2468_v41 = vld [vmem:[%s6897_s5 + $0x580] sm:$0xff] }
 0x315   : > { %3981 = vmatprep.subr.bf16.mxu0 %v3980_v34  ;;  %v2341_v34 = vld [vmem:[%s6897_s5 + $0x188] sm:$0xff]  ;;  %2766 = vmatprep.mubr.f32.mxu0 %v2289_v14  ;;  %v2470_v57 = vld [vmem:[%s6897_s5 + $0x590] sm:$0xff]  ;;  %v2347_v45 = vld [vmem:[%s6897_s5 + $0x1b8] sm:$0xff] }
 0x316   : > { %3855 = vmatpush1.bf16.msra.mxu1 %v3854_v37  ;;  %v3874_v37 = vpack.c.bf16 %v2338_v56, %v2336_v28  ;;  %v2345_v47 = vld [vmem:[%s6897_s5 + $0x1a8] sm:$0xff]  ;;  %v2475_v52 = vld [vmem:[%s6897_s5 + $0x5b8] sm:$0xff]  ;;  %v2344_v58 = vld [vmem:[%s6897_s5 + $0x1a0] sm:$0xff] }
 0x317   : > { %3857 = vmatprep.subr.bf16.mxu1 %v3856_v38  ;;  %v3876_v38 = vpack.c.bf16 %v2343_v12, %v2341_v34  ;;  %v2473_v51 = vld [vmem:[%s6897_s5 + $0x5a8] sm:$0xff]  ;;  %v2346_v49 = vld [vmem:[%s6897_s5 + $0x1b0] sm:$0xff]  ;;  %v2472_v62 = vld [vmem:[%s6897_s5 + $0x5a0] sm:$0xff] }
 0x318   : > { %3983 = vmatpush1.bf16.msra.mxu0 %v3982_v59  ;;  %v4002_v59 = vpack.c.bf16 %v2466_v31, %v2464_v5  ;;  %v2474_v0 = vld [vmem:[%s6897_s5 + $0x5b0] sm:$0xff]  ;;  %v2349_v29 = vld [vmem:[%s6897_s5 + $0x1c8] sm:$0xff]  ;;  %v2351_v2 = vld [vmem:[%s6897_s5 + $0x1d8] sm:$0xff] }
 0x319   : > { %3985 = vmatprep.subr.bf16.mxu0 %v3984_v43  ;;  %v4004_v43 = vpack.c.bf16 %v2471_v36, %v2469_v35  ;;  %v2477_v7 = vld [vmem:[%s6897_s5 + $0x5c8] sm:$0xff]  ;;  %v2479_v8 = vld [vmem:[%s6897_s5 + $0x5d8] sm:$0xff]  ;;  %v2348_v11 = vld [vmem:[%s6897_s5 + $0x1c0] sm:$0xff] }
 0x31a   : > { %3859 = vmatpush1.bf16.msra.mxu1 %v3858_v53  ;;  %v3878_v53 = vpack.c.bf16 %v2342_v40, %v2340_v39  ;;  %v2350_v13 = vld [vmem:[%s6897_s5 + $0x1d0] sm:$0xff]  ;;  %v2476_v15 = vld [vmem:[%s6897_s5 + $0x5c0] sm:$0xff]  ;;  %v2353_v6 = vld [vmem:[%s6897_s5 + $0x1e8] sm:$0xff] }
 0x31b   : > { %3861 = vmatprep.subr.bf16.mxu1 %v3860_v25  ;;  %v3880_v25 = vpack.c.bf16 %v2347_v45, %v2345_v47  ;;  %v2478_v16 = vld [vmem:[%s6897_s5 + $0x5d0] sm:$0xff]  ;;  %v2355_v19 = vld [vmem:[%s6897_s5 + $0x1f8] sm:$0xff]  ;;  %v2481_v32 = vld [vmem:[%s6897_s5 + $0x5e8] sm:$0xff] }
 0x31c   : > { %3987 = vmatpush1.bf16.msra.mxu0 %v3986_v48  ;;  %v4006_v48 = vpack.c.bf16 %v2470_v57, %v2468_v41  ;;  %v2483_v60 = vld [vmem:[%s6897_s5 + $0x5f8] sm:$0xff]  ;;  %v2352_v61 = vld [vmem:[%s6897_s5 + $0x1e0] sm:$0xff]  ;;  %v2354_v44 = vld [vmem:[%s6897_s5 + $0x1f0] sm:$0xff] }
 0x31d   : > { %3989 = vmatprep.subr.bf16.mxu0 %v3988_v63  ;;  %v4008_v63 = vpack.c.bf16 %v2475_v52, %v2473_v51  ;;  %v2480_v18 = vld [vmem:[%s6897_s5 + $0x5e0] sm:$0xff]  ;;  %v2482_v23 = vld [vmem:[%s6897_s5 + $0x5f0] sm:$0xff]  ;;  %v2357_v24 = vld [vmem:[%s6897_s5 + $0x208] sm:$0xff] }
 0x31e   : > { %3863 = vmatpush1.bf16.msra.mxu1 %v3862_v9  ;;  %v3882_v9 = vpack.c.bf16 %v2346_v49, %v2344_v58  ;;  %v2359_v42 = vld [vmem:[%s6897_s5 + $0x218] sm:$0xff]  ;;  %v2485_v21 = vld [vmem:[%s6897_s5 + $0x608] sm:$0xff]  ;;  %v4018_v28 = vpack.c.bf16 %v2482_v23, %v2480_v18  ;;  %v2358_v56 = vld [vmem:[%s6897_s5 + $0x210] sm:$0xff] }
 0x31f   : > { %3865 = vmatprep.subr.bf16.mxu1 %v3864_v54  ;;  %v3884_v54 = vpack.c.bf16 %v2351_v2, %v2349_v29  ;;  %v2487_v26 = vld [vmem:[%s6897_s5 + $0x618] sm:$0xff]  ;;  %v2484_v5 = vld [vmem:[%s6897_s5 + $0x600] sm:$0xff]  ;;  %v2361_v34 = vld [vmem:[%s6897_s5 + $0x228] sm:$0xff] }
 0x320   : > { %3991 = vmatpush1.bf16.msra.mxu0 %v3990_v10  ;;  %v4010_v10 = vpack.c.bf16 %v2474_v0, %v2472_v62  ;;  %v4020_v31 = vpack.c.bf16 %v2487_v26, %v2485_v21  ;;  %v2363_v12 = vld [vmem:[%s6897_s5 + $0x238] sm:$0xff]  ;;  %v2489_v20 = vld [vmem:[%s6897_s5 + $0x628] sm:$0xff]  ;;  %v2283_v36 = vld [vmem:[#allocation3] sm:$0xff] }
 0x321   : > { %3993 = vmatprep.subr.bf16.mxu0 %v3992_v1  ;;  %v4012_v1 = vpack.c.bf16 %v2479_v8, %v2477_v7  ;;  %v2491_v35 = vld [vmem:[%s6897_s5 + $0x638] sm:$0xff]  ;;  %v2360_v39 = vld [vmem:[%s6897_s5 + $0x220] sm:$0xff]  ;;  %v2362_v40 = vld [vmem:[%s6897_s5 + $0x230] sm:$0xff] }
 0x322   : > { %3867 = vmatpush1.bf16.msra.mxu1 %v3866_v30  ;;  %v3886_v30 = vpack.c.bf16 %v2350_v13, %v2348_v11  ;;  %v2488_v41 = vld [vmem:[%s6897_s5 + $0x620] sm:$0xff]  ;;  %v2490_v57 = vld [vmem:[%s6897_s5 + $0x630] sm:$0xff]  ;;  %v2365_v47 = vld [vmem:[%s6897_s5 + $0x248] sm:$0xff] }
 0x323   : > { %3869 = vmatprep.subr.bf16.mxu1 %v3868_v55  ;;  %v3888_v55 = vpack.c.bf16 %v2355_v19, %v2353_v6  ;;  %v2367_v45 = vld [vmem:[%s6897_s5 + $0x258] sm:$0xff]  ;;  %v2493_v51 = vld [vmem:[%s6897_s5 + $0x648] sm:$0xff]  ;;  %v2364_v58 = vld [vmem:[%s6897_s5 + $0x240] sm:$0xff] }
 0x324   : > { %3995 = vmatpush1.bf16.msra.mxu0 %v3994_v3  ;;  %v4014_v3 = vpack.c.bf16 %v2478_v16, %v2476_v15  ;;  %v2495_v52 = vld [vmem:[%s6897_s5 + $0x658] sm:$0xff]  ;;  %v2366_v49 = vld [vmem:[%s6897_s5 + $0x250] sm:$0xff]  ;;  %v2492_v62 = vld [vmem:[%s6897_s5 + $0x640] sm:$0xff] }
 0x325   : > { %3997 = vmatprep.subr.bf16.mxu0 %v3996_v22  ;;  %v4016_v22 = vpack.c.bf16 %v2483_v60, %v2481_v32  ;;  %v2494_v0 = vld [vmem:[%s6897_s5 + $0x650] sm:$0xff]  ;;  %v2369_v29 = vld [vmem:[%s6897_s5 + $0x268] sm:$0xff]  ;;  %v2371_v2 = vld [vmem:[%s6897_s5 + $0x278] sm:$0xff] }
 0x326   : > { %3871 = vmatpush1.bf16.msra.mxu1 %v3870_v27  ;;  %v3890_v27 = vpack.c.bf16 %v2354_v44, %v2352_v61  ;;  %v2497_v7 = vld [vmem:[%s6897_s5 + $0x668] sm:$0xff]  ;;  %v2499_v8 = vld [vmem:[%s6897_s5 + $0x678] sm:$0xff]  ;;  %v2368_v11 = vld [vmem:[%s6897_s5 + $0x260] sm:$0xff] }
 0x327   : > { %3873 = vmatprep.subr.bf16.mxu1 %v3872_v50  ;;  %v2356_v50 = vld [vmem:[%s6897_s5 + $0x200] sm:$0xff]  ;;  %v2370_v13 = vld [vmem:[%s6897_s5 + $0x270] sm:$0xff]  ;;  %v2373_v6 = vld [vmem:[%s6897_s5 + $0x288] sm:$0xff] }
 0x328   : > { %3999 = vmatpush1.bf16.msra.mxu0 %v3998_v4  ;;  %v3892_v4 = vpack.c.bf16 %v2359_v42, %v2357_v24  ;;  %v3894_v14 = vpack.c.bf16 %v2358_v56, %v2356_v50  ;;  %v2496_v15 = vld [vmem:[%s6897_s5 + $0x660] sm:$0xff]  ;;  %v2498_v16 = vld [vmem:[%s6897_s5 + $0x670] sm:$0xff]  ;;  %v2375_v19 = vld [vmem:[%s6897_s5 + $0x298] sm:$0xff] }
 0x329   : > { %4001 = vmatprep.subr.bf16.mxu0 %v4000_v33  ;;  %v2486_v33 = vld [vmem:[%s6897_s5 + $0x610] sm:$0xff]  ;;  %v2501_v32 = vld [vmem:[%s6897_s5 + $0x688] sm:$0xff]  ;;  %v2503_v60 = vld [vmem:[%s6897_s5 + $0x698] sm:$0xff] }
 0x32a   : > { %3875 = vmatpush1.bf16.msra.mxu1 %v3874_v37  ;;  %v2288_v37 = vld [vmem:[#allocation3 + $0x20] sm:$0xff]  ;;  %v2374_v44 = vld [vmem:[%s6897_s5 + $0x290] sm:$0xff]  ;;  %v2377_v24 = vld [vmem:[%s6897_s5 + $0x2a8] sm:$0xff] }
 0x32b   : > { %3877 = vmatprep.subr.bf16.mxu1 %v3876_v38  ;;  %v3896_v38 = vpack.c.bf16 %v2363_v12, %v2361_v34  ;;  %v2372_v61 = vld [vmem:[%s6897_s5 + $0x280] sm:$0xff]  ;;  %v2502_v23 = vld [vmem:[%s6897_s5 + $0x690] sm:$0xff]  ;;  %v2379_v42 = vld [vmem:[%s6897_s5 + $0x2b8] sm:$0xff] }
 0x32c   : > { %4003 = vmatpush1.bf16.msra.mxu0 %v4002_v59  ;;  %v4022_v59 = vpack.c.bf16 %v2486_v33, %v2484_v5  ;;  %v2500_v18 = vld [vmem:[%s6897_s5 + $0x680] sm:$0xff]  ;;  %v2505_v21 = vld [vmem:[%s6897_s5 + $0x6a8] sm:$0xff]  ;;  %v2507_v26 = vld [vmem:[%s6897_s5 + $0x6b8] sm:$0xff] }
 0x32d   : > { %4005 = vmatprep.subr.bf16.mxu0 %v4004_v43  ;;  %v4024_v43 = vpack.c.bf16 %v2491_v35, %v2489_v20  ;;  %v2376_v50 = vld [vmem:[%s6897_s5 + $0x2a0] sm:$0xff]  ;;  %v2378_v56 = vld [vmem:[%s6897_s5 + $0x2b0] sm:$0xff]  ;;  %v2381_v34 = vld [vmem:[%s6897_s5 + $0x2c8] sm:$0xff] }
 0x32e   : > { %3879 = vmatpush1.bf16.msra.mxu1 %v3878_v53  ;;  %v3898_v53 = vpack.c.bf16 %v2362_v40, %v2360_v39  ;;  %v2504_v5 = vld [vmem:[%s6897_s5 + $0x6a0] sm:$0xff]  ;;  %v2506_v33 = vld [vmem:[%s6897_s5 + $0x6b0] sm:$0xff]  ;;  %v2383_v12 = vld [vmem:[%s6897_s5 + $0x2d8] sm:$0xff] }
 0x32f   : > { %3881 = vmatprep.subr.bf16.mxu1 %v3880_v25  ;;  %v3900_v25 = vpack.c.bf16 %v2367_v45, %v2365_v47  ;;  %v2509_v20 = vld [vmem:[%s6897_s5 + $0x6c8] sm:$0xff]  ;;  %v2511_v35 = vld [vmem:[%s6897_s5 + $0x6d8] sm:$0xff]  ;;  %v2508_v39 = vld [vmem:[%s6897_s5 + $0x6c0] sm:$0xff] }
 0x330   : > { %4007 = vmatpush1.bf16.msra.mxu0 %v4006_v48  ;;  %v4026_v48 = vpack.c.bf16 %v2490_v57, %v2488_v41  ;;  %v2510_v40 = vld [vmem:[%s6897_s5 + $0x6d0] sm:$0xff]  ;;  %v4044_v41 = vpack.c.bf16 %v2511_v35, %v2509_v20  ;;  %v2387_v57 = vld [vmem:[%s6897_s5 + $0x2f8] sm:$0xff]  ;;  %v2513_v45 = vld [vmem:[%s6897_s5 + $0x6e8] sm:$0xff] }
 0x331   : > { %4009 = vmatprep.subr.bf16.mxu0 %v4008_v63  ;;  %v4028_v63 = vpack.c.bf16 %v2495_v52, %v2493_v51  ;;  %v2286_v47 = vld [vmem:[#allocation3 + $0x18] sm:$0xff]  ;;  %v2529_v20 = vld [vmem:[%s6897_s5 + $0x768] sm:$0xff] }
 0x332   : > { %3883 = vmatpush1.bf16.msra.mxu1 %v3882_v9  ;;  %v3902_v9 = vpack.c.bf16 %v2366_v49, %v2364_v58  ;;  %v2515_v51 = vld [vmem:[%s6897_s5 + $0x6f8] sm:$0xff]  ;;  %v2384_v58 = vld [vmem:[%s6897_s5 + $0x2e0] sm:$0xff]  ;;  %v2386_v49 = vld [vmem:[%s6897_s5 + $0x2f0] sm:$0xff] }
 0x333   : > { %3885 = vmatprep.subr.bf16.mxu1 %v3884_v54  ;;  %v3904_v54 = vpack.c.bf16 %v2371_v2, %v2369_v29  ;;  %v2291_v52 = vld [vmem:[#allocation3 + $0x38] sm:$0xff]  ;;  %v2389_v29 = vld [vmem:[%s6897_s5 + $0x308] sm:$0xff] }
 0x334   : > { %4011 = vmatpush1.bf16.msra.mxu0 %v4010_v10  ;;  %v4030_v10 = vpack.c.bf16 %v2494_v0, %v2492_v62  ;;  %v2512_v62 = vld [vmem:[%s6897_s5 + $0x6e0] sm:$0xff]  ;;  %v2514_v0 = vld [vmem:[%s6897_s5 + $0x6f0] sm:$0xff]  ;;  %v2391_v2 = vld [vmem:[%s6897_s5 + $0x318] sm:$0xff] }
 0x335   : > { %4013 = vmatprep.subr.bf16.mxu0 %v4012_v1  ;;  %v4032_v1 = vpack.c.bf16 %v2499_v8, %v2497_v7  ;;  %v2517_v7 = vld [vmem:[%s6897_s5 + $0x708] sm:$0xff]  ;;  %v2519_v8 = vld [vmem:[%s6897_s5 + $0x718] sm:$0xff] }
 0x336   : > { %3887 = vmatpush1.bf16.msra.mxu1 %v3886_v30  ;;  %v3906_v30 = vpack.c.bf16 %v2370_v13, %v2368_v11  ;;  %v2388_v11 = vld [vmem:[%s6897_s5 + $0x300] sm:$0xff]  ;;  %v2390_v13 = vld [vmem:[%s6897_s5 + $0x310] sm:$0xff]  ;;  %v2531_v35 = vld [vmem:[%s6897_s5 + $0x778] sm:$0xff] }
 0x337   : > { %3889 = vmatprep.subr.bf16.mxu1 %v3888_v55  ;;  %v3908_v55 = vpack.c.bf16 %v2375_v19, %v2373_v6  ;;  %v2393_v6 = vld [vmem:[%s6897_s5 + $0x328] sm:$0xff]  ;;  %v2395_v19 = vld [vmem:[%s6897_s5 + $0x338] sm:$0xff] }
 0x338   : > { %4015 = vmatpush1.bf16.msra.mxu0 %v4014_v3  ;;  %v4034_v3 = vpack.c.bf16 %v2498_v16, %v2496_v15  ;;  %v2516_v15 = vld [vmem:[%s6897_s5 + $0x700] sm:$0xff]  ;;  %v2518_v16 = vld [vmem:[%s6897_s5 + $0x710] sm:$0xff] }
 0x339   : > { %4017 = vmatprep.subr.bf16.mxu0 %v4016_v22  ;;  %v4036_v22 = vpack.c.bf16 %v2503_v60, %v2501_v32  ;;  %v2521_v32 = vld [vmem:[%s6897_s5 + $0x728] sm:$0xff]  ;;  %v2523_v60 = vld [vmem:[%s6897_s5 + $0x738] sm:$0xff] }
 0x33a   : > { %3891 = vmatpush1.bf16.msra.mxu1 %v3890_v27  ;;  %v3910_v27 = vpack.c.bf16 %v2374_v44, %v2372_v61  ;;  %v2392_v61 = vld [vmem:[%s6897_s5 + $0x320] sm:$0xff]  ;;  %v2394_v44 = vld [vmem:[%s6897_s5 + $0x330] sm:$0xff] }
 0x33b   : > { %3893 = vmatprep.subr.bf16.mxu1 %v3892_v4  ;;  %v3912_v4 = vpack.c.bf16 %v2379_v42, %v2377_v24  ;;  %v2397_v24 = vld [vmem:[%s6897_s5 + $0x348] sm:$0xff]  ;;  %v2399_v42 = vld [vmem:[%s6897_s5 + $0x358] sm:$0xff] }
 0x33c   : > { %4019 = vmatpush1.bf16.msra.mxu0 %v4018_v28  ;;  %v4038_v28 = vpack.c.bf16 %v2502_v23, %v2500_v18  ;;  %v2520_v18 = vld [vmem:[%s6897_s5 + $0x720] sm:$0xff]  ;;  %v2522_v23 = vld [vmem:[%s6897_s5 + $0x730] sm:$0xff] }
 0x33d   : > { %4021 = vmatprep.subr.bf16.mxu0 %v4020_v31  ;;  %2625 = vmatmul.mubr.f32.vlgmr.msra.gmra.mrb[0].mxu1 %v2283_v36  ;;  %v4040_v31 = vpack.c.bf16 %v2507_v26, %v2505_v21  ;;  %v3914_v36 = vpack.c.bf16 %v2378_v56, %v2376_v50  ;;  %v2525_v21 = vld [vmem:[%s6897_s5 + $0x748] sm:$0xff]  ;;  %v2527_v26 = vld [vmem:[%s6897_s5 + $0x758] sm:$0xff]  ;;  %v2396_v50 = vld [vmem:[%s6897_s5 + $0x340] sm:$0xff] }
 0x33e   : > { %3895 = vmatpush1.bf16.msra.mxu1 %v3894_v14  ;;  %v2380_v14 = vld [vmem:[%s6897_s5 + $0x2c0] sm:$0xff]  ;;  %2695 = vmatprep.mubr.f32.mxu1 %v2286_v47  ;;  %v2398_v56 = vld [vmem:[%s6897_s5 + $0x350] sm:$0xff]  ;;  %v2533_v47 = vld [vmem:[%s6897_s5 + $0x788] sm:$0xff] }
 0x33f   : > { %2767 = vmatmul.mubr.f32.vlgmr.msra.gmra.mrb[0].mxu0 %v2288_v37  ;;  %3897 = vmatprep.subr.bf16.mxu1 %v3896_v38  ;;  %v4042_v37 = vpack.c.bf16 %v2506_v33, %v2504_v5  ;;  %v2382_v38 = vld [vmem:[%s6897_s5 + $0x2d0] sm:$0xff]  ;;  %v2524_v5 = vld [vmem:[%s6897_s5 + $0x740] sm:$0xff] }
 0x340   : > { %4023 = vmatpush1.bf16.msra.mxu0 %v4022_v59  ;;  %v3916_v59 = vpack.c.bf16 %v2383_v12, %v2381_v34  ;;  %2837 = vmatprep.mubr.f32.mxu0 %v2291_v52  ;;  %v2526_v33 = vld [vmem:[%s6897_s5 + $0x750] sm:$0xff]  ;;  %v2401_v34 = vld [vmem:[%s6897_s5 + $0x368] sm:$0xff]  ;;  %v2403_v12 = vld [vmem:[%s6897_s5 + $0x378] sm:$0xff] }
 0x341   : > { %4025 = vmatprep.subr.bf16.mxu0 %v4024_v43  ;;  %v2385_v43 = vld [vmem:[%s6897_s5 + $0x2e8] sm:$0xff] }
 0x342   : > { %3899 = vmatpush1.bf16.msra.mxu1 %v3898_v53  ;;  %v3918_v53 = vpack.c.bf16 %v2382_v38, %v2380_v14  ;;  %v4062_v14 = vpack.c.bf16 %v2526_v33, %v2524_v5  ;;  %v2402_v38 = vld [vmem:[%s6897_s5 + $0x370] sm:$0xff]  ;;  %v2863_v33 = vld [vmem:[%s6899_s7 + $0x88] sm:$0xff] }
 0x343   : > { %3901 = vmatprep.subr.bf16.mxu1 %v3900_v25  ;;  %v3920_v25 = vpack.c.bf16 %v2387_v57, %v2385_v43  ;;  %v2405_v43 = vld [vmem:[%s6897_s5 + $0x388] sm:$0xff]  ;;  %v2407_v57 = vld [vmem:[%s6897_s5 + $0x398] sm:$0xff]  ;;  %v2546_v5 = vld [vmem:[%s6897_s5 + $0x7f0] sm:$0xff] }
 0x344   : > { %4027 = vmatpush1.bf16.msra.mxu0 %v4026_v48  ;;  %v4046_v48 = vpack.c.bf16 %v2510_v40, %v2508_v39  ;;  %v2528_v39 = vld [vmem:[%s6897_s5 + $0x760] sm:$0xff]  ;;  %v4064_v40 = vpack.c.bf16 %v2531_v35, %v2529_v20 }
 0x345   : > { %4029 = vmatprep.subr.bf16.mxu0 %v4028_v63  ;;  %v4048_v63 = vpack.c.bf16 %v2515_v51, %v2513_v45  ;;  %v2535_v45 = vld [vmem:[%s6897_s5 + $0x798] sm:$0xff]  ;;  %v2846_v35 = vld [vmem:[%s6899_s7] sm:$0xff] }
 0x346   : > { %3903 = vmatpush1.bf16.msra.mxu1 %v3902_v9  ;;  %v3922_v9 = vpack.c.bf16 %v2386_v49, %v2384_v58  ;;  %v2532_v58 = vld [vmem:[%s6897_s5 + $0x780] sm:$0xff]  ;;  %v4068_v49 = vpack.c.bf16 %v2535_v45, %v2533_v47  ;;  %v2867_v47 = vld [vmem:[%s6899_s7 + $0xa8] sm:$0xff] }
 0x347   : > { %3905 = vmatprep.subr.bf16.mxu1 %v3904_v54  ;;  %v3924_v54 = vpack.c.bf16 %v2391_v2, %v2389_v29  ;;  %v2537_v29 = vld [vmem:[%s6897_s5 + $0x7a8] sm:$0xff]  ;;  %v2539_v2 = vld [vmem:[%s6897_s5 + $0x7b8] sm:$0xff] }
 0x348   : > { %4031 = vmatpush1.bf16.msra.mxu0 %v4030_v10  ;;  %v4050_v10 = vpack.c.bf16 %v2514_v0, %v2512_v62  ;;  %v2534_v62 = vld [vmem:[%s6897_s5 + $0x790] sm:$0xff]  ;;  %v2411_v0 = vld [vmem:[%s6897_s5 + $0x3b8] sm:$0xff] }
 0x349   : > { %4033 = vmatprep.subr.bf16.mxu0 %v4032_v1  ;;  %v4052_v1 = vpack.c.bf16 %v2519_v8, %v2517_v7  ;;  %v4070_v8 = vpack.c.bf16 %v2534_v62, %v2532_v58  ;;  %v2852_v62 = vld [vmem:[%s6899_s7 + $0x30] sm:$0xff] }
 0x34a   : > { %3907 = vmatpush1.bf16.msra.mxu1 %v3906_v30  ;;  %v3926_v30 = vpack.c.bf16 %v2390_v13, %v2388_v11  ;;  %v2536_v11 = vld [vmem:[%s6897_s5 + $0x7a0] sm:$0xff]  ;;  %v4072_v13 = vpack.c.bf16 %v2539_v2, %v2537_v29  ;;  %v2871_v29 = vld [vmem:[%s6899_s7 + $0xc8] sm:$0xff] }
 0x34b   : > { %3909 = vmatprep.subr.bf16.mxu1 %v3908_v55  ;;  %v3928_v55 = vpack.c.bf16 %v2395_v19, %v2393_v6  ;;  %v2541_v6 = vld [vmem:[%s6897_s5 + $0x7c8] sm:$0xff]  ;;  %v2543_v19 = vld [vmem:[%s6897_s5 + $0x7d8] sm:$0xff] }
 0x34c   : > { %4035 = vmatpush1.bf16.msra.mxu0 %v4034_v3  ;;  %v4054_v3 = vpack.c.bf16 %v2518_v16, %v2516_v15  ;;  %v2538_v15 = vld [vmem:[%s6897_s5 + $0x7b0] sm:$0xff]  ;;  %v2415_v16 = vld [vmem:[%s6897_s5 + $0x3d8] sm:$0xff] }
 0x34d   : > { %4037 = vmatprep.subr.bf16.mxu0 %v4036_v22  ;;  %v4056_v22 = vpack.c.bf16 %v2523_v60, %v2521_v32  ;;  %v4074_v60 = vpack.c.bf16 %v2538_v15, %v2536_v11  ;;  %v2856_v15 = vld [vmem:[%s6899_s7 + $0x50] sm:$0xff] }
 0x34e   : > { %3911 = vmatpush1.bf16.msra.mxu1 %v3910_v27  ;;  %v3930_v27 = vpack.c.bf16 %v2394_v44, %v2392_v61  ;;  %v2540_v61 = vld [vmem:[%s6897_s5 + $0x7c0] sm:$0xff]  ;;  %v4076_v44 = vpack.c.bf16 %v2543_v19, %v2541_v6  ;;  %v2875_v19 = vld [vmem:[%s6899_s7 + $0xe8] sm:$0xff] }
 0x34f   : > { %3913 = vmatprep.subr.bf16.mxu1 %v3912_v4  ;;  %v3932_v4 = vpack.c.bf16 %v2399_v42, %v2397_v24  ;;  %v2545_v24 = vld [vmem:[%s6897_s5 + $0x7e8] sm:$0xff]  ;;  %v2547_v42 = vld [vmem:[%s6897_s5 + $0x7f8] sm:$0xff]  ;;  %v2874_v6 = vld [vmem:[%s6899_s7 + $0xe0] sm:$0xff] }
 0x350   : > { %4039 = vmatpush1.bf16.msra.mxu0 %v4038_v28  ;;  %v4058_v28 = vpack.c.bf16 %v2522_v23, %v2520_v18  ;;  %v2542_v18 = vld [vmem:[%s6897_s5 + $0x7d0] sm:$0xff]  ;;  %v2419_v23 = vld [vmem:[%s6897_s5 + $0x3f8] sm:$0xff] }
 0x351   : > { %4041 = vmatprep.subr.bf16.mxu0 %v4040_v31  ;;  %v4060_v31 = vpack.c.bf16 %v2527_v26, %v2525_v21  ;;  %v4078_v26 = vpack.c.bf16 %v2542_v18, %v2540_v61  ;;  %v2877_v61 = vld [vmem:[%s6899_s7 + $0xf8] sm:$0xff]  ;;  %v2860_v18 = vld [vmem:[%s6899_s7 + $0x70] sm:$0xff] }
 0x352   : > { %3915 = vmatpush1.bf16.msra.mxu1 %v3914_v36  ;;  %v3934_v36 = vpack.c.bf16 %v2398_v56, %v2396_v50  ;;  %v2544_v50 = vld [vmem:[%s6897_s5 + $0x7e0] sm:$0xff]  ;;  %v4080_v56 = vpack.c.bf16 %v2547_v42, %v2545_v24 }
 0x353   : > { %3917 = vmatprep.subr.bf16.mxu1 %v3916_v59  ;;  %v2400_v59 = vld [vmem:[%s6897_s5 + $0x360] sm:$0xff] }
 0x354   : > { %4043 = vmatpush1.bf16.msra.mxu0 %v4042_v37  ;;  %v3936_v37 = vpack.c.bf16 %v2403_v12, %v2401_v34  ;;  %v3938_v51 = vpack.c.bf16 %v2402_v38, %v2400_v59  ;;  %v4082_v12 = vpack.c.bf16 %v2546_v5, %v2544_v50  ;;  %v2285_v59 = vld [vmem:[#allocation3 + $0x10] sm:$0xff]  ;;  %v2548_v24 = vld [vmem:[%s6898_s6] sm:$0x3] }
 0x355   : > { %4045 = vmatprep.subr.bf16.mxu0 %v4044_v41  ;;  %v2530_v41 = vld [vmem:[%s6897_s5 + $0x770] sm:$0xff]  ;;  %v2553_v42 = vrot.slane %v2548_v24, %v5190_v46 }
 0x356   : > { %3919 = vmatpush1.bf16.msra.mxu1 %v3918_v53  ;;  %v4066_v52 = vpack.c.bf16 %v2530_v41, %v2528_v39  ;;  %v3940_v53 = vpack.c.bf16 %v2407_v57, %v2405_v43  ;;  %v2290_v39 = vld [vmem:[#allocation3 + $0x30] sm:$0xff]  ;;  %v2849_v43 = vld [vmem:[%s6899_s7 + $0x18] sm:$0xff]  ;;  %v2866_v57 = vld [vmem:[%s6899_s7 + $0xa0] sm:$0xff] }
 0x357   : > { %3921 = vmatprep.subr.bf16.mxu1 %v3920_v25  ;;  %v2406_v25 = vld [vmem:[%s6897_s5 + $0x390] sm:$0xff] }
 0x358   : > { %4047 = vmatpush1.bf16.msra.mxu0 %v4046_v48  ;;  %v2404_v48 = vld [vmem:[%s6897_s5 + $0x380] sm:$0xff]  ;;  %v2848_v41 = vld [vmem:[%s6899_s7 + $0x10] sm:$0xff] }
 0x359   : > { %4049 = vmatprep.subr.bf16.mxu0 %v4048_v63  ;;  %v2409_v63 = vld [vmem:[%s6897_s5 + $0x3a8] sm:$0xff]  ;;  %v3942_v7 = vpack.c.bf16 %v2406_v25, %v2404_v48  ;;  %v4090_v45 = vpack.c.bf16 %v2849_v43, %v2848_v41  ;;  %v2868_v48 = vld [vmem:[%s6899_s7 + $0xb0] sm:$0xff]  ;;  %v2869_v25 = vld [vmem:[%s6899_s7 + $0xb8] sm:$0xff] }
 0x35a   : > { %3923 = vmatpush1.bf16.msra.mxu1 %v3922_v9  ;;  %v3944_v9 = vpack.c.bf16 %v2411_v0, %v2409_v63  ;;  %v2853_v63 = vld [vmem:[%s6899_s7 + $0x38] sm:$0xff]  ;;  %v2870_v0 = vld [vmem:[%s6899_s7 + $0xc0] sm:$0xff] }
 0x35b   : > { %3925 = vmatprep.subr.bf16.mxu1 %v3924_v54  ;;  %v2410_v54 = vld [vmem:[%s6897_s5 + $0x3b0] sm:$0xff]  ;;  %v4098_v2 = vpack.c.bf16 %v2853_v63, %v2852_v62 }
 0x35c   : > { %4051 = vmatpush1.bf16.msra.mxu0 %v4050_v10  ;;  %v2408_v10 = vld [vmem:[%s6897_s5 + $0x3a0] sm:$0xff] }
 0x35d   : > { %4053 = vmatprep.subr.bf16.mxu0 %v4052_v1  ;;  %v2413_v1 = vld [vmem:[%s6897_s5 + $0x3c8] sm:$0xff]  ;;  %v3946_v32 = vpack.c.bf16 %v2410_v54, %v2408_v10  ;;  %v2872_v10 = vld [vmem:[%s6899_s7 + $0xd0] sm:$0xff]  ;;  %v2873_v54 = vld [vmem:[%s6899_s7 + $0xd8] sm:$0xff] }
 0x35e   : > { %3927 = vmatpush1.bf16.msra.mxu1 %v3926_v30  ;;  %v3948_v30 = vpack.c.bf16 %v2415_v16, %v2413_v1  ;;  %v2857_v1 = vld [vmem:[%s6899_s7 + $0x58] sm:$0xff] }
 0x35f   : > { %3929 = vmatprep.subr.bf16.mxu1 %v3928_v55  ;;  %v2414_v55 = vld [vmem:[%s6897_s5 + $0x3d0] sm:$0xff]  ;;  %v4106_v16 = vpack.c.bf16 %v2857_v1, %v2856_v15 }
 0x360   : > { %4055 = vmatpush1.bf16.msra.mxu0 %v4054_v3  ;;  %v2412_v3 = vld [vmem:[%s6897_s5 + $0x3c0] sm:$0xff] }
 0x361   : > { %4057 = vmatprep.subr.bf16.mxu0 %v4056_v22  ;;  %v2417_v22 = vld [vmem:[%s6897_s5 + $0x3e8] sm:$0xff]  ;;  %v3950_v21 = vpack.c.bf16 %v2414_v55, %v2412_v3  ;;  %v2876_v55 = vld [vmem:[%s6899_s7 + $0xf0] sm:$0xff] }
 0x362   : > { %3931 = vmatpush1.bf16.msra.mxu1 %v3930_v27  ;;  %v3952_v27 = vpack.c.bf16 %v2419_v23, %v2417_v22  ;;  %v2861_v22 = vld [vmem:[%s6899_s7 + $0x78] sm:$0xff] }
 0x363   : > { %3933 = vmatprep.subr.bf16.mxu1 %v3932_v4  ;;  %v2418_v4 = vld [vmem:[%s6897_s5 + $0x3f0] sm:$0xff]  ;;  %v4114_v23 = vpack.c.bf16 %v2861_v22, %v2860_v18 }
 0x364   : > { %4059 = vmatpush1.bf16.msra.mxu0 %v4058_v28  ;;  %v2416_v28 = vld [vmem:[%s6897_s5 + $0x3e0] sm:$0xff] }
 0x365   : > { %4061 = vmatprep.subr.bf16.mxu0 %v4060_v31  ;;  %v2862_v31 = vld [vmem:[%s6899_s7 + $0x80] sm:$0xff]  ;;  %v3954_v34 = vpack.c.bf16 %v2418_v4, %v2416_v28 }
 0x366   : > { %3935 = vmatpush1.bf16.msra.mxu1 %v3934_v36  ;;  %v4084_v20 = vpack.c.bf16 %v2863_v33, %v2862_v31  ;;  %v2847_v36 = vld [vmem:[%s6899_s7 + $0x8] sm:$0xff] }
 0x367   : > { %3937 = vmatprep.subr.bf16.mxu1 %v3936_v37  ;;  %v2865_v37 = vld [vmem:[%s6899_s7 + $0x98] sm:$0xff]  ;;  %v4086_v38 = vpack.c.bf16 %v2847_v36, %v2846_v35 }
 0x368   : > { %4063 = vmatpush1.bf16.msra.mxu0 %v4062_v14  ;;  %v2864_v14 = vld [vmem:[%s6899_s7 + $0x90] sm:$0xff] }
 0x369   : > { %4065 = vmatprep.subr.bf16.mxu0 %v4064_v40  ;;  %v4088_v40 = vpack.c.bf16 %v2865_v37, %v2864_v14 }
 0x36a   : > { %3939 = vmatpush1.bf16.msra.mxu1 %v3938_v51  ;;  %v4092_v51 = vpack.c.bf16 %v2867_v47, %v2866_v57 }
 0x36b   : > { %3941 = vmatprep.subr.bf16.mxu1 %v3940_v53  ;;  %v2851_v53 = vld [vmem:[%s6899_s7 + $0x28] sm:$0xff] }
 0x36c   : > { %4067 = vmatpush1.bf16.msra.mxu0 %v4066_v52  ;;  %v2850_v52 = vld [vmem:[%s6899_s7 + $0x20] sm:$0xff] }
 0x36d   : > { %4069 = vmatprep.subr.bf16.mxu0 %v4068_v49  ;;  %v4094_v58 = vpack.c.bf16 %v2851_v53, %v2850_v52  ;;  %v4096_v49 = vpack.c.bf16 %v2869_v25, %v2868_v48 }
 0x36e   : > { %3943 = vmatpush1.bf16.msra.mxu1 %v3942_v7  ;;  %v4100_v7 = vpack.c.bf16 %v2871_v29, %v2870_v0 }
 0x36f   : > { %3945 = vmatprep.subr.bf16.mxu1 %v3944_v9  ;;  %v2855_v9 = vld [vmem:[%s6899_s7 + $0x48] sm:$0xff] }
 0x370   : > { %4071 = vmatpush1.bf16.msra.mxu0 %v4070_v8  ;;  %v2854_v8 = vld [vmem:[%s6899_s7 + $0x40] sm:$0xff] }
 0x371   : > { %4073 = vmatprep.subr.bf16.mxu0 %v4072_v13  ;;  %v4102_v11 = vpack.c.bf16 %v2855_v9, %v2854_v8  ;;  %v4104_v13 = vpack.c.bf16 %v2873_v54, %v2872_v10 }
 0x372   : > { %3947 = vmatpush1.bf16.msra.mxu1 %v3946_v32  ;;  %v4108_v32 = vpack.c.bf16 %v2875_v19, %v2874_v6 }
 0x373   : > { %3949 = vmatprep.subr.bf16.mxu1 %v3948_v30  ;;  %v2859_v30 = vld [vmem:[%s6899_s7 + $0x68] sm:$0xff] }
 0x374   : > { %4075 = vmatpush1.bf16.msra.mxu0 %v4074_v60  ;;  %v2858_v60 = vld [vmem:[%s6899_s7 + $0x60] sm:$0xff] }
 0x375   : > { %4077 = vmatprep.subr.bf16.mxu0 %v4076_v44  ;;  %v4110_v3 = vpack.c.bf16 %v2859_v30, %v2858_v60  ;;  %v4112_v44 = vpack.c.bf16 %v2877_v61, %v2876_v55 }
 0x376   : > { %3951 = vmatpush1.bf16.msra.mxu1 %v3950_v21  ;;  %v2557_v21 = vrot.slane %v2548_v24, %v5195_v17  ;;  %v3440_v17 = vld [vmem:[%s6900_s8] ss:$0 sm:$0xff] }
 0x377   : > { %3953 = vmatprep.subr.bf16.mxu1 %v3952_v27 }
 0x378   : > { %4079 = vmatpush1.bf16.msra.mxu0 %v4078_v26 }
 0x379   : > { %4081 = vmatprep.subr.bf16.mxu0 %v4080_v56 }
 0x37a   : > { %3955 = vmatpush1.bf16.msra.mxu1 %v3954_v34 }
 0x37b   : > { %4085 = vmatprep.subr.bf16.mxu1 %v4084_v20 }
 0x37c   : > { %4083 = vmatpush1.bf16.msra.mxu0 %v4082_v12 }
 0x37d   : > { %2696 = vmatmul.mubr.f32.vlgmr.msra.gmra.mrb[0].mxu1 %v2285_v59 }
 0x37e   : > { %4087 = vmatpush3.bf16.msra.mxu1 %v4086_v38 }
 0x37f   : > { %2838 = vmatmul.mubr.f32.vlgmr.msra.gmra.mrb[0].mxu0 %v2290_v39  ;;  %4089 = vmatprep.subr.bf16.mxu1 %v4088_v40 }
 0x382   : > { %4091 = vmatpush3.bf16.msra.mxu1 %v4090_v45 }
 0x383   : > { %4093 = vmatprep.subr.bf16.mxu1 %v4092_v51 }
 0x386   : > { %4095 = vmatpush3.bf16.msra.mxu1 %v4094_v58 }
 0x387   : > { %4097 = vmatprep.subr.bf16.mxu1 %v4096_v49 }
 0x38a   : > { %4099 = vmatpush3.bf16.msra.mxu1 %v4098_v2 }
 0x38b   : > { %4101 = vmatprep.subr.bf16.mxu1 %v4100_v7 }
 0x38e   : > { %4103 = vmatpush3.bf16.msra.mxu1 %v4102_v11 }
 0x38f   : > { %4105 = vmatprep.subr.bf16.mxu1 %v4104_v13 }
 0x392   : > { %4107 = vmatpush3.bf16.msra.mxu1 %v4106_v16 }
 0x393   : > { %4109 = vmatprep.subr.bf16.mxu1 %v4108_v32 }
 0x396   : > { %4111 = vmatpush3.bf16.msra.mxu1 %v4110_v3 }
 0x397   : > { %4113 = vmatprep.subr.bf16.mxu1 %v4112_v44 }
 0x39a   : > { %4115 = vmatpush3.bf16.msra.mxu1 %v4114_v23 }
 0x450   : > { %v2697_v26 = vpop.f32.mrb[0].mxu1 }
 0x451   : > { %v4244_v27 = vadd.f32 %v2697_v26, %v2553_v42  ;;  %v2699_v4 = vpop.f32.mrb[1].mxu1 }
 0x452   : > { %v2839_v28 = vpop.f32.mrb[0].mxu0  ;;  %v4246_v50 = vadd.f32 %v2699_v4, %v2557_v21 }
 0x453   : > { %v2841_v56 = vpop.f32.mrb[1].mxu0  ;;  %v4245_v5 = vadd.f32 %v4244_v27, %v2839_v28 }
 0x454   : > { %v4247_v31 = vadd.f32 %v4246_v50, %v2841_v56 }
 0x455   : > { %v2844_v34 = vmax.f32 %v4245_v5, 0.0 }
 0x456   : > { %v2845_v33 = vmax.f32 %v4247_v31, 0.0 }
 0x458   : > { %2949 = vmatprep.mubr.f32.mxu1 %v2845_v33 }
 0x459   : > { %2950 = vmatmul.mubr.f32.vlgmr.msra.gmra.mrb[2].mxu1 %v2844_v34 }
 0x52c   : > { %v3489_v46 = vpop.f32.mrb[2].mxu1 }
 0x52d   : > { %v3490_v12 = vpop.f32.mrb[3].mxu1 }
 0x52e   : > { %v3491_v20 = vadd.f32 %v3490_v12, %v3489_v46 }
 0x530   : > { %v2952_v35 = vadd.f32 %v3491_v20, %v3440_v17 }
 0x532   : > { %2955 = vst [vmem:[%s4579_s17] sm:$0xff] %v2952_v35 }
 0x533   : > { %4324 = shalt.err (!%p4321_p10)
}
 0x534   : > { %s4325_s28 = scalar_lea.hbm %s6847_s14, 128  ;;  %s4329_s13 = scalar_lea.hbm %s6901_s9, 256 }
 0x535   : > { %p4326_p11 = scmp.ne.s32.totalorder %s6847_s14, %s4325_s28  ;;  %p4330_p0 = scmp.lt.u32.totalorder %s6847_s14, %s6901_s9 }
 0x536   : > { %p4331_p1 = scmp.lt.u32.totalorder %s4329_s13, %s4325_s28  ;;  %p4333_p3 = scmp.lt.u32.totalorder %s4325_s28, %s6847_s14 }
 0x537   : > { %p4327_p12 = pnand %p4326_p11, %p4482_p6 }
 0x538   : > { %p4332_p2 = por %p4331_p1, %p4330_p0 }
 0x539   : > { %p4328_p13 = pneg %p4327_p12 }
 0x53a   : > { %p4334_p4 = por %p4333_p3, %p4332_p2 }
 0x53c   : > { %p4335_p5 = pnand %p4334_p4, %p4328_p13 }
 0x53e   : > { %4338 = shalt.err (!%p4335_p5)
}
 0x53f   : > { %4254 = dma.vmem_to_hbm [thread:$0]  (%p4482_p6), %s6849_s29, 128, %s6847_s14, %s2957_s11  }
 0x540 PF: > { %s2982_s27 = sand.u32 1, %s4369_s30   ;;  %p4257_p7 = pnand %p3085_p9, %p4486_p8 }
 0x541   : > { %s2983_s0 = scalar_lea.sflag [#allocation6], %s2982_s27 }
 0x542   : > { %4364 = dma.done.wait (!%p4257_p7), %s2983_s0, 128  }
 0x543   : > { %4366 = vsyncadd (!%p4257_p7), %s2983_s0, 4294967168  ;;  %s6911_s25 = sld [smem:[#allocation8_spill]]  ;;  %s6912_s11 = sld [smem:[#allocation9_spill]] }
 0x544   : > { %p19_p10 = scmp.ge.s32.totalorder %s4467_s15, 4   ;;  %s6913_s30 = smov %s4373_s10 }
 0x545   : > { %s6915_s12 = smov %s4467_s15 }
 0x546   :  { %21 = sbr.rel (!%p19_p10) target bundleno = 5 (0x5), region = 187 }
 0x549   : > { %s6914_s10 = smov %s6911_s25 }
 0x54d   :  { %2988 = vsyncpa [#allocation6], 1 }
 0x54e   :  { %2990 = vsyncpa [#allocation6 + $0x1], 1 }

</bundles_post_ra>
